<compile_context>
chip_gen: v7x
topology: tpu7x:2x2x1
jax: 0.10.0
libtpu: 0.0.40
codegen_flags: <defaults>
</compile_context>

<pallas_src>
import functools

import jax
import jax.numpy as jnp
from jax import lax
from jax.experimental import pallas as pl
from jax.experimental.pallas import tpu as pltpu


def mm_gru_classifier_kernel(*refs, num_layers, hidden, t_sizes):
  """Whole forward (GRU stack + LeakyReLU + 2-layer classifier) in VMEM.

  refs = (x_mod_0, ..., x_mod_{n-1},          # (T_m, B, D) time-major, bf16
          wih_pair, whh_blk, bih_fold, bhh_n, # prepacked GRU weights
          w1, b1, w2, b2,                     # classifier (lane-padded)
          out_ref,                            # (B, out_pad) f32
          gi_ref, seq_ref)                    # VMEM scratch
  """
  n_mod = len(t_sizes)
  x_refs = refs[:n_mod]
  (wih_ref, whh_ref, bih_ref, bhn_ref,
   w1_ref, b1_ref, w2_ref, b2_ref,
   out_ref, gi_ref, seq_ref) = refs[n_mod:]

  H = hidden
  D = 2 * H
  T = sum(t_sizes)
  B = out_ref.shape[0]                      # already padded to a multiple of 8
  # Bounded unroll: full LLO visibility only while the working set is tiny;
  # at realistic H a small factor avoids vreg spills on the serial chain.
  unroll = T if (H < 128 and T <= 32) else 4

  # ---- Assemble concat(dim=1) in time-major layout: one contiguous block ---
  # copy per modality (inputs are already (T_m, B, D)); row (t*B + b) of
  # seq_ref holds timestep t of batch element b.  D == 2H.
  off = 0
  for m in range(n_mod):
    Tm = t_sizes[m]
    seq_ref[off * B:(off + Tm) * B, :] = (
        x_refs[m][...].reshape(Tm * B, D).astype(seq_ref.dtype))
    off += Tm

  def cell(gi3, gh3, bn, h_prev):
    """GRU cell, gate order [r, z, n]; gi3 already contains bih + bhh_{r,z}."""
    rz = jax.nn.sigmoid(gi3[:, :2 * H] + gh3[:, :2 * H])
    r = rz[:, :H]
    z = rz[:, H:]
    n = jnp.tanh(gi3[:, 2 * H:] + r * (gh3[:, 2 * H:] + bn))
    return (1.0 - z) * n + z * h_prev

  h_last = None
  for layer in range(num_layers):               # static, small
    is_last = layer == num_layers - 1
    wih = wih_ref[layer]                        # (D, 6H) bf16: [fwd r,z,n | bwd r,z,n]
    whh_blk = whh_ref[layer]                    # (2H, 6H) bf16 block-diag(whh_f, whh_b)
    bih = bih_ref[layer]                        # (1, 6H) f32, bhh_{r,z} folded in
    # Hoisted broadcast of the n-gate hidden biases (must stay r-gated).
    bn_f = jnp.broadcast_to(bhn_ref[layer][:, :H], (B, H))
    bn_b = jnp.broadcast_to(bhn_ref[layer][:, H:], (B, H))

    # ---- Hoisted input-to-hidden matmul for the whole sequence -------------
    # One big-M bf16 MXU matmul per layer (both directions at once), f32 acc.
    gi_ref[...] = jnp.dot(seq_ref[...], wih,
                          preferred_element_type=jnp.float32) + bih

    h0 = jnp.zeros((B, H), jnp.float32)

    if not is_last:
      # ---- fwd & bwd interleaved; ONE fused recurrent dot per step ---------
      def step(i, carry):
        h_f, h_b = carry
        row_f = pl.multiple_of(i * B, 8)
        row_b = pl.multiple_of((T - 1 - i) * B, 8)
        gi_f = gi_ref[pl.ds(row_f, B), :]          # (B, 6H) f32
        gi_b = gi_ref[pl.ds(row_b, B), :]
        hc = jnp.concatenate([h_f, h_b], axis=-1).astype(jnp.bfloat16)
        gh = jnp.dot(hc, whh_blk, preferred_element_type=jnp.float32)  # (B, 6H)
        h_f = cell(gi_f[:, :3 * H], gh[:, :3 * H], bn_f, h_f)
        h_b = cell(gi_b[:, 3 * H:], gh[:, 3 * H:], bn_b, h_b)
        seq_ref[pl.ds(row_f, B), 0:H] = h_f.astype(seq_ref.dtype)
        seq_ref[pl.ds(row_b, B), H:2 * H] = h_b.astype(seq_ref.dtype)
        return h_f, h_b

      lax.fori_loop(0, T, step, (h0, h0), unroll=unroll)
    else:
      # ---- Last layer: only output[:, -1] is needed --------------------------
      # fwd: full recurrence, carry-only (no sequence stores).
      whh_f = whh_blk[0:H, 0:3 * H]                # (H, 3H) bf16

      def fwd_step(i, h_f):
        row_f = pl.multiple_of(i * B, 8)
        gi_f = gi_ref[pl.ds(row_f, B), :]
        gh_f = jnp.dot(h_f.astype(jnp.bfloat16), whh_f,
                       preferred_element_type=jnp.float32)
        return cell(gi_f[:, :3 * H], gh_f, bn_f, h_f)

      h_f = lax.fori_loop(0, T, fwd_step, h0, unroll=unroll)
      # bwd: exactly one step at t = T-1 from h = 0, so h @ whh_b == 0.
      gi_b = gi_ref[(T - 1) * B:T * B, :]
      gh_b = jnp.zeros((B, 3 * H), jnp.float32)
      h_b = cell(gi_b[:, 3 * H:], gh_b, bn_b, h0)
      h_last = jnp.concatenate([h_f, h_b], axis=-1)      # (B, 2H) f32

  # ---- LeakyReLU(0.2) + SimpleClassifier (Dropout = identity in eval) -------
  feat = jnp.where(h_last > 0, h_last, 0.2 * h_last)
  h1 = jnp.dot(feat, w1_ref[...], preferred_element_type=jnp.float32) + b1_ref[...]
  out = jnp.dot(h1, w2_ref[...], preferred_element_type=jnp.float32) + b2_ref[...]
  out_ref[...] = out.astype(out_ref.dtype)


def init_params(key, in_features, out_features, num_layers, reduction=8):
  """Deterministic synthetic parameters with the shapes implied by __init__."""
  assert in_features % 2 == 0
  D = in_features
  H = in_features // 2
  hid1 = in_features // reduction
  keys = iter(jax.random.split(key, 128))

  def rnd(shape, scale):
    return scale * jax.random.uniform(next(keys), shape, jnp.float32, -1.0, 1.0)

  # Bidirectional GRU: hidden = D//2, so every layer's input size is D and all
  # w_ih share shape (D, 3H). Gate order along 3H: [r, z, n].
  gs = 1.0 / (H ** 0.5)
  wih = jnp.stack([rnd((D, 3 * H), gs) for _ in range(2 * num_layers)])
  whh = jnp.stack([rnd((H, 3 * H), gs) for _ in range(2 * num_layers)])
  bih = jnp.stack([rnd((1, 3 * H), gs) for _ in range(2 * num_layers)])
  bhh = jnp.stack([rnd((1, 3 * H), gs) for _ in range(2 * num_layers)])

  classifiers = {}
  for modality in ['FA', 'ICGA', 'US', 'MM']:
    s1, s2 = 1.0 / (D ** 0.5), 1.0 / (hid1 ** 0.5)
    classifiers[modality] = (rnd((D, hid1), s1), rnd((1, hid1), s1),
                             rnd((hid1, out_features), s2),
                             rnd((1, out_features), s2))
  return {'gru': (wih, whh, bih, bhh), 'classifiers': classifiers}


def mm_dict_classifier_forward(x_dict, params):
  """Wrapper: modality selection + weight prepacking, then one pallas_call."""
  if len(x_dict) == 1:
    modality = list(x_dict.keys())[0]
  else:
    modality = 'MM'

  xs = list(x_dict.values())                       # each (B, T_m, D), batch-first
  t_sizes = tuple(int(x.shape[1]) for x in xs)
  B = int(xs[0].shape[0])
  T = sum(t_sizes)

  wih, whh, bih, bhh = params['gru']
  w1, b1, w2, b2 = params['classifiers'][modality]
  num_layers = int(wih.shape[0] // 2)
  assert num_layers > 0        # TODO(synk): num_layers == 0 path not implemented.
  H = int(whh.shape[-2])
  D = int(wih.shape[-2])
  assert D == 2 * H, "hidden = in_features // 2 with even in_features"
  out_features = int(w2.shape[-1])
  hid1 = int(w1.shape[-1])

  # ---- Batch padded to a sublane multiple; inputs transposed to time-major --
  B_pad = max(8, ((B + 7) // 8) * 8)
  xs_tm = []
  for x in xs:
    xt = jnp.transpose(x, (1, 0, 2)).astype(jnp.bfloat16)     # (T_m, B, D)
    if B_pad != B:
      xt = jnp.pad(xt, ((0, 0), (0, B_pad - B), (0, 0)))
    xs_tm.append(xt)

  # ---- GRU weight prepack ----------------------------------------------------
  # Pair fwd/bwd w_ih along the gate axis: one hoisted matmul -> both directions.
  wih_pair = jnp.concatenate([wih[0::2], wih[1::2]], axis=-1).astype(jnp.bfloat16)
  # Block-diagonal recurrent weights: concat([h_f, h_b]) @ (2H, 6H) fuses the
  # two per-step recurrent dots into a single MXU launch.
  zeros_hh = jnp.zeros_like(whh[0::2])
  whh_blk = jnp.concatenate(
      [jnp.concatenate([whh[0::2], zeros_hh], axis=-1),
       jnp.concatenate([zeros_hh, whh[1::2]], axis=-1)],
      axis=-2).astype(jnp.bfloat16)                              # (L, 2H, 6H)
  # Fold bhh_{r,z} into bih (PyTorch GRU only requires bhh_n to stay inside the
  # r-gated term); keep bhh_n separately.
  bih_pair = jnp.concatenate([bih[0::2], bih[1::2]], axis=-1)    # (L, 1, 6H)
  fold = jnp.concatenate(
      [bhh[0::2][:, :, :2 * H], jnp.zeros_like(bhh[0::2][:, :, 2 * H:]),
       bhh[1::2][:, :, :2 * H], jnp.zeros_like(bhh[1::2][:, :, 2 * H:])],
      axis=-1)
  bih_fold = (bih_pair + fold).astype(jnp.float32)               # (L, 1, 6H)
  bhh_n = jnp.concatenate([bhh[0::2][:, :, 2 * H:], bhh[1::2][:, :, 2 * H:]],
                          axis=-1).astype(jnp.float32)           # (L, 1, 2H)

  # ---- Lane-dense classifier: pad hid1 and out_features to 128 lanes --------
  hid1_pad = max(128, ((hid1 + 127) // 128) * 128)
  out_pad = max(128, ((out_features + 127) // 128) * 128)
  w1p = jnp.zeros((D, hid1_pad), jnp.float32).at[:, :hid1].set(w1)
  b1p = jnp.zeros((1, hid1_pad), jnp.float32).at[:, :hid1].set(b1)
  w2p = jnp.zeros((hid1_pad, out_pad), jnp.float32).at[:hid1, :out_features].set(w2)
  b2p = jnp.zeros((1, out_pad), jnp.float32).at[:, :out_features].set(b2)

  # ---- Explicit scoped-VMEM budget (default 16/32 MiB is too small at scale) -
  weight_args = (wih_pair, whh_blk, bih_fold, bhh_n, w1p, b1p, w2p, b2p)
  in_bytes = sum(int(a.size) * a.dtype.itemsize for a in (*xs_tm, *weight_args))
  scratch_bytes = T * B_pad * 6 * H * 4 + T * B_pad * 2 * H * 2
  out_bytes = B_pad * out_pad * 4
  vmem_limit = min(max(2 * (in_bytes + scratch_bytes + out_bytes) + (2 << 20),
                       32 << 20), 64 << 20)

  kernel = functools.partial(mm_gru_classifier_kernel,
                             num_layers=num_layers, hidden=H, t_sizes=t_sizes)
  vmem_spec = pl.BlockSpec(memory_space=pltpu.MemorySpace.VMEM)
  n_in = len(xs_tm) + len(weight_args)

  out_padded = pl.pallas_call(
      kernel,
      out_shape=jax.ShapeDtypeStruct((B_pad, out_pad), jnp.float32),
      in_specs=[vmem_spec] * n_in,
      out_specs=vmem_spec,
      scratch_shapes=[pltpu.VMEM((T * B_pad, 6 * H), jnp.float32),   # hoisted gates
                      pltpu.VMEM((T * B_pad, 2 * H), jnp.bfloat16)], # time-major seq
      compiler_params=pltpu.CompilerParams(vmem_limit_bytes=int(vmem_limit)),
  )(*xs_tm, *weight_args)
  return out_padded[:B, :out_features]


def reference_forward(x_dict, params, mxu_dtype=None):
  """Pure-JAX reference mirroring the PyTorch semantics.

  mxu_dtype=jnp.bfloat16 mirrors the kernel's bf16 MXU operands (f32 accumulate,
  f32 elementwise) for a tight numerical comparison; None = pure f32 module.
  """
  modality = list(x_dict.keys())[0] if len(x_dict) == 1 else 'MM'
  x = jnp.concatenate(list(x_dict.values()), axis=1)          # (B, T, D)
  wih, whh, bih, bhh = params['gru']
  num_layers = wih.shape[0] // 2
  H = whh.shape[-2]
  B, T, _ = x.shape

  def mm(a, b):
    if mxu_dtype is not None:
      a, b = a.astype(mxu_dtype), b.astype(mxu_dtype)
    return jnp.dot(a, b, preferred_element_type=jnp.float32)

  seq = x.astype(jnp.float32)
  for layer in range(num_layers):
    outs = []
    for direction in range(2):
      idx = layer * 2 + direction
      order = range(T) if direction == 0 else range(T - 1, -1, -1)
      h = jnp.zeros((B, H), jnp.float32)
      buf = [None] * T
      for t in order:
        gi = mm(seq[:, t, :], wih[idx]) + bih[idx]
        gh = mm(h, whh[idx]) + bhh[idx]
        r = jax.nn.sigmoid(gi[:, :H] + gh[:, :H])
        z = jax.nn.sigmoid(gi[:, H:2 * H] + gh[:, H:2 * H])
        n = jnp.tanh(gi[:, 2 * H:] + r * gh[:, 2 * H:])
        h = (1.0 - z) * n + z * h
        buf[t] = h
      outs.append(jnp.stack(buf, axis=1))
    seq = jnp.concatenate(outs, axis=-1)
  last = seq[:, -1, :]
  feat = jnp.where(last > 0, last, 0.2 * last)
  w1, b1, w2, b2 = params['classifiers'][modality]
  return (feat @ w1 + b1) @ w2 + b2


if __name__ == "__main__":
  B, in_features, out_features, num_layers, reduction = 2, 32, 3, 2, 8
  key = jax.random.PRNGKey(0)
  pkey, k1, k2, k3 = jax.random.split(key, 4)
  params = init_params(pkey, in_features, out_features, num_layers, reduction)

  # Multi-modal dict input -> modality 'MM'; sequences concat along dim=1.
  x_dict = {
      'FA':   jax.random.normal(k1, (B, 4, in_features), jnp.float32),
      'ICGA': jax.random.normal(k2, (B, 3, in_features), jnp.float32),
      'US':   jax.random.normal(k3, (B, 2, in_features), jnp.float32),
  }

  out = jax.block_until_ready(mm_dict_classifier_forward(x_dict, params))
  assert out.shape == (B, out_features)

  # Tight check vs a reference with matching bf16 MXU-operand rounding, plus a
  # looser sanity check vs the pure-f32 module semantics.
  ref_bf16 = reference_forward(x_dict, params, mxu_dtype=jnp.bfloat16)
  ref_f32 = reference_forward(x_dict, params)
  assert bool(jnp.allclose(out, ref_bf16, rtol=5e-3, atol=5e-3)), (out, ref_bf16)
  assert bool(jnp.allclose(out, ref_f32, rtol=1e-1, atol=1e-1)), (out, ref_f32)
  print("KERNEL_OK")
</pallas_src>

<mosaic_0001>
module attributes {stable_mosaic.version = 11 : i64} {
  func.func @mm_gru_classifier_kernel(%arg0: memref<4x8x32xbf16, #tpu.memory_space<vmem>>, %arg1: memref<3x8x32xbf16, #tpu.memory_space<vmem>>, %arg2: memref<2x8x32xbf16, #tpu.memory_space<vmem>>, %arg3: memref<2x32x96xbf16, #tpu.memory_space<vmem>>, %arg4: memref<2x32x96xbf16, #tpu.memory_space<vmem>>, %arg5: memref<2x1x96xf32, #tpu.memory_space<vmem>>, %arg6: memref<2x1x32xf32, #tpu.memory_space<vmem>>, %arg7: memref<32x128xf32, #tpu.memory_space<vmem>>, %arg8: memref<1x128xf32, #tpu.memory_space<vmem>>, %arg9: memref<128x128xf32, #tpu.memory_space<vmem>>, %arg10: memref<1x128xf32, #tpu.memory_space<vmem>>, %arg11: memref<8x128xf32, #tpu.memory_space<vmem>>, %arg12: memref<72x96xf32, #tpu.memory_space<vmem>>, %arg13: memref<72x32xbf16, #tpu.memory_space<vmem>>) attributes {dimension_semantics = [], scalar_prefetch = 0 : i64, scratch_operands = 2 : i64, tpu.core_type = #tpu.core_type<tc>} {
    %c0 = arith.constant 0 : index
    %c0_0 = arith.constant 0 : index
    %c0_1 = arith.constant 0 : index
    %0 = vector.load %arg0[%c0, %c0_0, %c0_1] : memref<4x8x32xbf16, #tpu.memory_space<vmem>>, vector<4x8x32xbf16>
    %1 = vector.shape_cast %0 : vector<4x8x32xbf16> to vector<32x32xbf16>
    %c0_2 = arith.constant 0 : index
    %c0_3 = arith.constant 0 : index
    %2 = vector.load %arg13[%c0_2, %c0_3] : memref<72x32xbf16, #tpu.memory_space<vmem>>, vector<32x32xbf16>
    tpu.vector_store %arg13[%c0_2, %c0_3], %1 {strides = array<i32>} : memref<72x32xbf16, #tpu.memory_space<vmem>>, vector<32x32xbf16>,
    %c0_4 = arith.constant 0 : index
    %c0_5 = arith.constant 0 : index
    %c0_6 = arith.constant 0 : index
    %3 = vector.load %arg1[%c0_4, %c0_5, %c0_6] : memref<3x8x32xbf16, #tpu.memory_space<vmem>>, vector<3x8x32xbf16>
    %4 = vector.shape_cast %3 : vector<3x8x32xbf16> to vector<24x32xbf16>
    %c32 = arith.constant 32 : index
    %c0_7 = arith.constant 0 : index
    %5 = vector.load %arg13[%c32, %c0_7] : memref<72x32xbf16, #tpu.memory_space<vmem>>, vector<24x32xbf16>
    tpu.vector_store %arg13[%c32, %c0_7], %4 {strides = array<i32>} : memref<72x32xbf16, #tpu.memory_space<vmem>>, vector<24x32xbf16>,
    %c0_8 = arith.constant 0 : index
    %c0_9 = arith.constant 0 : index
    %c0_10 = arith.constant 0 : index
    %6 = vector.load %arg2[%c0_8, %c0_9, %c0_10] : memref<2x8x32xbf16, #tpu.memory_space<vmem>>, vector<2x8x32xbf16>
    %7 = vector.shape_cast %6 : vector<2x8x32xbf16> to vector<16x32xbf16>
    %c56 = arith.constant 56 : index
    %c0_11 = arith.constant 0 : index
    %8 = vector.load %arg13[%c56, %c0_11] : memref<72x32xbf16, #tpu.memory_space<vmem>>, vector<16x32xbf16>
    tpu.vector_store %arg13[%c56, %c0_11], %7 {strides = array<i32>} : memref<72x32xbf16, #tpu.memory_space<vmem>>, vector<16x32xbf16>,
    %c0_12 = arith.constant 0 : index
    %c0_13 = arith.constant 0 : index
    %c0_14 = arith.constant 0 : index
    %9 = vector.load %arg3[%c0_12, %c0_13, %c0_14] : memref<2x32x96xbf16, #tpu.memory_space<vmem>>, vector<1x32x96xbf16>
    %10 = vector.shape_cast %9 : vector<1x32x96xbf16> to vector<32x96xbf16>
    %c0_15 = arith.constant 0 : index
    %c0_16 = arith.constant 0 : index
    %c0_17 = arith.constant 0 : index
    %11 = vector.load %arg4[%c0_15, %c0_16, %c0_17] : memref<2x32x96xbf16, #tpu.memory_space<vmem>>, vector<1x32x96xbf16>
    %12 = vector.shape_cast %11 : vector<1x32x96xbf16> to vector<32x96xbf16>
    %c0_18 = arith.constant 0 : index
    %c0_19 = arith.constant 0 : index
    %c0_20 = arith.constant 0 : index
    %13 = vector.load %arg5[%c0_18, %c0_19, %c0_20] : memref<2x1x96xf32, #tpu.memory_space<vmem>>, vector<1x1x96xf32>
    %14 = vector.shape_cast %13 : vector<1x1x96xf32> to vector<1x96xf32>
    %c0_21 = arith.constant 0 : index
    %c0_22 = arith.constant 0 : index
    %c0_23 = arith.constant 0 : index
    %15 = vector.load %arg6[%c0_21, %c0_22, %c0_23] : memref<2x1x32xf32, #tpu.memory_space<vmem>>, vector<1x1x32xf32>
    %16 = vector.shape_cast %15 : vector<1x1x32xf32> to vector<1x32xf32>
    %17 = vector.extract_strided_slice %16 {offsets = [0, 0], sizes = [1, 16], strides = [1, 1]} : vector<1x32xf32> to vector<1x16xf32>
    %18 = vector.shape_cast %17 : vector<1x16xf32> to vector<1x16xf32>
    %19 = vector.broadcast %18 : vector<1x16xf32> to vector<8x16xf32>
    %c0_24 = arith.constant 0 : index
    %c0_25 = arith.constant 0 : index
    %c0_26 = arith.constant 0 : index
    %20 = vector.load %arg6[%c0_24, %c0_25, %c0_26] : memref<2x1x32xf32, #tpu.memory_space<vmem>>, vector<1x1x32xf32>
    %21 = vector.shape_cast %20 : vector<1x1x32xf32> to vector<1x32xf32>
    %22 = vector.extract_strided_slice %21 {offsets = [0, 16], sizes = [1, 16], strides = [1, 1]} : vector<1x32xf32> to vector<1x16xf32>
    %23 = vector.shape_cast %22 : vector<1x16xf32> to vector<1x16xf32>
    %24 = vector.broadcast %23 : vector<1x16xf32> to vector<8x16xf32>
    %c0_27 = arith.constant 0 : index
    %c0_28 = arith.constant 0 : index
    %25 = vector.load %arg13[%c0_27, %c0_28] : memref<72x32xbf16, #tpu.memory_space<vmem>>, vector<72x32xbf16>
    %cst = arith.constant dense<0.000000e+00> : vector<72x96xf32>
    %26 = tpu.matmul %25, %10, %cst {dimension_numbers = #tpu.dot_dimension_numbers<[1], [0], [0], [1], [0, 0, 1, 1], [], []>} : vector<72x32xbf16>, vector<32x96xbf16>, vector<72x96xf32> -> vector<72x96xf32>
    %27 = vector.broadcast %14 : vector<1x96xf32> to vector<72x96xf32>
    %28 = arith.addf %26, %27 : vector<72x96xf32>
    %c0_29 = arith.constant 0 : index
    %c0_30 = arith.constant 0 : index
    %29 = vector.load %arg12[%c0_29, %c0_30] : memref<72x96xf32, #tpu.memory_space<vmem>>, vector<72x96xf32>
    tpu.vector_store %arg12[%c0_29, %c0_30], %28 {strides = array<i32>} : memref<72x96xf32, #tpu.memory_space<vmem>>, vector<72x96xf32>,
    %cst_31 = arith.constant 0.000000e+00 : f32
    %30 = vector.broadcast %cst_31 : f32 to vector<8x16xf32>
    %c0_i32 = arith.constant 0 : i32
    %c8_i32 = arith.constant 8 : i32
    %31 = arith.muli %c0_i32, %c8_i32 : i32
    %32 = tpu.assume_multiple %31, 8 : i32
    %c8_i32_32 = arith.constant 8 : i32
    %33 = arith.subi %c8_i32_32, %c0_i32 : i32
    %c8_i32_33 = arith.constant 8 : i32
    %34 = arith.muli %33, %c8_i32_33 : i32
    %35 = tpu.assume_multiple %34, 8 : i32
    %36 = arith.index_cast %32 : i32 to index
    %c0_34 = arith.constant 0 : index
    %37 = vector.load %arg12[%36, %c0_34] : memref<72x96xf32, #tpu.memory_space<vmem>>, vector<8x96xf32>
    %38 = arith.index_cast %35 : i32 to index
    %c0_35 = arith.constant 0 : index
    %39 = vector.load %arg12[%38, %c0_35] : memref<72x96xf32, #tpu.memory_space<vmem>>, vector<8x96xf32>
    %40 = tpu.concatenate %30, %30 in 1 : vector<8x16xf32>, vector<8x16xf32> -> vector<8x32xf32>
    %41 = arith.truncf %40 : vector<8x32xf32> to vector<8x32xbf16>
    %cst_36 = arith.constant dense<0.000000e+00> : vector<8x96xf32>
    %42 = tpu.matmul %41, %12, %cst_36 {dimension_numbers = #tpu.dot_dimension_numbers<[1], [0], [0], [1], [0, 0, 1, 1], [], []>} : vector<8x32xbf16>, vector<32x96xbf16>, vector<8x96xf32> -> vector<8x96xf32>
    %43 = vector.extract_strided_slice %37 {offsets = [0, 0], sizes = [8, 48], strides = [1, 1]} : vector<8x96xf32> to vector<8x48xf32>
    %44 = vector.extract_strided_slice %42 {offsets = [0, 0], sizes = [8, 48], strides = [1, 1]} : vector<8x96xf32> to vector<8x48xf32>
    %45 = vector.extract_strided_slice %43 {offsets = [0, 0], sizes = [8, 32], strides = [1, 1]} : vector<8x48xf32> to vector<8x32xf32>
    %46 = vector.extract_strided_slice %44 {offsets = [0, 0], sizes = [8, 32], strides = [1, 1]} : vector<8x48xf32> to vector<8x32xf32>
    %47 = arith.addf %45, %46 : vector<8x32xf32>
    %48 = arith.negf %47 : vector<8x32xf32>
    %49 = math.exp %48 : vector<8x32xf32>
    %cst_37 = arith.constant 1.000000e+00 : f32
    %50 = vector.broadcast %cst_37 : f32 to vector<8x32xf32>
    %51 = arith.addf %50, %49 : vector<8x32xf32>
    %52 = arith.divf %50, %51 : vector<8x32xf32>
    %53 = vector.extract_strided_slice %52 {offsets = [0, 0], sizes = [8, 16], strides = [1, 1]} : vector<8x32xf32> to vector<8x16xf32>
    %54 = vector.extract_strided_slice %52 {offsets = [0, 16], sizes = [8, 16], strides = [1, 1]} : vector<8x32xf32> to vector<8x16xf32>
    %55 = vector.extract_strided_slice %43 {offsets = [0, 32], sizes = [8, 16], strides = [1, 1]} : vector<8x48xf32> to vector<8x16xf32>
    %56 = vector.extract_strided_slice %44 {offsets = [0, 32], sizes = [8, 16], strides = [1, 1]} : vector<8x48xf32> to vector<8x16xf32>
    %57 = arith.addf %56, %19 : vector<8x16xf32>
    %58 = arith.mulf %53, %57 : vector<8x16xf32>
    %59 = arith.addf %55, %58 : vector<8x16xf32>
    %60 = math.tanh %59 : vector<8x16xf32>
    %cst_38 = arith.constant 1.000000e+00 : f32
    %61 = vector.broadcast %cst_38 : f32 to vector<8x16xf32>
    %62 = arith.subf %61, %54 : vector<8x16xf32>
    %63 = arith.mulf %62, %60 : vector<8x16xf32>
    %64 = arith.mulf %54, %30 : vector<8x16xf32>
    %65 = arith.addf %63, %64 : vector<8x16xf32>
    %66 = vector.extract_strided_slice %39 {offsets = [0, 48], sizes = [8, 48], strides = [1, 1]} : vector<8x96xf32> to vector<8x48xf32>
    %67 = vector.extract_strided_slice %42 {offsets = [0, 48], sizes = [8, 48], strides = [1, 1]} : vector<8x96xf32> to vector<8x48xf32>
    %68 = vector.extract_strided_slice %66 {offsets = [0, 0], sizes = [8, 32], strides = [1, 1]} : vector<8x48xf32> to vector<8x32xf32>
    %69 = vector.extract_strided_slice %67 {offsets = [0, 0], sizes = [8, 32], strides = [1, 1]} : vector<8x48xf32> to vector<8x32xf32>
    %70 = arith.addf %68, %69 : vector<8x32xf32>
    %71 = arith.negf %70 : vector<8x32xf32>
    %72 = math.exp %71 : vector<8x32xf32>
    %cst_39 = arith.constant 1.000000e+00 : f32
    %73 = vector.broadcast %cst_39 : f32 to vector<8x32xf32>
    %74 = arith.addf %73, %72 : vector<8x32xf32>
    %75 = arith.divf %73, %74 : vector<8x32xf32>
    %76 = vector.extract_strided_slice %75 {offsets = [0, 0], sizes = [8, 16], strides = [1, 1]} : vector<8x32xf32> to vector<8x16xf32>
    %77 = vector.extract_strided_slice %75 {offsets = [0, 16], sizes = [8, 16], strides = [1, 1]} : vector<8x32xf32> to vector<8x16xf32>
    %78 = vector.extract_strided_slice %66 {offsets = [0, 32], sizes = [8, 16], strides = [1, 1]} : vector<8x48xf32> to vector<8x16xf32>
    %79 = vector.extract_strided_slice %67 {offsets = [0, 32], sizes = [8, 16], strides = [1, 1]} : vector<8x48xf32> to vector<8x16xf32>
    %80 = arith.addf %79, %24 : vector<8x16xf32>
    %81 = arith.mulf %76, %80 : vector<8x16xf32>
    %82 = arith.addf %78, %81 : vector<8x16xf32>
    %83 = math.tanh %82 : vector<8x16xf32>
    %cst_40 = arith.constant 1.000000e+00 : f32
    %84 = vector.broadcast %cst_40 : f32 to vector<8x16xf32>
    %85 = arith.subf %84, %77 : vector<8x16xf32>
    %86 = arith.mulf %85, %83 : vector<8x16xf32>
    %87 = arith.mulf %77, %30 : vector<8x16xf32>
    %88 = arith.addf %86, %87 : vector<8x16xf32>
    %89 = arith.truncf %65 : vector<8x16xf32> to vector<8x16xbf16>
    %90 = arith.index_cast %32 : i32 to index
    %c0_41 = arith.constant 0 : index
    %91 = vector.load %arg13[%90, %c0_41] : memref<72x32xbf16, #tpu.memory_space<vmem>>, vector<8x16xbf16>
    tpu.vector_store %arg13[%90, %c0_41], %89 {strides = array<i32>} : memref<72x32xbf16, #tpu.memory_space<vmem>>, vector<8x16xbf16>,
    %92 = arith.truncf %88 : vector<8x16xf32> to vector<8x16xbf16>
    %93 = arith.index_cast %35 : i32 to index
    %c16 = arith.constant 16 : index
    %94 = vector.load %arg13[%93, %c16] : memref<72x32xbf16, #tpu.memory_space<vmem>>, vector<8x16xbf16>
    tpu.vector_store %arg13[%93, %c16], %92 {strides = array<i32>} : memref<72x32xbf16, #tpu.memory_space<vmem>>, vector<8x16xbf16>,
    %c1_i32 = arith.constant 1 : i32
    %c8_i32_42 = arith.constant 8 : i32
    %95 = arith.muli %c1_i32, %c8_i32_42 : i32
    %96 = tpu.assume_multiple %95, 8 : i32
    %c8_i32_43 = arith.constant 8 : i32
    %97 = arith.subi %c8_i32_43, %c1_i32 : i32
    %c8_i32_44 = arith.constant 8 : i32
    %98 = arith.muli %97, %c8_i32_44 : i32
    %99 = tpu.assume_multiple %98, 8 : i32
    %100 = arith.index_cast %96 : i32 to index
    %c0_45 = arith.constant 0 : index
    %101 = vector.load %arg12[%100, %c0_45] : memref<72x96xf32, #tpu.memory_space<vmem>>, vector<8x96xf32>
    %102 = arith.index_cast %99 : i32 to index
    %c0_46 = arith.constant 0 : index
    %103 = vector.load %arg12[%102, %c0_46] : memref<72x96xf32, #tpu.memory_space<vmem>>, vector<8x96xf32>
    %104 = tpu.concatenate %65, %88 in 1 : vector<8x16xf32>, vector<8x16xf32> -> vector<8x32xf32>
    %105 = arith.truncf %104 : vector<8x32xf32> to vector<8x32xbf16>
    %cst_47 = arith.constant dense<0.000000e+00> : vector<8x96xf32>
    %106 = tpu.matmul %105, %12, %cst_47 {dimension_numbers = #tpu.dot_dimension_numbers<[1], [0], [0], [1], [0, 0, 1, 1], [], []>} : vector<8x32xbf16>, vector<32x96xbf16>, vector<8x96xf32> -> vector<8x96xf32>
    %107 = vector.extract_strided_slice %101 {offsets = [0, 0], sizes = [8, 48], strides = [1, 1]} : vector<8x96xf32> to vector<8x48xf32>
    %108 = vector.extract_strided_slice %106 {offsets = [0, 0], sizes = [8, 48], strides = [1, 1]} : vector<8x96xf32> to vector<8x48xf32>
    %109 = vector.extract_strided_slice %107 {offsets = [0, 0], sizes = [8, 32], strides = [1, 1]} : vector<8x48xf32> to vector<8x32xf32>
    %110 = vector.extract_strided_slice %108 {offsets = [0, 0], sizes = [8, 32], strides = [1, 1]} : vector<8x48xf32> to vector<8x32xf32>
    %111 = arith.addf %109, %110 : vector<8x32xf32>
    %112 = arith.negf %111 : vector<8x32xf32>
    %113 = math.exp %112 : vector<8x32xf32>
    %cst_48 = arith.constant 1.000000e+00 : f32
    %114 = vector.broadcast %cst_48 : f32 to vector<8x32xf32>
    %115 = arith.addf %114, %113 : vector<8x32xf32>
    %116 = arith.divf %114, %115 : vector<8x32xf32>
    %117 = vector.extract_strided_slice %116 {offsets = [0, 0], sizes = [8, 16], strides = [1, 1]} : vector<8x32xf32> to vector<8x16xf32>
    %118 = vector.extract_strided_slice %116 {offsets = [0, 16], sizes = [8, 16], strides = [1, 1]} : vector<8x32xf32> to vector<8x16xf32>
    %119 = vector.extract_strided_slice %107 {offsets = [0, 32], sizes = [8, 16], strides = [1, 1]} : vector<8x48xf32> to vector<8x16xf32>
    %120 = vector.extract_strided_slice %108 {offsets = [0, 32], sizes = [8, 16], strides = [1, 1]} : vector<8x48xf32> to vector<8x16xf32>
    %121 = arith.addf %120, %19 : vector<8x16xf32>
    %122 = arith.mulf %117, %121 : vector<8x16xf32>
    %123 = arith.addf %119, %122 : vector<8x16xf32>
    %124 = math.tanh %123 : vector<8x16xf32>
    %cst_49 = arith.constant 1.000000e+00 : f32
    %125 = vector.broadcast %cst_49 : f32 to vector<8x16xf32>
    %126 = arith.subf %125, %118 : vector<8x16xf32>
    %127 = arith.mulf %126, %124 : vector<8x16xf32>
    %128 = arith.mulf %118, %65 : vector<8x16xf32>
    %129 = arith.addf %127, %128 : vector<8x16xf32>
    %130 = vector.extract_strided_slice %103 {offsets = [0, 48], sizes = [8, 48], strides = [1, 1]} : vector<8x96xf32> to vector<8x48xf32>
    %131 = vector.extract_strided_slice %106 {offsets = [0, 48], sizes = [8, 48], strides = [1, 1]} : vector<8x96xf32> to vector<8x48xf32>
    %132 = vector.extract_strided_slice %130 {offsets = [0, 0], sizes = [8, 32], strides = [1, 1]} : vector<8x48xf32> to vector<8x32xf32>
    %133 = vector.extract_strided_slice %131 {offsets = [0, 0], sizes = [8, 32], strides = [1, 1]} : vector<8x48xf32> to vector<8x32xf32>
    %134 = arith.addf %132, %133 : vector<8x32xf32>
    %135 = arith.negf %134 : vector<8x32xf32>
    %136 = math.exp %135 : vector<8x32xf32>
    %cst_50 = arith.constant 1.000000e+00 : f32
    %137 = vector.broadcast %cst_50 : f32 to vector<8x32xf32>
    %138 = arith.addf %137, %136 : vector<8x32xf32>
    %139 = arith.divf %137, %138 : vector<8x32xf32>
    %140 = vector.extract_strided_slice %139 {offsets = [0, 0], sizes = [8, 16], strides = [1, 1]} : vector<8x32xf32> to vector<8x16xf32>
    %141 = vector.extract_strided_slice %139 {offsets = [0, 16], sizes = [8, 16], strides = [1, 1]} : vector<8x32xf32> to vector<8x16xf32>
    %142 = vector.extract_strided_slice %130 {offsets = [0, 32], sizes = [8, 16], strides = [1, 1]} : vector<8x48xf32> to vector<8x16xf32>
    %143 = vector.extract_strided_slice %131 {offsets = [0, 32], sizes = [8, 16], strides = [1, 1]} : vector<8x48xf32> to vector<8x16xf32>
    %144 = arith.addf %143, %24 : vector<8x16xf32>
    %145 = arith.mulf %140, %144 : vector<8x16xf32>
    %146 = arith.addf %142, %145 : vector<8x16xf32>
    %147 = math.tanh %146 : vector<8x16xf32>
    %cst_51 = arith.constant 1.000000e+00 : f32
    %148 = vector.broadcast %cst_51 : f32 to vector<8x16xf32>
    %149 = arith.subf %148, %141 : vector<8x16xf32>
    %150 = arith.mulf %149, %147 : vector<8x16xf32>
    %151 = arith.mulf %141, %88 : vector<8x16xf32>
    %152 = arith.addf %150, %151 : vector<8x16xf32>
    %153 = arith.truncf %129 : vector<8x16xf32> to vector<8x16xbf16>
    %154 = arith.index_cast %96 : i32 to index
    %c0_52 = arith.constant 0 : index
    %155 = vector.load %arg13[%154, %c0_52] : memref<72x32xbf16, #tpu.memory_space<vmem>>, vector<8x16xbf16>
    tpu.vector_store %arg13[%154, %c0_52], %153 {strides = array<i32>} : memref<72x32xbf16, #tpu.memory_space<vmem>>, vector<8x16xbf16>,
    %156 = arith.truncf %152 : vector<8x16xf32> to vector<8x16xbf16>
    %157 = arith.index_cast %99 : i32 to index
    %c16_53 = arith.constant 16 : index
    %158 = vector.load %arg13[%157, %c16_53] : memref<72x32xbf16, #tpu.memory_space<vmem>>, vector<8x16xbf16>
    tpu.vector_store %arg13[%157, %c16_53], %156 {strides = array<i32>} : memref<72x32xbf16, #tpu.memory_space<vmem>>, vector<8x16xbf16>,
    %c2_i32 = arith.constant 2 : i32
    %c8_i32_54 = arith.constant 8 : i32
    %159 = arith.muli %c2_i32, %c8_i32_54 : i32
    %160 = tpu.assume_multiple %159, 8 : i32
    %c8_i32_55 = arith.constant 8 : i32
    %161 = arith.subi %c8_i32_55, %c2_i32 : i32
    %c8_i32_56 = arith.constant 8 : i32
    %162 = arith.muli %161, %c8_i32_56 : i32
    %163 = tpu.assume_multiple %162, 8 : i32
    %164 = arith.index_cast %160 : i32 to index
    %c0_57 = arith.constant 0 : index
    %165 = vector.load %arg12[%164, %c0_57] : memref<72x96xf32, #tpu.memory_space<vmem>>, vector<8x96xf32>
    %166 = arith.index_cast %163 : i32 to index
    %c0_58 = arith.constant 0 : index
    %167 = vector.load %arg12[%166, %c0_58] : memref<72x96xf32, #tpu.memory_space<vmem>>, vector<8x96xf32>
    %168 = tpu.concatenate %129, %152 in 1 : vector<8x16xf32>, vector<8x16xf32> -> vector<8x32xf32>
    %169 = arith.truncf %168 : vector<8x32xf32> to vector<8x32xbf16>
    %cst_59 = arith.constant dense<0.000000e+00> : vector<8x96xf32>
    %170 = tpu.matmul %169, %12, %cst_59 {dimension_numbers = #tpu.dot_dimension_numbers<[1], [0], [0], [1], [0, 0, 1, 1], [], []>} : vector<8x32xbf16>, vector<32x96xbf16>, vector<8x96xf32> -> vector<8x96xf32>
    %171 = vector.extract_strided_slice %165 {offsets = [0, 0], sizes = [8, 48], strides = [1, 1]} : vector<8x96xf32> to vector<8x48xf32>
    %172 = vector.extract_strided_slice %170 {offsets = [0, 0], sizes = [8, 48], strides = [1, 1]} : vector<8x96xf32> to vector<8x48xf32>
    %173 = vector.extract_strided_slice %171 {offsets = [0, 0], sizes = [8, 32], strides = [1, 1]} : vector<8x48xf32> to vector<8x32xf32>
    %174 = vector.extract_strided_slice %172 {offsets = [0, 0], sizes = [8, 32], strides = [1, 1]} : vector<8x48xf32> to vector<8x32xf32>
    %175 = arith.addf %173, %174 : vector<8x32xf32>
    %176 = arith.negf %175 : vector<8x32xf32>
    %177 = math.exp %176 : vector<8x32xf32>
    %cst_60 = arith.constant 1.000000e+00 : f32
    %178 = vector.broadcast %cst_60 : f32 to vector<8x32xf32>
    %179 = arith.addf %178, %177 : vector<8x32xf32>
    %180 = arith.divf %178, %179 : vector<8x32xf32>
    %181 = vector.extract_strided_slice %180 {offsets = [0, 0], sizes = [8, 16], strides = [1, 1]} : vector<8x32xf32> to vector<8x16xf32>
    %182 = vector.extract_strided_slice %180 {offsets = [0, 16], sizes = [8, 16], strides = [1, 1]} : vector<8x32xf32> to vector<8x16xf32>
    %183 = vector.extract_strided_slice %171 {offsets = [0, 32], sizes = [8, 16], strides = [1, 1]} : vector<8x48xf32> to vector<8x16xf32>
    %184 = vector.extract_strided_slice %172 {offsets = [0, 32], sizes = [8, 16], strides = [1, 1]} : vector<8x48xf32> to vector<8x16xf32>
    %185 = arith.addf %184, %19 : vector<8x16xf32>
    %186 = arith.mulf %181, %185 : vector<8x16xf32>
    %187 = arith.addf %183, %186 : vector<8x16xf32>
    %188 = math.tanh %187 : vector<8x16xf32>
    %cst_61 = arith.constant 1.000000e+00 : f32
    %189 = vector.broadcast %cst_61 : f32 to vector<8x16xf32>
    %190 = arith.subf %189, %182 : vector<8x16xf32>
    %191 = arith.mulf %190, %188 : vector<8x16xf32>
    %192 = arith.mulf %182, %129 : vector<8x16xf32>
    %193 = arith.addf %191, %192 : vector<8x16xf32>
    %194 = vector.extract_strided_slice %167 {offsets = [0, 48], sizes = [8, 48], strides = [1, 1]} : vector<8x96xf32> to vector<8x48xf32>
    %195 = vector.extract_strided_slice %170 {offsets = [0, 48], sizes = [8, 48], strides = [1, 1]} : vector<8x96xf32> to vector<8x48xf32>
    %196 = vector.extract_strided_slice %194 {offsets = [0, 0], sizes = [8, 32], strides = [1, 1]} : vector<8x48xf32> to vector<8x32xf32>
    %197 = vector.extract_strided_slice %195 {offsets = [0, 0], sizes = [8, 32], strides = [1, 1]} : vector<8x48xf32> to vector<8x32xf32>
    %198 = arith.addf %196, %197 : vector<8x32xf32>
    %199 = arith.negf %198 : vector<8x32xf32>
    %200 = math.exp %199 : vector<8x32xf32>
    %cst_62 = arith.constant 1.000000e+00 : f32
    %201 = vector.broadcast %cst_62 : f32 to vector<8x32xf32>
    %202 = arith.addf %201, %200 : vector<8x32xf32>
    %203 = arith.divf %201, %202 : vector<8x32xf32>
    %204 = vector.extract_strided_slice %203 {offsets = [0, 0], sizes = [8, 16], strides = [1, 1]} : vector<8x32xf32> to vector<8x16xf32>
    %205 = vector.extract_strided_slice %203 {offsets = [0, 16], sizes = [8, 16], strides = [1, 1]} : vector<8x32xf32> to vector<8x16xf32>
    %206 = vector.extract_strided_slice %194 {offsets = [0, 32], sizes = [8, 16], strides = [1, 1]} : vector<8x48xf32> to vector<8x16xf32>
    %207 = vector.extract_strided_slice %195 {offsets = [0, 32], sizes = [8, 16], strides = [1, 1]} : vector<8x48xf32> to vector<8x16xf32>
    %208 = arith.addf %207, %24 : vector<8x16xf32>
    %209 = arith.mulf %204, %208 : vector<8x16xf32>
    %210 = arith.addf %206, %209 : vector<8x16xf32>
    %211 = math.tanh %210 : vector<8x16xf32>
    %cst_63 = arith.constant 1.000000e+00 : f32
    %212 = vector.broadcast %cst_63 : f32 to vector<8x16xf32>
    %213 = arith.subf %212, %205 : vector<8x16xf32>
    %214 = arith.mulf %213, %211 : vector<8x16xf32>
    %215 = arith.mulf %205, %152 : vector<8x16xf32>
    %216 = arith.addf %214, %215 : vector<8x16xf32>
    %217 = arith.truncf %193 : vector<8x16xf32> to vector<8x16xbf16>
    %218 = arith.index_cast %160 : i32 to index
    %c0_64 = arith.constant 0 : index
    %219 = vector.load %arg13[%218, %c0_64] : memref<72x32xbf16, #tpu.memory_space<vmem>>, vector<8x16xbf16>
    tpu.vector_store %arg13[%218, %c0_64], %217 {strides = array<i32>} : memref<72x32xbf16, #tpu.memory_space<vmem>>, vector<8x16xbf16>,
    %220 = arith.truncf %216 : vector<8x16xf32> to vector<8x16xbf16>
    %221 = arith.index_cast %163 : i32 to index
    %c16_65 = arith.constant 16 : index
    %222 = vector.load %arg13[%221, %c16_65] : memref<72x32xbf16, #tpu.memory_space<vmem>>, vector<8x16xbf16>
    tpu.vector_store %arg13[%221, %c16_65], %220 {strides = array<i32>} : memref<72x32xbf16, #tpu.memory_space<vmem>>, vector<8x16xbf16>,
    %c3_i32 = arith.constant 3 : i32
    %c8_i32_66 = arith.constant 8 : i32
    %223 = arith.muli %c3_i32, %c8_i32_66 : i32
    %224 = tpu.assume_multiple %223, 8 : i32
    %c8_i32_67 = arith.constant 8 : i32
    %225 = arith.subi %c8_i32_67, %c3_i32 : i32
    %c8_i32_68 = arith.constant 8 : i32
    %226 = arith.muli %225, %c8_i32_68 : i32
    %227 = tpu.assume_multiple %226, 8 : i32
    %228 = arith.index_cast %224 : i32 to index
    %c0_69 = arith.constant 0 : index
    %229 = vector.load %arg12[%228, %c0_69] : memref<72x96xf32, #tpu.memory_space<vmem>>, vector<8x96xf32>
    %230 = arith.index_cast %227 : i32 to index
    %c0_70 = arith.constant 0 : index
    %231 = vector.load %arg12[%230, %c0_70] : memref<72x96xf32, #tpu.memory_space<vmem>>, vector<8x96xf32>
    %232 = tpu.concatenate %193, %216 in 1 : vector<8x16xf32>, vector<8x16xf32> -> vector<8x32xf32>
    %233 = arith.truncf %232 : vector<8x32xf32> to vector<8x32xbf16>
    %cst_71 = arith.constant dense<0.000000e+00> : vector<8x96xf32>
    %234 = tpu.matmul %233, %12, %cst_71 {dimension_numbers = #tpu.dot_dimension_numbers<[1], [0], [0], [1], [0, 0, 1, 1], [], []>} : vector<8x32xbf16>, vector<32x96xbf16>, vector<8x96xf32> -> vector<8x96xf32>
    %235 = vector.extract_strided_slice %229 {offsets = [0, 0], sizes = [8, 48], strides = [1, 1]} : vector<8x96xf32> to vector<8x48xf32>
    %236 = vector.extract_strided_slice %234 {offsets = [0, 0], sizes = [8, 48], strides = [1, 1]} : vector<8x96xf32> to vector<8x48xf32>
    %237 = vector.extract_strided_slice %235 {offsets = [0, 0], sizes = [8, 32], strides = [1, 1]} : vector<8x48xf32> to vector<8x32xf32>
    %238 = vector.extract_strided_slice %236 {offsets = [0, 0], sizes = [8, 32], strides = [1, 1]} : vector<8x48xf32> to vector<8x32xf32>
    %239 = arith.addf %237, %238 : vector<8x32xf32>
    %240 = arith.negf %239 : vector<8x32xf32>
    %241 = math.exp %240 : vector<8x32xf32>
    %cst_72 = arith.constant 1.000000e+00 : f32
    %242 = vector.broadcast %cst_72 : f32 to vector<8x32xf32>
    %243 = arith.addf %242, %241 : vector<8x32xf32>
    %244 = arith.divf %242, %243 : vector<8x32xf32>
    %245 = vector.extract_strided_slice %244 {offsets = [0, 0], sizes = [8, 16], strides = [1, 1]} : vector<8x32xf32> to vector<8x16xf32>
    %246 = vector.extract_strided_slice %244 {offsets = [0, 16], sizes = [8, 16], strides = [1, 1]} : vector<8x32xf32> to vector<8x16xf32>
    %247 = vector.extract_strided_slice %235 {offsets = [0, 32], sizes = [8, 16], strides = [1, 1]} : vector<8x48xf32> to vector<8x16xf32>
    %248 = vector.extract_strided_slice %236 {offsets = [0, 32], sizes = [8, 16], strides = [1, 1]} : vector<8x48xf32> to vector<8x16xf32>
    %249 = arith.addf %248, %19 : vector<8x16xf32>
    %250 = arith.mulf %245, %249 : vector<8x16xf32>
    %251 = arith.addf %247, %250 : vector<8x16xf32>
    %252 = math.tanh %251 : vector<8x16xf32>
    %cst_73 = arith.constant 1.000000e+00 : f32
    %253 = vector.broadcast %cst_73 : f32 to vector<8x16xf32>
    %254 = arith.subf %253, %246 : vector<8x16xf32>
    %255 = arith.mulf %254, %252 : vector<8x16xf32>
    %256 = arith.mulf %246, %193 : vector<8x16xf32>
    %257 = arith.addf %255, %256 : vector<8x16xf32>
    %258 = vector.extract_strided_slice %231 {offsets = [0, 48], sizes = [8, 48], strides = [1, 1]} : vector<8x96xf32> to vector<8x48xf32>
    %259 = vector.extract_strided_slice %234 {offsets = [0, 48], sizes = [8, 48], strides = [1, 1]} : vector<8x96xf32> to vector<8x48xf32>
    %260 = vector.extract_strided_slice %258 {offsets = [0, 0], sizes = [8, 32], strides = [1, 1]} : vector<8x48xf32> to vector<8x32xf32>
    %261 = vector.extract_strided_slice %259 {offsets = [0, 0], sizes = [8, 32], strides = [1, 1]} : vector<8x48xf32> to vector<8x32xf32>
    %262 = arith.addf %260, %261 : vector<8x32xf32>
    %263 = arith.negf %262 : vector<8x32xf32>
    %264 = math.exp %263 : vector<8x32xf32>
    %cst_74 = arith.constant 1.000000e+00 : f32
    %265 = vector.broadcast %cst_74 : f32 to vector<8x32xf32>
    %266 = arith.addf %265, %264 : vector<8x32xf32>
    %267 = arith.divf %265, %266 : vector<8x32xf32>
    %268 = vector.extract_strided_slice %267 {offsets = [0, 0], sizes = [8, 16], strides = [1, 1]} : vector<8x32xf32> to vector<8x16xf32>
    %269 = vector.extract_strided_slice %267 {offsets = [0, 16], sizes = [8, 16], strides = [1, 1]} : vector<8x32xf32> to vector<8x16xf32>
    %270 = vector.extract_strided_slice %258 {offsets = [0, 32], sizes = [8, 16], strides = [1, 1]} : vector<8x48xf32> to vector<8x16xf32>
    %271 = vector.extract_strided_slice %259 {offsets = [0, 32], sizes = [8, 16], strides = [1, 1]} : vector<8x48xf32> to vector<8x16xf32>
    %272 = arith.addf %271, %24 : vector<8x16xf32>
    %273 = arith.mulf %268, %272 : vector<8x16xf32>
    %274 = arith.addf %270, %273 : vector<8x16xf32>
    %275 = math.tanh %274 : vector<8x16xf32>
    %cst_75 = arith.constant 1.000000e+00 : f32
    %276 = vector.broadcast %cst_75 : f32 to vector<8x16xf32>
    %277 = arith.subf %276, %269 : vector<8x16xf32>
    %278 = arith.mulf %277, %275 : vector<8x16xf32>
    %279 = arith.mulf %269, %216 : vector<8x16xf32>
    %280 = arith.addf %278, %279 : vector<8x16xf32>
    %281 = arith.truncf %257 : vector<8x16xf32> to vector<8x16xbf16>
    %282 = arith.index_cast %224 : i32 to index
    %c0_76 = arith.constant 0 : index
    %283 = vector.load %arg13[%282, %c0_76] : memref<72x32xbf16, #tpu.memory_space<vmem>>, vector<8x16xbf16>
    tpu.vector_store %arg13[%282, %c0_76], %281 {strides = array<i32>} : memref<72x32xbf16, #tpu.memory_space<vmem>>, vector<8x16xbf16>,
    %284 = arith.truncf %280 : vector<8x16xf32> to vector<8x16xbf16>
    %285 = arith.index_cast %227 : i32 to index
    %c16_77 = arith.constant 16 : index
    %286 = vector.load %arg13[%285, %c16_77] : memref<72x32xbf16, #tpu.memory_space<vmem>>, vector<8x16xbf16>
    tpu.vector_store %arg13[%285, %c16_77], %284 {strides = array<i32>} : memref<72x32xbf16, #tpu.memory_space<vmem>>, vector<8x16xbf16>,
    %c4_i32 = arith.constant 4 : i32
    %c8_i32_78 = arith.constant 8 : i32
    %287 = arith.muli %c4_i32, %c8_i32_78 : i32
    %288 = tpu.assume_multiple %287, 8 : i32
    %c8_i32_79 = arith.constant 8 : i32
    %289 = arith.subi %c8_i32_79, %c4_i32 : i32
    %c8_i32_80 = arith.constant 8 : i32
    %290 = arith.muli %289, %c8_i32_80 : i32
    %291 = tpu.assume_multiple %290, 8 : i32
    %292 = arith.index_cast %288 : i32 to index
    %c0_81 = arith.constant 0 : index
    %293 = vector.load %arg12[%292, %c0_81] : memref<72x96xf32, #tpu.memory_space<vmem>>, vector<8x96xf32>
    %294 = arith.index_cast %291 : i32 to index
    %c0_82 = arith.constant 0 : index
    %295 = vector.load %arg12[%294, %c0_82] : memref<72x96xf32, #tpu.memory_space<vmem>>, vector<8x96xf32>
    %296 = tpu.concatenate %257, %280 in 1 : vector<8x16xf32>, vector<8x16xf32> -> vector<8x32xf32>
    %297 = arith.truncf %296 : vector<8x32xf32> to vector<8x32xbf16>
    %cst_83 = arith.constant dense<0.000000e+00> : vector<8x96xf32>
    %298 = tpu.matmul %297, %12, %cst_83 {dimension_numbers = #tpu.dot_dimension_numbers<[1], [0], [0], [1], [0, 0, 1, 1], [], []>} : vector<8x32xbf16>, vector<32x96xbf16>, vector<8x96xf32> -> vector<8x96xf32>
    %299 = vector.extract_strided_slice %293 {offsets = [0, 0], sizes = [8, 48], strides = [1, 1]} : vector<8x96xf32> to vector<8x48xf32>
    %300 = vector.extract_strided_slice %298 {offsets = [0, 0], sizes = [8, 48], strides = [1, 1]} : vector<8x96xf32> to vector<8x48xf32>
    %301 = vector.extract_strided_slice %299 {offsets = [0, 0], sizes = [8, 32], strides = [1, 1]} : vector<8x48xf32> to vector<8x32xf32>
    %302 = vector.extract_strided_slice %300 {offsets = [0, 0], sizes = [8, 32], strides = [1, 1]} : vector<8x48xf32> to vector<8x32xf32>
    %303 = arith.addf %301, %302 : vector<8x32xf32>
    %304 = arith.negf %303 : vector<8x32xf32>
    %305 = math.exp %304 : vector<8x32xf32>
    %cst_84 = arith.constant 1.000000e+00 : f32
    %306 = vector.broadcast %cst_84 : f32 to vector<8x32xf32>
    %307 = arith.addf %306, %305 : vector<8x32xf32>
    %308 = arith.divf %306, %307 : vector<8x32xf32>
    %309 = vector.extract_strided_slice %308 {offsets = [0, 0], sizes = [8, 16], strides = [1, 1]} : vector<8x32xf32> to vector<8x16xf32>
    %310 = vector.extract_strided_slice %308 {offsets = [0, 16], sizes = [8, 16], strides = [1, 1]} : vector<8x32xf32> to vector<8x16xf32>
    %311 = vector.extract_strided_slice %299 {offsets = [0, 32], sizes = [8, 16], strides = [1, 1]} : vector<8x48xf32> to vector<8x16xf32>
    %312 = vector.extract_strided_slice %300 {offsets = [0, 32], sizes = [8, 16], strides = [1, 1]} : vector<8x48xf32> to vector<8x16xf32>
    %313 = arith.addf %312, %19 : vector<8x16xf32>
    %314 = arith.mulf %309, %313 : vector<8x16xf32>
    %315 = arith.addf %311, %314 : vector<8x16xf32>
    %316 = math.tanh %315 : vector<8x16xf32>
    %cst_85 = arith.constant 1.000000e+00 : f32
    %317 = vector.broadcast %cst_85 : f32 to vector<8x16xf32>
    %318 = arith.subf %317, %310 : vector<8x16xf32>
    %319 = arith.mulf %318, %316 : vector<8x16xf32>
    %320 = arith.mulf %310, %257 : vector<8x16xf32>
    %321 = arith.addf %319, %320 : vector<8x16xf32>
    %322 = vector.extract_strided_slice %295 {offsets = [0, 48], sizes = [8, 48], strides = [1, 1]} : vector<8x96xf32> to vector<8x48xf32>
    %323 = vector.extract_strided_slice %298 {offsets = [0, 48], sizes = [8, 48], strides = [1, 1]} : vector<8x96xf32> to vector<8x48xf32>
    %324 = vector.extract_strided_slice %322 {offsets = [0, 0], sizes = [8, 32], strides = [1, 1]} : vector<8x48xf32> to vector<8x32xf32>
    %325 = vector.extract_strided_slice %323 {offsets = [0, 0], sizes = [8, 32], strides = [1, 1]} : vector<8x48xf32> to vector<8x32xf32>
    %326 = arith.addf %324, %325 : vector<8x32xf32>
    %327 = arith.negf %326 : vector<8x32xf32>
    %328 = math.exp %327 : vector<8x32xf32>
    %cst_86 = arith.constant 1.000000e+00 : f32
    %329 = vector.broadcast %cst_86 : f32 to vector<8x32xf32>
    %330 = arith.addf %329, %328 : vector<8x32xf32>
    %331 = arith.divf %329, %330 : vector<8x32xf32>
    %332 = vector.extract_strided_slice %331 {offsets = [0, 0], sizes = [8, 16], strides = [1, 1]} : vector<8x32xf32> to vector<8x16xf32>
    %333 = vector.extract_strided_slice %331 {offsets = [0, 16], sizes = [8, 16], strides = [1, 1]} : vector<8x32xf32> to vector<8x16xf32>
    %334 = vector.extract_strided_slice %322 {offsets = [0, 32], sizes = [8, 16], strides = [1, 1]} : vector<8x48xf32> to vector<8x16xf32>
    %335 = vector.extract_strided_slice %323 {offsets = [0, 32], sizes = [8, 16], strides = [1, 1]} : vector<8x48xf32> to vector<8x16xf32>
    %336 = arith.addf %335, %24 : vector<8x16xf32>
    %337 = arith.mulf %332, %336 : vector<8x16xf32>
    %338 = arith.addf %334, %337 : vector<8x16xf32>
    %339 = math.tanh %338 : vector<8x16xf32>
    %cst_87 = arith.constant 1.000000e+00 : f32
    %340 = vector.broadcast %cst_87 : f32 to vector<8x16xf32>
    %341 = arith.subf %340, %333 : vector<8x16xf32>
    %342 = arith.mulf %341, %339 : vector<8x16xf32>
    %343 = arith.mulf %333, %280 : vector<8x16xf32>
    %344 = arith.addf %342, %343 : vector<8x16xf32>
    %345 = arith.truncf %321 : vector<8x16xf32> to vector<8x16xbf16>
    %346 = arith.index_cast %288 : i32 to index
    %c0_88 = arith.constant 0 : index
    %347 = vector.load %arg13[%346, %c0_88] : memref<72x32xbf16, #tpu.memory_space<vmem>>, vector<8x16xbf16>
    tpu.vector_store %arg13[%346, %c0_88], %345 {strides = array<i32>} : memref<72x32xbf16, #tpu.memory_space<vmem>>, vector<8x16xbf16>,
    %348 = arith.truncf %344 : vector<8x16xf32> to vector<8x16xbf16>
    %349 = arith.index_cast %291 : i32 to index
    %c16_89 = arith.constant 16 : index
    %350 = vector.load %arg13[%349, %c16_89] : memref<72x32xbf16, #tpu.memory_space<vmem>>, vector<8x16xbf16>
    tpu.vector_store %arg13[%349, %c16_89], %348 {strides = array<i32>} : memref<72x32xbf16, #tpu.memory_space<vmem>>, vector<8x16xbf16>,
    %c5_i32 = arith.constant 5 : i32
    %c8_i32_90 = arith.constant 8 : i32
    %351 = arith.muli %c5_i32, %c8_i32_90 : i32
    %352 = tpu.assume_multiple %351, 8 : i32
    %c8_i32_91 = arith.constant 8 : i32
    %353 = arith.subi %c8_i32_91, %c5_i32 : i32
    %c8_i32_92 = arith.constant 8 : i32
    %354 = arith.muli %353, %c8_i32_92 : i32
    %355 = tpu.assume_multiple %354, 8 : i32
    %356 = arith.index_cast %352 : i32 to index
    %c0_93 = arith.constant 0 : index
    %357 = vector.load %arg12[%356, %c0_93] : memref<72x96xf32, #tpu.memory_space<vmem>>, vector<8x96xf32>
    %358 = arith.index_cast %355 : i32 to index
    %c0_94 = arith.constant 0 : index
    %359 = vector.load %arg12[%358, %c0_94] : memref<72x96xf32, #tpu.memory_space<vmem>>, vector<8x96xf32>
    %360 = tpu.concatenate %321, %344 in 1 : vector<8x16xf32>, vector<8x16xf32> -> vector<8x32xf32>
    %361 = arith.truncf %360 : vector<8x32xf32> to vector<8x32xbf16>
    %cst_95 = arith.constant dense<0.000000e+00> : vector<8x96xf32>
    %362 = tpu.matmul %361, %12, %cst_95 {dimension_numbers = #tpu.dot_dimension_numbers<[1], [0], [0], [1], [0, 0, 1, 1], [], []>} : vector<8x32xbf16>, vector<32x96xbf16>, vector<8x96xf32> -> vector<8x96xf32>
    %363 = vector.extract_strided_slice %357 {offsets = [0, 0], sizes = [8, 48], strides = [1, 1]} : vector<8x96xf32> to vector<8x48xf32>
    %364 = vector.extract_strided_slice %362 {offsets = [0, 0], sizes = [8, 48], strides = [1, 1]} : vector<8x96xf32> to vector<8x48xf32>
    %365 = vector.extract_strided_slice %363 {offsets = [0, 0], sizes = [8, 32], strides = [1, 1]} : vector<8x48xf32> to vector<8x32xf32>
    %366 = vector.extract_strided_slice %364 {offsets = [0, 0], sizes = [8, 32], strides = [1, 1]} : vector<8x48xf32> to vector<8x32xf32>
    %367 = arith.addf %365, %366 : vector<8x32xf32>
    %368 = arith.negf %367 : vector<8x32xf32>
    %369 = math.exp %368 : vector<8x32xf32>
    %cst_96 = arith.constant 1.000000e+00 : f32
    %370 = vector.broadcast %cst_96 : f32 to vector<8x32xf32>
    %371 = arith.addf %370, %369 : vector<8x32xf32>
    %372 = arith.divf %370, %371 : vector<8x32xf32>
    %373 = vector.extract_strided_slice %372 {offsets = [0, 0], sizes = [8, 16], strides = [1, 1]} : vector<8x32xf32> to vector<8x16xf32>
    %374 = vector.extract_strided_slice %372 {offsets = [0, 16], sizes = [8, 16], strides = [1, 1]} : vector<8x32xf32> to vector<8x16xf32>
    %375 = vector.extract_strided_slice %363 {offsets = [0, 32], sizes = [8, 16], strides = [1, 1]} : vector<8x48xf32> to vector<8x16xf32>
    %376 = vector.extract_strided_slice %364 {offsets = [0, 32], sizes = [8, 16], strides = [1, 1]} : vector<8x48xf32> to vector<8x16xf32>
    %377 = arith.addf %376, %19 : vector<8x16xf32>
    %378 = arith.mulf %373, %377 : vector<8x16xf32>
    %379 = arith.addf %375, %378 : vector<8x16xf32>
    %380 = math.tanh %379 : vector<8x16xf32>
    %cst_97 = arith.constant 1.000000e+00 : f32
    %381 = vector.broadcast %cst_97 : f32 to vector<8x16xf32>
    %382 = arith.subf %381, %374 : vector<8x16xf32>
    %383 = arith.mulf %382, %380 : vector<8x16xf32>
    %384 = arith.mulf %374, %321 : vector<8x16xf32>
    %385 = arith.addf %383, %384 : vector<8x16xf32>
    %386 = vector.extract_strided_slice %359 {offsets = [0, 48], sizes = [8, 48], strides = [1, 1]} : vector<8x96xf32> to vector<8x48xf32>
    %387 = vector.extract_strided_slice %362 {offsets = [0, 48], sizes = [8, 48], strides = [1, 1]} : vector<8x96xf32> to vector<8x48xf32>
    %388 = vector.extract_strided_slice %386 {offsets = [0, 0], sizes = [8, 32], strides = [1, 1]} : vector<8x48xf32> to vector<8x32xf32>
    %389 = vector.extract_strided_slice %387 {offsets = [0, 0], sizes = [8, 32], strides = [1, 1]} : vector<8x48xf32> to vector<8x32xf32>
    %390 = arith.addf %388, %389 : vector<8x32xf32>
    %391 = arith.negf %390 : vector<8x32xf32>
    %392 = math.exp %391 : vector<8x32xf32>
    %cst_98 = arith.constant 1.000000e+00 : f32
    %393 = vector.broadcast %cst_98 : f32 to vector<8x32xf32>
    %394 = arith.addf %393, %392 : vector<8x32xf32>
    %395 = arith.divf %393, %394 : vector<8x32xf32>
    %396 = vector.extract_strided_slice %395 {offsets = [0, 0], sizes = [8, 16], strides = [1, 1]} : vector<8x32xf32> to vector<8x16xf32>
    %397 = vector.extract_strided_slice %395 {offsets = [0, 16], sizes = [8, 16], strides = [1, 1]} : vector<8x32xf32> to vector<8x16xf32>
    %398 = vector.extract_strided_slice %386 {offsets = [0, 32], sizes = [8, 16], strides = [1, 1]} : vector<8x48xf32> to vector<8x16xf32>
    %399 = vector.extract_strided_slice %387 {offsets = [0, 32], sizes = [8, 16], strides = [1, 1]} : vector<8x48xf32> to vector<8x16xf32>
    %400 = arith.addf %399, %24 : vector<8x16xf32>
    %401 = arith.mulf %396, %400 : vector<8x16xf32>
    %402 = arith.addf %398, %401 : vector<8x16xf32>
    %403 = math.tanh %402 : vector<8x16xf32>
    %cst_99 = arith.constant 1.000000e+00 : f32
    %404 = vector.broadcast %cst_99 : f32 to vector<8x16xf32>
    %405 = arith.subf %404, %397 : vector<8x16xf32>
    %406 = arith.mulf %405, %403 : vector<8x16xf32>
    %407 = arith.mulf %397, %344 : vector<8x16xf32>
    %408 = arith.addf %406, %407 : vector<8x16xf32>
    %409 = arith.truncf %385 : vector<8x16xf32> to vector<8x16xbf16>
    %410 = arith.index_cast %352 : i32 to index
    %c0_100 = arith.constant 0 : index
    %411 = vector.load %arg13[%410, %c0_100] : memref<72x32xbf16, #tpu.memory_space<vmem>>, vector<8x16xbf16>
    tpu.vector_store %arg13[%410, %c0_100], %409 {strides = array<i32>} : memref<72x32xbf16, #tpu.memory_space<vmem>>, vector<8x16xbf16>,
    %412 = arith.truncf %408 : vector<8x16xf32> to vector<8x16xbf16>
    %413 = arith.index_cast %355 : i32 to index
    %c16_101 = arith.constant 16 : index
    %414 = vector.load %arg13[%413, %c16_101] : memref<72x32xbf16, #tpu.memory_space<vmem>>, vector<8x16xbf16>
    tpu.vector_store %arg13[%413, %c16_101], %412 {strides = array<i32>} : memref<72x32xbf16, #tpu.memory_space<vmem>>, vector<8x16xbf16>,
    %c6_i32 = arith.constant 6 : i32
    %c8_i32_102 = arith.constant 8 : i32
    %415 = arith.muli %c6_i32, %c8_i32_102 : i32
    %416 = tpu.assume_multiple %415, 8 : i32
    %c8_i32_103 = arith.constant 8 : i32
    %417 = arith.subi %c8_i32_103, %c6_i32 : i32
    %c8_i32_104 = arith.constant 8 : i32
    %418 = arith.muli %417, %c8_i32_104 : i32
    %419 = tpu.assume_multiple %418, 8 : i32
    %420 = arith.index_cast %416 : i32 to index
    %c0_105 = arith.constant 0 : index
    %421 = vector.load %arg12[%420, %c0_105] : memref<72x96xf32, #tpu.memory_space<vmem>>, vector<8x96xf32>
    %422 = arith.index_cast %419 : i32 to index
    %c0_106 = arith.constant 0 : index
    %423 = vector.load %arg12[%422, %c0_106] : memref<72x96xf32, #tpu.memory_space<vmem>>, vector<8x96xf32>
    %424 = tpu.concatenate %385, %408 in 1 : vector<8x16xf32>, vector<8x16xf32> -> vector<8x32xf32>
    %425 = arith.truncf %424 : vector<8x32xf32> to vector<8x32xbf16>
    %cst_107 = arith.constant dense<0.000000e+00> : vector<8x96xf32>
    %426 = tpu.matmul %425, %12, %cst_107 {dimension_numbers = #tpu.dot_dimension_numbers<[1], [0], [0], [1], [0, 0, 1, 1], [], []>} : vector<8x32xbf16>, vector<32x96xbf16>, vector<8x96xf32> -> vector<8x96xf32>
    %427 = vector.extract_strided_slice %421 {offsets = [0, 0], sizes = [8, 48], strides = [1, 1]} : vector<8x96xf32> to vector<8x48xf32>
    %428 = vector.extract_strided_slice %426 {offsets = [0, 0], sizes = [8, 48], strides = [1, 1]} : vector<8x96xf32> to vector<8x48xf32>
    %429 = vector.extract_strided_slice %427 {offsets = [0, 0], sizes = [8, 32], strides = [1, 1]} : vector<8x48xf32> to vector<8x32xf32>
    %430 = vector.extract_strided_slice %428 {offsets = [0, 0], sizes = [8, 32], strides = [1, 1]} : vector<8x48xf32> to vector<8x32xf32>
    %431 = arith.addf %429, %430 : vector<8x32xf32>
    %432 = arith.negf %431 : vector<8x32xf32>
    %433 = math.exp %432 : vector<8x32xf32>
    %cst_108 = arith.constant 1.000000e+00 : f32
    %434 = vector.broadcast %cst_108 : f32 to vector<8x32xf32>
    %435 = arith.addf %434, %433 : vector<8x32xf32>
    %436 = arith.divf %434, %435 : vector<8x32xf32>
    %437 = vector.extract_strided_slice %436 {offsets = [0, 0], sizes = [8, 16], strides = [1, 1]} : vector<8x32xf32> to vector<8x16xf32>
    %438 = vector.extract_strided_slice %436 {offsets = [0, 16], sizes = [8, 16], strides = [1, 1]} : vector<8x32xf32> to vector<8x16xf32>
    %439 = vector.extract_strided_slice %427 {offsets = [0, 32], sizes = [8, 16], strides = [1, 1]} : vector<8x48xf32> to vector<8x16xf32>
    %440 = vector.extract_strided_slice %428 {offsets = [0, 32], sizes = [8, 16], strides = [1, 1]} : vector<8x48xf32> to vector<8x16xf32>
    %441 = arith.addf %440, %19 : vector<8x16xf32>
    %442 = arith.mulf %437, %441 : vector<8x16xf32>
    %443 = arith.addf %439, %442 : vector<8x16xf32>
    %444 = math.tanh %443 : vector<8x16xf32>
    %cst_109 = arith.constant 1.000000e+00 : f32
    %445 = vector.broadcast %cst_109 : f32 to vector<8x16xf32>
    %446 = arith.subf %445, %438 : vector<8x16xf32>
    %447 = arith.mulf %446, %444 : vector<8x16xf32>
    %448 = arith.mulf %438, %385 : vector<8x16xf32>
    %449 = arith.addf %447, %448 : vector<8x16xf32>
    %450 = vector.extract_strided_slice %423 {offsets = [0, 48], sizes = [8, 48], strides = [1, 1]} : vector<8x96xf32> to vector<8x48xf32>
    %451 = vector.extract_strided_slice %426 {offsets = [0, 48], sizes = [8, 48], strides = [1, 1]} : vector<8x96xf32> to vector<8x48xf32>
    %452 = vector.extract_strided_slice %450 {offsets = [0, 0], sizes = [8, 32], strides = [1, 1]} : vector<8x48xf32> to vector<8x32xf32>
    %453 = vector.extract_strided_slice %451 {offsets = [0, 0], sizes = [8, 32], strides = [1, 1]} : vector<8x48xf32> to vector<8x32xf32>
    %454 = arith.addf %452, %453 : vector<8x32xf32>
    %455 = arith.negf %454 : vector<8x32xf32>
    %456 = math.exp %455 : vector<8x32xf32>
    %cst_110 = arith.constant 1.000000e+00 : f32
    %457 = vector.broadcast %cst_110 : f32 to vector<8x32xf32>
    %458 = arith.addf %457, %456 : vector<8x32xf32>
    %459 = arith.divf %457, %458 : vector<8x32xf32>
    %460 = vector.extract_strided_slice %459 {offsets = [0, 0], sizes = [8, 16], strides = [1, 1]} : vector<8x32xf32> to vector<8x16xf32>
    %461 = vector.extract_strided_slice %459 {offsets = [0, 16], sizes = [8, 16], strides = [1, 1]} : vector<8x32xf32> to vector<8x16xf32>
    %462 = vector.extract_strided_slice %450 {offsets = [0, 32], sizes = [8, 16], strides = [1, 1]} : vector<8x48xf32> to vector<8x16xf32>
    %463 = vector.extract_strided_slice %451 {offsets = [0, 32], sizes = [8, 16], strides = [1, 1]} : vector<8x48xf32> to vector<8x16xf32>
    %464 = arith.addf %463, %24 : vector<8x16xf32>
    %465 = arith.mulf %460, %464 : vector<8x16xf32>
    %466 = arith.addf %462, %465 : vector<8x16xf32>
    %467 = math.tanh %466 : vector<8x16xf32>
    %cst_111 = arith.constant 1.000000e+00 : f32
    %468 = vector.broadcast %cst_111 : f32 to vector<8x16xf32>
    %469 = arith.subf %468, %461 : vector<8x16xf32>
    %470 = arith.mulf %469, %467 : vector<8x16xf32>
    %471 = arith.mulf %461, %408 : vector<8x16xf32>
    %472 = arith.addf %470, %471 : vector<8x16xf32>
    %473 = arith.truncf %449 : vector<8x16xf32> to vector<8x16xbf16>
    %474 = arith.index_cast %416 : i32 to index
    %c0_112 = arith.constant 0 : index
    %475 = vector.load %arg13[%474, %c0_112] : memref<72x32xbf16, #tpu.memory_space<vmem>>, vector<8x16xbf16>
    tpu.vector_store %arg13[%474, %c0_112], %473 {strides = array<i32>} : memref<72x32xbf16, #tpu.memory_space<vmem>>, vector<8x16xbf16>,
    %476 = arith.truncf %472 : vector<8x16xf32> to vector<8x16xbf16>
    %477 = arith.index_cast %419 : i32 to index
    %c16_113 = arith.constant 16 : index
    %478 = vector.load %arg13[%477, %c16_113] : memref<72x32xbf16, #tpu.memory_space<vmem>>, vector<8x16xbf16>
    tpu.vector_store %arg13[%477, %c16_113], %476 {strides = array<i32>} : memref<72x32xbf16, #tpu.memory_space<vmem>>, vector<8x16xbf16>,
    %c7_i32 = arith.constant 7 : i32
    %c8_i32_114 = arith.constant 8 : i32
    %479 = arith.muli %c7_i32, %c8_i32_114 : i32
    %480 = tpu.assume_multiple %479, 8 : i32
    %c8_i32_115 = arith.constant 8 : i32
    %481 = arith.subi %c8_i32_115, %c7_i32 : i32
    %c8_i32_116 = arith.constant 8 : i32
    %482 = arith.muli %481, %c8_i32_116 : i32
    %483 = tpu.assume_multiple %482, 8 : i32
    %484 = arith.index_cast %480 : i32 to index
    %c0_117 = arith.constant 0 : index
    %485 = vector.load %arg12[%484, %c0_117] : memref<72x96xf32, #tpu.memory_space<vmem>>, vector<8x96xf32>
    %486 = arith.index_cast %483 : i32 to index
    %c0_118 = arith.constant 0 : index
    %487 = vector.load %arg12[%486, %c0_118] : memref<72x96xf32, #tpu.memory_space<vmem>>, vector<8x96xf32>
    %488 = tpu.concatenate %449, %472 in 1 : vector<8x16xf32>, vector<8x16xf32> -> vector<8x32xf32>
    %489 = arith.truncf %488 : vector<8x32xf32> to vector<8x32xbf16>
    %cst_119 = arith.constant dense<0.000000e+00> : vector<8x96xf32>
    %490 = tpu.matmul %489, %12, %cst_119 {dimension_numbers = #tpu.dot_dimension_numbers<[1], [0], [0], [1], [0, 0, 1, 1], [], []>} : vector<8x32xbf16>, vector<32x96xbf16>, vector<8x96xf32> -> vector<8x96xf32>
    %491 = vector.extract_strided_slice %485 {offsets = [0, 0], sizes = [8, 48], strides = [1, 1]} : vector<8x96xf32> to vector<8x48xf32>
    %492 = vector.extract_strided_slice %490 {offsets = [0, 0], sizes = [8, 48], strides = [1, 1]} : vector<8x96xf32> to vector<8x48xf32>
    %493 = vector.extract_strided_slice %491 {offsets = [0, 0], sizes = [8, 32], strides = [1, 1]} : vector<8x48xf32> to vector<8x32xf32>
    %494 = vector.extract_strided_slice %492 {offsets = [0, 0], sizes = [8, 32], strides = [1, 1]} : vector<8x48xf32> to vector<8x32xf32>
    %495 = arith.addf %493, %494 : vector<8x32xf32>
    %496 = arith.negf %495 : vector<8x32xf32>
    %497 = math.exp %496 : vector<8x32xf32>
    %cst_120 = arith.constant 1.000000e+00 : f32
    %498 = vector.broadcast %cst_120 : f32 to vector<8x32xf32>
    %499 = arith.addf %498, %497 : vector<8x32xf32>
    %500 = arith.divf %498, %499 : vector<8x32xf32>
    %501 = vector.extract_strided_slice %500 {offsets = [0, 0], sizes = [8, 16], strides = [1, 1]} : vector<8x32xf32> to vector<8x16xf32>
    %502 = vector.extract_strided_slice %500 {offsets = [0, 16], sizes = [8, 16], strides = [1, 1]} : vector<8x32xf32> to vector<8x16xf32>
    %503 = vector.extract_strided_slice %491 {offsets = [0, 32], sizes = [8, 16], strides = [1, 1]} : vector<8x48xf32> to vector<8x16xf32>
    %504 = vector.extract_strided_slice %492 {offsets = [0, 32], sizes = [8, 16], strides = [1, 1]} : vector<8x48xf32> to vector<8x16xf32>
    %505 = arith.addf %504, %19 : vector<8x16xf32>
    %506 = arith.mulf %501, %505 : vector<8x16xf32>
    %507 = arith.addf %503, %506 : vector<8x16xf32>
    %508 = math.tanh %507 : vector<8x16xf32>
    %cst_121 = arith.constant 1.000000e+00 : f32
    %509 = vector.broadcast %cst_121 : f32 to vector<8x16xf32>
    %510 = arith.subf %509, %502 : vector<8x16xf32>
    %511 = arith.mulf %510, %508 : vector<8x16xf32>
    %512 = arith.mulf %502, %449 : vector<8x16xf32>
    %513 = arith.addf %511, %512 : vector<8x16xf32>
    %514 = vector.extract_strided_slice %487 {offsets = [0, 48], sizes = [8, 48], strides = [1, 1]} : vector<8x96xf32> to vector<8x48xf32>
    %515 = vector.extract_strided_slice %490 {offsets = [0, 48], sizes = [8, 48], strides = [1, 1]} : vector<8x96xf32> to vector<8x48xf32>
    %516 = vector.extract_strided_slice %514 {offsets = [0, 0], sizes = [8, 32], strides = [1, 1]} : vector<8x48xf32> to vector<8x32xf32>
    %517 = vector.extract_strided_slice %515 {offsets = [0, 0], sizes = [8, 32], strides = [1, 1]} : vector<8x48xf32> to vector<8x32xf32>
    %518 = arith.addf %516, %517 : vector<8x32xf32>
    %519 = arith.negf %518 : vector<8x32xf32>
    %520 = math.exp %519 : vector<8x32xf32>
    %cst_122 = arith.constant 1.000000e+00 : f32
    %521 = vector.broadcast %cst_122 : f32 to vector<8x32xf32>
    %522 = arith.addf %521, %520 : vector<8x32xf32>
    %523 = arith.divf %521, %522 : vector<8x32xf32>
    %524 = vector.extract_strided_slice %523 {offsets = [0, 0], sizes = [8, 16], strides = [1, 1]} : vector<8x32xf32> to vector<8x16xf32>
    %525 = vector.extract_strided_slice %523 {offsets = [0, 16], sizes = [8, 16], strides = [1, 1]} : vector<8x32xf32> to vector<8x16xf32>
    %526 = vector.extract_strided_slice %514 {offsets = [0, 32], sizes = [8, 16], strides = [1, 1]} : vector<8x48xf32> to vector<8x16xf32>
    %527 = vector.extract_strided_slice %515 {offsets = [0, 32], sizes = [8, 16], strides = [1, 1]} : vector<8x48xf32> to vector<8x16xf32>
    %528 = arith.addf %527, %24 : vector<8x16xf32>
    %529 = arith.mulf %524, %528 : vector<8x16xf32>
    %530 = arith.addf %526, %529 : vector<8x16xf32>
    %531 = math.tanh %530 : vector<8x16xf32>
    %cst_123 = arith.constant 1.000000e+00 : f32
    %532 = vector.broadcast %cst_123 : f32 to vector<8x16xf32>
    %533 = arith.subf %532, %525 : vector<8x16xf32>
    %534 = arith.mulf %533, %531 : vector<8x16xf32>
    %535 = arith.mulf %525, %472 : vector<8x16xf32>
    %536 = arith.addf %534, %535 : vector<8x16xf32>
    %537 = arith.truncf %513 : vector<8x16xf32> to vector<8x16xbf16>
    %538 = arith.index_cast %480 : i32 to index
    %c0_124 = arith.constant 0 : index
    %539 = vector.load %arg13[%538, %c0_124] : memref<72x32xbf16, #tpu.memory_space<vmem>>, vector<8x16xbf16>
    tpu.vector_store %arg13[%538, %c0_124], %537 {strides = array<i32>} : memref<72x32xbf16, #tpu.memory_space<vmem>>, vector<8x16xbf16>,
    %540 = arith.truncf %536 : vector<8x16xf32> to vector<8x16xbf16>
    %541 = arith.index_cast %483 : i32 to index
    %c16_125 = arith.constant 16 : index
    %542 = vector.load %arg13[%541, %c16_125] : memref<72x32xbf16, #tpu.memory_space<vmem>>, vector<8x16xbf16>
    tpu.vector_store %arg13[%541, %c16_125], %540 {strides = array<i32>} : memref<72x32xbf16, #tpu.memory_space<vmem>>, vector<8x16xbf16>,
    %c8_i32_126 = arith.constant 8 : i32
    %c8_i32_127 = arith.constant 8 : i32
    %543 = arith.muli %c8_i32_126, %c8_i32_127 : i32
    %544 = tpu.assume_multiple %543, 8 : i32
    %c8_i32_128 = arith.constant 8 : i32
    %545 = arith.subi %c8_i32_128, %c8_i32_126 : i32
    %c8_i32_129 = arith.constant 8 : i32
    %546 = arith.muli %545, %c8_i32_129 : i32
    %547 = tpu.assume_multiple %546, 8 : i32
    %548 = arith.index_cast %544 : i32 to index
    %c0_130 = arith.constant 0 : index
    %549 = vector.load %arg12[%548, %c0_130] : memref<72x96xf32, #tpu.memory_space<vmem>>, vector<8x96xf32>
    %550 = arith.index_cast %547 : i32 to index
    %c0_131 = arith.constant 0 : index
    %551 = vector.load %arg12[%550, %c0_131] : memref<72x96xf32, #tpu.memory_space<vmem>>, vector<8x96xf32>
    %552 = tpu.concatenate %513, %536 in 1 : vector<8x16xf32>, vector<8x16xf32> -> vector<8x32xf32>
    %553 = arith.truncf %552 : vector<8x32xf32> to vector<8x32xbf16>
    %cst_132 = arith.constant dense<0.000000e+00> : vector<8x96xf32>
    %554 = tpu.matmul %553, %12, %cst_132 {dimension_numbers = #tpu.dot_dimension_numbers<[1], [0], [0], [1], [0, 0, 1, 1], [], []>} : vector<8x32xbf16>, vector<32x96xbf16>, vector<8x96xf32> -> vector<8x96xf32>
    %555 = vector.extract_strided_slice %549 {offsets = [0, 0], sizes = [8, 48], strides = [1, 1]} : vector<8x96xf32> to vector<8x48xf32>
    %556 = vector.extract_strided_slice %554 {offsets = [0, 0], sizes = [8, 48], strides = [1, 1]} : vector<8x96xf32> to vector<8x48xf32>
    %557 = vector.extract_strided_slice %555 {offsets = [0, 0], sizes = [8, 32], strides = [1, 1]} : vector<8x48xf32> to vector<8x32xf32>
    %558 = vector.extract_strided_slice %556 {offsets = [0, 0], sizes = [8, 32], strides = [1, 1]} : vector<8x48xf32> to vector<8x32xf32>
    %559 = arith.addf %557, %558 : vector<8x32xf32>
    %560 = arith.negf %559 : vector<8x32xf32>
    %561 = math.exp %560 : vector<8x32xf32>
    %cst_133 = arith.constant 1.000000e+00 : f32
    %562 = vector.broadcast %cst_133 : f32 to vector<8x32xf32>
    %563 = arith.addf %562, %561 : vector<8x32xf32>
    %564 = arith.divf %562, %563 : vector<8x32xf32>
    %565 = vector.extract_strided_slice %564 {offsets = [0, 0], sizes = [8, 16], strides = [1, 1]} : vector<8x32xf32> to vector<8x16xf32>
    %566 = vector.extract_strided_slice %564 {offsets = [0, 16], sizes = [8, 16], strides = [1, 1]} : vector<8x32xf32> to vector<8x16xf32>
    %567 = vector.extract_strided_slice %555 {offsets = [0, 32], sizes = [8, 16], strides = [1, 1]} : vector<8x48xf32> to vector<8x16xf32>
    %568 = vector.extract_strided_slice %556 {offsets = [0, 32], sizes = [8, 16], strides = [1, 1]} : vector<8x48xf32> to vector<8x16xf32>
    %569 = arith.addf %568, %19 : vector<8x16xf32>
    %570 = arith.mulf %565, %569 : vector<8x16xf32>
    %571 = arith.addf %567, %570 : vector<8x16xf32>
    %572 = math.tanh %571 : vector<8x16xf32>
    %cst_134 = arith.constant 1.000000e+00 : f32
    %573 = vector.broadcast %cst_134 : f32 to vector<8x16xf32>
    %574 = arith.subf %573, %566 : vector<8x16xf32>
    %575 = arith.mulf %574, %572 : vector<8x16xf32>
    %576 = arith.mulf %566, %513 : vector<8x16xf32>
    %577 = arith.addf %575, %576 : vector<8x16xf32>
    %578 = vector.extract_strided_slice %551 {offsets = [0, 48], sizes = [8, 48], strides = [1, 1]} : vector<8x96xf32> to vector<8x48xf32>
    %579 = vector.extract_strided_slice %554 {offsets = [0, 48], sizes = [8, 48], strides = [1, 1]} : vector<8x96xf32> to vector<8x48xf32>
    %580 = vector.extract_strided_slice %578 {offsets = [0, 0], sizes = [8, 32], strides = [1, 1]} : vector<8x48xf32> to vector<8x32xf32>
    %581 = vector.extract_strided_slice %579 {offsets = [0, 0], sizes = [8, 32], strides = [1, 1]} : vector<8x48xf32> to vector<8x32xf32>
    %582 = arith.addf %580, %581 : vector<8x32xf32>
    %583 = arith.negf %582 : vector<8x32xf32>
    %584 = math.exp %583 : vector<8x32xf32>
    %cst_135 = arith.constant 1.000000e+00 : f32
    %585 = vector.broadcast %cst_135 : f32 to vector<8x32xf32>
    %586 = arith.addf %585, %584 : vector<8x32xf32>
    %587 = arith.divf %585, %586 : vector<8x32xf32>
    %588 = vector.extract_strided_slice %587 {offsets = [0, 0], sizes = [8, 16], strides = [1, 1]} : vector<8x32xf32> to vector<8x16xf32>
    %589 = vector.extract_strided_slice %587 {offsets = [0, 16], sizes = [8, 16], strides = [1, 1]} : vector<8x32xf32> to vector<8x16xf32>
    %590 = vector.extract_strided_slice %578 {offsets = [0, 32], sizes = [8, 16], strides = [1, 1]} : vector<8x48xf32> to vector<8x16xf32>
    %591 = vector.extract_strided_slice %579 {offsets = [0, 32], sizes = [8, 16], strides = [1, 1]} : vector<8x48xf32> to vector<8x16xf32>
    %592 = arith.addf %591, %24 : vector<8x16xf32>
    %593 = arith.mulf %588, %592 : vector<8x16xf32>
    %594 = arith.addf %590, %593 : vector<8x16xf32>
    %595 = math.tanh %594 : vector<8x16xf32>
    %cst_136 = arith.constant 1.000000e+00 : f32
    %596 = vector.broadcast %cst_136 : f32 to vector<8x16xf32>
    %597 = arith.subf %596, %589 : vector<8x16xf32>
    %598 = arith.mulf %597, %595 : vector<8x16xf32>
    %599 = arith.mulf %589, %536 : vector<8x16xf32>
    %600 = arith.addf %598, %599 : vector<8x16xf32>
    %601 = arith.truncf %577 : vector<8x16xf32> to vector<8x16xbf16>
    %602 = arith.index_cast %544 : i32 to index
    %c0_137 = arith.constant 0 : index
    %603 = vector.load %arg13[%602, %c0_137] : memref<72x32xbf16, #tpu.memory_space<vmem>>, vector<8x16xbf16>
    tpu.vector_store %arg13[%602, %c0_137], %601 {strides = array<i32>} : memref<72x32xbf16, #tpu.memory_space<vmem>>, vector<8x16xbf16>,
    %604 = arith.truncf %600 : vector<8x16xf32> to vector<8x16xbf16>
    %605 = arith.index_cast %547 : i32 to index
    %c16_138 = arith.constant 16 : index
    %606 = vector.load %arg13[%605, %c16_138] : memref<72x32xbf16, #tpu.memory_space<vmem>>, vector<8x16xbf16>
    tpu.vector_store %arg13[%605, %c16_138], %604 {strides = array<i32>} : memref<72x32xbf16, #tpu.memory_space<vmem>>, vector<8x16xbf16>,
    %c9_i32 = arith.constant 9 : i32
    %c1 = arith.constant 1 : index
    %c0_139 = arith.constant 0 : index
    %c0_140 = arith.constant 0 : index
    %607 = vector.load %arg3[%c1, %c0_139, %c0_140] : memref<2x32x96xbf16, #tpu.memory_space<vmem>>, vector<1x32x96xbf16>
    %608 = vector.shape_cast %607 : vector<1x32x96xbf16> to vector<32x96xbf16>
    %c1_141 = arith.constant 1 : index
    %c0_142 = arith.constant 0 : index
    %c0_143 = arith.constant 0 : index
    %609 = vector.load %arg4[%c1_141, %c0_142, %c0_143] : memref<2x32x96xbf16, #tpu.memory_space<vmem>>, vector<1x32x96xbf16>
    %610 = vector.shape_cast %609 : vector<1x32x96xbf16> to vector<32x96xbf16>
    %c1_144 = arith.constant 1 : index
    %c0_145 = arith.constant 0 : index
    %c0_146 = arith.constant 0 : index
    %611 = vector.load %arg5[%c1_144, %c0_145, %c0_146] : memref<2x1x96xf32, #tpu.memory_space<vmem>>, vector<1x1x96xf32>
    %612 = vector.shape_cast %611 : vector<1x1x96xf32> to vector<1x96xf32>
    %c1_147 = arith.constant 1 : index
    %c0_148 = arith.constant 0 : index
    %c0_149 = arith.constant 0 : index
    %613 = vector.load %arg6[%c1_147, %c0_148, %c0_149] : memref<2x1x32xf32, #tpu.memory_space<vmem>>, vector<1x1x32xf32>
    %614 = vector.shape_cast %613 : vector<1x1x32xf32> to vector<1x32xf32>
    %615 = vector.extract_strided_slice %614 {offsets = [0, 0], sizes = [1, 16], strides = [1, 1]} : vector<1x32xf32> to vector<1x16xf32>
    %616 = vector.shape_cast %615 : vector<1x16xf32> to vector<1x16xf32>
    %617 = vector.broadcast %616 : vector<1x16xf32> to vector<8x16xf32>
    %c1_150 = arith.constant 1 : index
    %c0_151 = arith.constant 0 : index
    %c0_152 = arith.constant 0 : index
    %618 = vector.load %arg6[%c1_150, %c0_151, %c0_152] : memref<2x1x32xf32, #tpu.memory_space<vmem>>, vector<1x1x32xf32>
    %619 = vector.shape_cast %618 : vector<1x1x32xf32> to vector<1x32xf32>
    %620 = vector.extract_strided_slice %619 {offsets = [0, 16], sizes = [1, 16], strides = [1, 1]} : vector<1x32xf32> to vector<1x16xf32>
    %621 = vector.shape_cast %620 : vector<1x16xf32> to vector<1x16xf32>
    %622 = vector.broadcast %621 : vector<1x16xf32> to vector<8x16xf32>
    %c0_153 = arith.constant 0 : index
    %c0_154 = arith.constant 0 : index
    %623 = vector.load %arg13[%c0_153, %c0_154] : memref<72x32xbf16, #tpu.memory_space<vmem>>, vector<72x32xbf16>
    %cst_155 = arith.constant dense<0.000000e+00> : vector<72x96xf32>
    %624 = tpu.matmul %623, %608, %cst_155 {dimension_numbers = #tpu.dot_dimension_numbers<[1], [0], [0], [1], [0, 0, 1, 1], [], []>} : vector<72x32xbf16>, vector<32x96xbf16>, vector<72x96xf32> -> vector<72x96xf32>
    %625 = vector.broadcast %612 : vector<1x96xf32> to vector<72x96xf32>
    %626 = arith.addf %624, %625 : vector<72x96xf32>
    %c0_156 = arith.constant 0 : index
    %c0_157 = arith.constant 0 : index
    %627 = vector.load %arg12[%c0_156, %c0_157] : memref<72x96xf32, #tpu.memory_space<vmem>>, vector<72x96xf32>
    tpu.vector_store %arg12[%c0_156, %c0_157], %626 {strides = array<i32>} : memref<72x96xf32, #tpu.memory_space<vmem>>, vector<72x96xf32>,
    %cst_158 = arith.constant 0.000000e+00 : f32
    %628 = vector.broadcast %cst_158 : f32 to vector<8x16xf32>
    %629 = vector.extract_strided_slice %610 {offsets = [0, 0], sizes = [16, 48], strides = [1, 1]} : vector<32x96xbf16> to vector<16x48xbf16>
    %c0_i32_159 = arith.constant 0 : i32
    %c8_i32_160 = arith.constant 8 : i32
    %630 = arith.muli %c0_i32_159, %c8_i32_160 : i32
    %631 = tpu.assume_multiple %630, 8 : i32
    %632 = arith.index_cast %631 : i32 to index
    %c0_161 = arith.constant 0 : index
    %633 = vector.load %arg12[%632, %c0_161] : memref<72x96xf32, #tpu.memory_space<vmem>>, vector<8x96xf32>
    %634 = arith.truncf %628 : vector<8x16xf32> to vector<8x16xbf16>
    %cst_162 = arith.constant dense<0.000000e+00> : vector<8x48xf32>
    %635 = tpu.matmul %634, %629, %cst_162 {dimension_numbers = #tpu.dot_dimension_numbers<[1], [0], [0], [1], [0, 0, 1, 1], [], []>} : vector<8x16xbf16>, vector<16x48xbf16>, vector<8x48xf32> -> vector<8x48xf32>
    %636 = vector.extract_strided_slice %633 {offsets = [0, 0], sizes = [8, 48], strides = [1, 1]} : vector<8x96xf32> to vector<8x48xf32>
    %637 = vector.extract_strided_slice %636 {offsets = [0, 0], sizes = [8, 32], strides = [1, 1]} : vector<8x48xf32> to vector<8x32xf32>
    %638 = vector.extract_strided_slice %635 {offsets = [0, 0], sizes = [8, 32], strides = [1, 1]} : vector<8x48xf32> to vector<8x32xf32>
    %639 = arith.addf %637, %638 : vector<8x32xf32>
    %640 = arith.negf %639 : vector<8x32xf32>
    %641 = math.exp %640 : vector<8x32xf32>
    %cst_163 = arith.constant 1.000000e+00 : f32
    %642 = vector.broadcast %cst_163 : f32 to vector<8x32xf32>
    %643 = arith.addf %642, %641 : vector<8x32xf32>
    %644 = arith.divf %642, %643 : vector<8x32xf32>
    %645 = vector.extract_strided_slice %644 {offsets = [0, 0], sizes = [8, 16], strides = [1, 1]} : vector<8x32xf32> to vector<8x16xf32>
    %646 = vector.extract_strided_slice %644 {offsets = [0, 16], sizes = [8, 16], strides = [1, 1]} : vector<8x32xf32> to vector<8x16xf32>
    %647 = vector.extract_strided_slice %636 {offsets = [0, 32], sizes = [8, 16], strides = [1, 1]} : vector<8x48xf32> to vector<8x16xf32>
    %648 = vector.extract_strided_slice %635 {offsets = [0, 32], sizes = [8, 16], strides = [1, 1]} : vector<8x48xf32> to vector<8x16xf32>
    %649 = arith.addf %648, %617 : vector<8x16xf32>
    %650 = arith.mulf %645, %649 : vector<8x16xf32>
    %651 = arith.addf %647, %650 : vector<8x16xf32>
    %652 = math.tanh %651 : vector<8x16xf32>
    %cst_164 = arith.constant 1.000000e+00 : f32
    %653 = vector.broadcast %cst_164 : f32 to vector<8x16xf32>
    %654 = arith.subf %653, %646 : vector<8x16xf32>
    %655 = arith.mulf %654, %652 : vector<8x16xf32>
    %656 = arith.mulf %646, %628 : vector<8x16xf32>
    %657 = arith.addf %655, %656 : vector<8x16xf32>
    %c1_i32_165 = arith.constant 1 : i32
    %c8_i32_166 = arith.constant 8 : i32
    %658 = arith.muli %c1_i32_165, %c8_i32_166 : i32
    %659 = tpu.assume_multiple %658, 8 : i32
    %660 = arith.index_cast %659 : i32 to index
    %c0_167 = arith.constant 0 : index
    %661 = vector.load %arg12[%660, %c0_167] : memref<72x96xf32, #tpu.memory_space<vmem>>, vector<8x96xf32>
    %662 = arith.truncf %657 : vector<8x16xf32> to vector<8x16xbf16>
    %cst_168 = arith.constant dense<0.000000e+00> : vector<8x48xf32>
    %663 = tpu.matmul %662, %629, %cst_168 {dimension_numbers = #tpu.dot_dimension_numbers<[1], [0], [0], [1], [0, 0, 1, 1], [], []>} : vector<8x16xbf16>, vector<16x48xbf16>, vector<8x48xf32> -> vector<8x48xf32>
    %664 = vector.extract_strided_slice %661 {offsets = [0, 0], sizes = [8, 48], strides = [1, 1]} : vector<8x96xf32> to vector<8x48xf32>
    %665 = vector.extract_strided_slice %664 {offsets = [0, 0], sizes = [8, 32], strides = [1, 1]} : vector<8x48xf32> to vector<8x32xf32>
    %666 = vector.extract_strided_slice %663 {offsets = [0, 0], sizes = [8, 32], strides = [1, 1]} : vector<8x48xf32> to vector<8x32xf32>
    %667 = arith.addf %665, %666 : vector<8x32xf32>
    %668 = arith.negf %667 : vector<8x32xf32>
    %669 = math.exp %668 : vector<8x32xf32>
    %cst_169 = arith.constant 1.000000e+00 : f32
    %670 = vector.broadcast %cst_169 : f32 to vector<8x32xf32>
    %671 = arith.addf %670, %669 : vector<8x32xf32>
    %672 = arith.divf %670, %671 : vector<8x32xf32>
    %673 = vector.extract_strided_slice %672 {offsets = [0, 0], sizes = [8, 16], strides = [1, 1]} : vector<8x32xf32> to vector<8x16xf32>
    %674 = vector.extract_strided_slice %672 {offsets = [0, 16], sizes = [8, 16], strides = [1, 1]} : vector<8x32xf32> to vector<8x16xf32>
    %675 = vector.extract_strided_slice %664 {offsets = [0, 32], sizes = [8, 16], strides = [1, 1]} : vector<8x48xf32> to vector<8x16xf32>
    %676 = vector.extract_strided_slice %663 {offsets = [0, 32], sizes = [8, 16], strides = [1, 1]} : vector<8x48xf32> to vector<8x16xf32>
    %677 = arith.addf %676, %617 : vector<8x16xf32>
    %678 = arith.mulf %673, %677 : vector<8x16xf32>
    %679 = arith.addf %675, %678 : vector<8x16xf32>
    %680 = math.tanh %679 : vector<8x16xf32>
    %cst_170 = arith.constant 1.000000e+00 : f32
    %681 = vector.broadcast %cst_170 : f32 to vector<8x16xf32>
    %682 = arith.subf %681, %674 : vector<8x16xf32>
    %683 = arith.mulf %682, %680 : vector<8x16xf32>
    %684 = arith.mulf %674, %657 : vector<8x16xf32>
    %685 = arith.addf %683, %684 : vector<8x16xf32>
    %c2_i32_171 = arith.constant 2 : i32
    %c8_i32_172 = arith.constant 8 : i32
    %686 = arith.muli %c2_i32_171, %c8_i32_172 : i32
    %687 = tpu.assume_multiple %686, 8 : i32
    %688 = arith.index_cast %687 : i32 to index
    %c0_173 = arith.constant 0 : index
    %689 = vector.load %arg12[%688, %c0_173] : memref<72x96xf32, #tpu.memory_space<vmem>>, vector<8x96xf32>
    %690 = arith.truncf %685 : vector<8x16xf32> to vector<8x16xbf16>
    %cst_174 = arith.constant dense<0.000000e+00> : vector<8x48xf32>
    %691 = tpu.matmul %690, %629, %cst_174 {dimension_numbers = #tpu.dot_dimension_numbers<[1], [0], [0], [1], [0, 0, 1, 1], [], []>} : vector<8x16xbf16>, vector<16x48xbf16>, vector<8x48xf32> -> vector<8x48xf32>
    %692 = vector.extract_strided_slice %689 {offsets = [0, 0], sizes = [8, 48], strides = [1, 1]} : vector<8x96xf32> to vector<8x48xf32>
    %693 = vector.extract_strided_slice %692 {offsets = [0, 0], sizes = [8, 32], strides = [1, 1]} : vector<8x48xf32> to vector<8x32xf32>
    %694 = vector.extract_strided_slice %691 {offsets = [0, 0], sizes = [8, 32], strides = [1, 1]} : vector<8x48xf32> to vector<8x32xf32>
    %695 = arith.addf %693, %694 : vector<8x32xf32>
    %696 = arith.negf %695 : vector<8x32xf32>
    %697 = math.exp %696 : vector<8x32xf32>
    %cst_175 = arith.constant 1.000000e+00 : f32
    %698 = vector.broadcast %cst_175 : f32 to vector<8x32xf32>
    %699 = arith.addf %698, %697 : vector<8x32xf32>
    %700 = arith.divf %698, %699 : vector<8x32xf32>
    %701 = vector.extract_strided_slice %700 {offsets = [0, 0], sizes = [8, 16], strides = [1, 1]} : vector<8x32xf32> to vector<8x16xf32>
    %702 = vector.extract_strided_slice %700 {offsets = [0, 16], sizes = [8, 16], strides = [1, 1]} : vector<8x32xf32> to vector<8x16xf32>
    %703 = vector.extract_strided_slice %692 {offsets = [0, 32], sizes = [8, 16], strides = [1, 1]} : vector<8x48xf32> to vector<8x16xf32>
    %704 = vector.extract_strided_slice %691 {offsets = [0, 32], sizes = [8, 16], strides = [1, 1]} : vector<8x48xf32> to vector<8x16xf32>
    %705 = arith.addf %704, %617 : vector<8x16xf32>
    %706 = arith.mulf %701, %705 : vector<8x16xf32>
    %707 = arith.addf %703, %706 : vector<8x16xf32>
    %708 = math.tanh %707 : vector<8x16xf32>
    %cst_176 = arith.constant 1.000000e+00 : f32
    %709 = vector.broadcast %cst_176 : f32 to vector<8x16xf32>
    %710 = arith.subf %709, %702 : vector<8x16xf32>
    %711 = arith.mulf %710, %708 : vector<8x16xf32>
    %712 = arith.mulf %702, %685 : vector<8x16xf32>
    %713 = arith.addf %711, %712 : vector<8x16xf32>
    %c3_i32_177 = arith.constant 3 : i32
    %c8_i32_178 = arith.constant 8 : i32
    %714 = arith.muli %c3_i32_177, %c8_i32_178 : i32
    %715 = tpu.assume_multiple %714, 8 : i32
    %716 = arith.index_cast %715 : i32 to index
    %c0_179 = arith.constant 0 : index
    %717 = vector.load %arg12[%716, %c0_179] : memref<72x96xf32, #tpu.memory_space<vmem>>, vector<8x96xf32>
    %718 = arith.truncf %713 : vector<8x16xf32> to vector<8x16xbf16>
    %cst_180 = arith.constant dense<0.000000e+00> : vector<8x48xf32>
    %719 = tpu.matmul %718, %629, %cst_180 {dimension_numbers = #tpu.dot_dimension_numbers<[1], [0], [0], [1], [0, 0, 1, 1], [], []>} : vector<8x16xbf16>, vector<16x48xbf16>, vector<8x48xf32> -> vector<8x48xf32>
    %720 = vector.extract_strided_slice %717 {offsets = [0, 0], sizes = [8, 48], strides = [1, 1]} : vector<8x96xf32> to vector<8x48xf32>
    %721 = vector.extract_strided_slice %720 {offsets = [0, 0], sizes = [8, 32], strides = [1, 1]} : vector<8x48xf32> to vector<8x32xf32>
    %722 = vector.extract_strided_slice %719 {offsets = [0, 0], sizes = [8, 32], strides = [1, 1]} : vector<8x48xf32> to vector<8x32xf32>
    %723 = arith.addf %721, %722 : vector<8x32xf32>
    %724 = arith.negf %723 : vector<8x32xf32>
    %725 = math.exp %724 : vector<8x32xf32>
    %cst_181 = arith.constant 1.000000e+00 : f32
    %726 = vector.broadcast %cst_181 : f32 to vector<8x32xf32>
    %727 = arith.addf %726, %725 : vector<8x32xf32>
    %728 = arith.divf %726, %727 : vector<8x32xf32>
    %729 = vector.extract_strided_slice %728 {offsets = [0, 0], sizes = [8, 16], strides = [1, 1]} : vector<8x32xf32> to vector<8x16xf32>
    %730 = vector.extract_strided_slice %728 {offsets = [0, 16], sizes = [8, 16], strides = [1, 1]} : vector<8x32xf32> to vector<8x16xf32>
    %731 = vector.extract_strided_slice %720 {offsets = [0, 32], sizes = [8, 16], strides = [1, 1]} : vector<8x48xf32> to vector<8x16xf32>
    %732 = vector.extract_strided_slice %719 {offsets = [0, 32], sizes = [8, 16], strides = [1, 1]} : vector<8x48xf32> to vector<8x16xf32>
    %733 = arith.addf %732, %617 : vector<8x16xf32>
    %734 = arith.mulf %729, %733 : vector<8x16xf32>
    %735 = arith.addf %731, %734 : vector<8x16xf32>
    %736 = math.tanh %735 : vector<8x16xf32>
    %cst_182 = arith.constant 1.000000e+00 : f32
    %737 = vector.broadcast %cst_182 : f32 to vector<8x16xf32>
    %738 = arith.subf %737, %730 : vector<8x16xf32>
    %739 = arith.mulf %738, %736 : vector<8x16xf32>
    %740 = arith.mulf %730, %713 : vector<8x16xf32>
    %741 = arith.addf %739, %740 : vector<8x16xf32>
    %c4_i32_183 = arith.constant 4 : i32
    %c8_i32_184 = arith.constant 8 : i32
    %742 = arith.muli %c4_i32_183, %c8_i32_184 : i32
    %743 = tpu.assume_multiple %742, 8 : i32
    %744 = arith.index_cast %743 : i32 to index
    %c0_185 = arith.constant 0 : index
    %745 = vector.load %arg12[%744, %c0_185] : memref<72x96xf32, #tpu.memory_space<vmem>>, vector<8x96xf32>
    %746 = arith.truncf %741 : vector<8x16xf32> to vector<8x16xbf16>
    %cst_186 = arith.constant dense<0.000000e+00> : vector<8x48xf32>
    %747 = tpu.matmul %746, %629, %cst_186 {dimension_numbers = #tpu.dot_dimension_numbers<[1], [0], [0], [1], [0, 0, 1, 1], [], []>} : vector<8x16xbf16>, vector<16x48xbf16>, vector<8x48xf32> -> vector<8x48xf32>
    %748 = vector.extract_strided_slice %745 {offsets = [0, 0], sizes = [8, 48], strides = [1, 1]} : vector<8x96xf32> to vector<8x48xf32>
    %749 = vector.extract_strided_slice %748 {offsets = [0, 0], sizes = [8, 32], strides = [1, 1]} : vector<8x48xf32> to vector<8x32xf32>
    %750 = vector.extract_strided_slice %747 {offsets = [0, 0], sizes = [8, 32], strides = [1, 1]} : vector<8x48xf32> to vector<8x32xf32>
    %751 = arith.addf %749, %750 : vector<8x32xf32>
    %752 = arith.negf %751 : vector<8x32xf32>
    %753 = math.exp %752 : vector<8x32xf32>
    %cst_187 = arith.constant 1.000000e+00 : f32
    %754 = vector.broadcast %cst_187 : f32 to vector<8x32xf32>
    %755 = arith.addf %754, %753 : vector<8x32xf32>
    %756 = arith.divf %754, %755 : vector<8x32xf32>
    %757 = vector.extract_strided_slice %756 {offsets = [0, 0], sizes = [8, 16], strides = [1, 1]} : vector<8x32xf32> to vector<8x16xf32>
    %758 = vector.extract_strided_slice %756 {offsets = [0, 16], sizes = [8, 16], strides = [1, 1]} : vector<8x32xf32> to vector<8x16xf32>
    %759 = vector.extract_strided_slice %748 {offsets = [0, 32], sizes = [8, 16], strides = [1, 1]} : vector<8x48xf32> to vector<8x16xf32>
    %760 = vector.extract_strided_slice %747 {offsets = [0, 32], sizes = [8, 16], strides = [1, 1]} : vector<8x48xf32> to vector<8x16xf32>
    %761 = arith.addf %760, %617 : vector<8x16xf32>
    %762 = arith.mulf %757, %761 : vector<8x16xf32>
    %763 = arith.addf %759, %762 : vector<8x16xf32>
    %764 = math.tanh %763 : vector<8x16xf32>
    %cst_188 = arith.constant 1.000000e+00 : f32
    %765 = vector.broadcast %cst_188 : f32 to vector<8x16xf32>
    %766 = arith.subf %765, %758 : vector<8x16xf32>
    %767 = arith.mulf %766, %764 : vector<8x16xf32>
    %768 = arith.mulf %758, %741 : vector<8x16xf32>
    %769 = arith.addf %767, %768 : vector<8x16xf32>
    %c5_i32_189 = arith.constant 5 : i32
    %c8_i32_190 = arith.constant 8 : i32
    %770 = arith.muli %c5_i32_189, %c8_i32_190 : i32
    %771 = tpu.assume_multiple %770, 8 : i32
    %772 = arith.index_cast %771 : i32 to index
    %c0_191 = arith.constant 0 : index
    %773 = vector.load %arg12[%772, %c0_191] : memref<72x96xf32, #tpu.memory_space<vmem>>, vector<8x96xf32>
    %774 = arith.truncf %769 : vector<8x16xf32> to vector<8x16xbf16>
    %cst_192 = arith.constant dense<0.000000e+00> : vector<8x48xf32>
    %775 = tpu.matmul %774, %629, %cst_192 {dimension_numbers = #tpu.dot_dimension_numbers<[1], [0], [0], [1], [0, 0, 1, 1], [], []>} : vector<8x16xbf16>, vector<16x48xbf16>, vector<8x48xf32> -> vector<8x48xf32>
    %776 = vector.extract_strided_slice %773 {offsets = [0, 0], sizes = [8, 48], strides = [1, 1]} : vector<8x96xf32> to vector<8x48xf32>
    %777 = vector.extract_strided_slice %776 {offsets = [0, 0], sizes = [8, 32], strides = [1, 1]} : vector<8x48xf32> to vector<8x32xf32>
    %778 = vector.extract_strided_slice %775 {offsets = [0, 0], sizes = [8, 32], strides = [1, 1]} : vector<8x48xf32> to vector<8x32xf32>
    %779 = arith.addf %777, %778 : vector<8x32xf32>
    %780 = arith.negf %779 : vector<8x32xf32>
    %781 = math.exp %780 : vector<8x32xf32>
    %cst_193 = arith.constant 1.000000e+00 : f32
    %782 = vector.broadcast %cst_193 : f32 to vector<8x32xf32>
    %783 = arith.addf %782, %781 : vector<8x32xf32>
    %784 = arith.divf %782, %783 : vector<8x32xf32>
    %785 = vector.extract_strided_slice %784 {offsets = [0, 0], sizes = [8, 16], strides = [1, 1]} : vector<8x32xf32> to vector<8x16xf32>
    %786 = vector.extract_strided_slice %784 {offsets = [0, 16], sizes = [8, 16], strides = [1, 1]} : vector<8x32xf32> to vector<8x16xf32>
    %787 = vector.extract_strided_slice %776 {offsets = [0, 32], sizes = [8, 16], strides = [1, 1]} : vector<8x48xf32> to vector<8x16xf32>
    %788 = vector.extract_strided_slice %775 {offsets = [0, 32], sizes = [8, 16], strides = [1, 1]} : vector<8x48xf32> to vector<8x16xf32>
    %789 = arith.addf %788, %617 : vector<8x16xf32>
    %790 = arith.mulf %785, %789 : vector<8x16xf32>
    %791 = arith.addf %787, %790 : vector<8x16xf32>
    %792 = math.tanh %791 : vector<8x16xf32>
    %cst_194 = arith.constant 1.000000e+00 : f32
    %793 = vector.broadcast %cst_194 : f32 to vector<8x16xf32>
    %794 = arith.subf %793, %786 : vector<8x16xf32>
    %795 = arith.mulf %794, %792 : vector<8x16xf32>
    %796 = arith.mulf %786, %769 : vector<8x16xf32>
    %797 = arith.addf %795, %796 : vector<8x16xf32>
    %c6_i32_195 = arith.constant 6 : i32
    %c8_i32_196 = arith.constant 8 : i32
    %798 = arith.muli %c6_i32_195, %c8_i32_196 : i32
    %799 = tpu.assume_multiple %798, 8 : i32
    %800 = arith.index_cast %799 : i32 to index
    %c0_197 = arith.constant 0 : index
    %801 = vector.load %arg12[%800, %c0_197] : memref<72x96xf32, #tpu.memory_space<vmem>>, vector<8x96xf32>
    %802 = arith.truncf %797 : vector<8x16xf32> to vector<8x16xbf16>
    %cst_198 = arith.constant dense<0.000000e+00> : vector<8x48xf32>
    %803 = tpu.matmul %802, %629, %cst_198 {dimension_numbers = #tpu.dot_dimension_numbers<[1], [0], [0], [1], [0, 0, 1, 1], [], []>} : vector<8x16xbf16>, vector<16x48xbf16>, vector<8x48xf32> -> vector<8x48xf32>
    %804 = vector.extract_strided_slice %801 {offsets = [0, 0], sizes = [8, 48], strides = [1, 1]} : vector<8x96xf32> to vector<8x48xf32>
    %805 = vector.extract_strided_slice %804 {offsets = [0, 0], sizes = [8, 32], strides = [1, 1]} : vector<8x48xf32> to vector<8x32xf32>
    %806 = vector.extract_strided_slice %803 {offsets = [0, 0], sizes = [8, 32], strides = [1, 1]} : vector<8x48xf32> to vector<8x32xf32>
    %807 = arith.addf %805, %806 : vector<8x32xf32>
    %808 = arith.negf %807 : vector<8x32xf32>
    %809 = math.exp %808 : vector<8x32xf32>
    %cst_199 = arith.constant 1.000000e+00 : f32
    %810 = vector.broadcast %cst_199 : f32 to vector<8x32xf32>
    %811 = arith.addf %810, %809 : vector<8x32xf32>
    %812 = arith.divf %810, %811 : vector<8x32xf32>
    %813 = vector.extract_strided_slice %812 {offsets = [0, 0], sizes = [8, 16], strides = [1, 1]} : vector<8x32xf32> to vector<8x16xf32>
    %814 = vector.extract_strided_slice %812 {offsets = [0, 16], sizes = [8, 16], strides = [1, 1]} : vector<8x32xf32> to vector<8x16xf32>
    %815 = vector.extract_strided_slice %804 {offsets = [0, 32], sizes = [8, 16], strides = [1, 1]} : vector<8x48xf32> to vector<8x16xf32>
    %816 = vector.extract_strided_slice %803 {offsets = [0, 32], sizes = [8, 16], strides = [1, 1]} : vector<8x48xf32> to vector<8x16xf32>
    %817 = arith.addf %816, %617 : vector<8x16xf32>
    %818 = arith.mulf %813, %817 : vector<8x16xf32>
    %819 = arith.addf %815, %818 : vector<8x16xf32>
    %820 = math.tanh %819 : vector<8x16xf32>
    %cst_200 = arith.constant 1.000000e+00 : f32
    %821 = vector.broadcast %cst_200 : f32 to vector<8x16xf32>
    %822 = arith.subf %821, %814 : vector<8x16xf32>
    %823 = arith.mulf %822, %820 : vector<8x16xf32>
    %824 = arith.mulf %814, %797 : vector<8x16xf32>
    %825 = arith.addf %823, %824 : vector<8x16xf32>
    %c7_i32_201 = arith.constant 7 : i32
    %c8_i32_202 = arith.constant 8 : i32
    %826 = arith.muli %c7_i32_201, %c8_i32_202 : i32
    %827 = tpu.assume_multiple %826, 8 : i32
    %828 = arith.index_cast %827 : i32 to index
    %c0_203 = arith.constant 0 : index
    %829 = vector.load %arg12[%828, %c0_203] : memref<72x96xf32, #tpu.memory_space<vmem>>, vector<8x96xf32>
    %830 = arith.truncf %825 : vector<8x16xf32> to vector<8x16xbf16>
    %cst_204 = arith.constant dense<0.000000e+00> : vector<8x48xf32>
    %831 = tpu.matmul %830, %629, %cst_204 {dimension_numbers = #tpu.dot_dimension_numbers<[1], [0], [0], [1], [0, 0, 1, 1], [], []>} : vector<8x16xbf16>, vector<16x48xbf16>, vector<8x48xf32> -> vector<8x48xf32>
    %832 = vector.extract_strided_slice %829 {offsets = [0, 0], sizes = [8, 48], strides = [1, 1]} : vector<8x96xf32> to vector<8x48xf32>
    %833 = vector.extract_strided_slice %832 {offsets = [0, 0], sizes = [8, 32], strides = [1, 1]} : vector<8x48xf32> to vector<8x32xf32>
    %834 = vector.extract_strided_slice %831 {offsets = [0, 0], sizes = [8, 32], strides = [1, 1]} : vector<8x48xf32> to vector<8x32xf32>
    %835 = arith.addf %833, %834 : vector<8x32xf32>
    %836 = arith.negf %835 : vector<8x32xf32>
    %837 = math.exp %836 : vector<8x32xf32>
    %cst_205 = arith.constant 1.000000e+00 : f32
    %838 = vector.broadcast %cst_205 : f32 to vector<8x32xf32>
    %839 = arith.addf %838, %837 : vector<8x32xf32>
    %840 = arith.divf %838, %839 : vector<8x32xf32>
    %841 = vector.extract_strided_slice %840 {offsets = [0, 0], sizes = [8, 16], strides = [1, 1]} : vector<8x32xf32> to vector<8x16xf32>
    %842 = vector.extract_strided_slice %840 {offsets = [0, 16], sizes = [8, 16], strides = [1, 1]} : vector<8x32xf32> to vector<8x16xf32>
    %843 = vector.extract_strided_slice %832 {offsets = [0, 32], sizes = [8, 16], strides = [1, 1]} : vector<8x48xf32> to vector<8x16xf32>
    %844 = vector.extract_strided_slice %831 {offsets = [0, 32], sizes = [8, 16], strides = [1, 1]} : vector<8x48xf32> to vector<8x16xf32>
    %845 = arith.addf %844, %617 : vector<8x16xf32>
    %846 = arith.mulf %841, %845 : vector<8x16xf32>
    %847 = arith.addf %843, %846 : vector<8x16xf32>
    %848 = math.tanh %847 : vector<8x16xf32>
    %cst_206 = arith.constant 1.000000e+00 : f32
    %849 = vector.broadcast %cst_206 : f32 to vector<8x16xf32>
    %850 = arith.subf %849, %842 : vector<8x16xf32>
    %851 = arith.mulf %850, %848 : vector<8x16xf32>
    %852 = arith.mulf %842, %825 : vector<8x16xf32>
    %853 = arith.addf %851, %852 : vector<8x16xf32>
    %c8_i32_207 = arith.constant 8 : i32
    %c8_i32_208 = arith.constant 8 : i32
    %854 = arith.muli %c8_i32_207, %c8_i32_208 : i32
    %855 = tpu.assume_multiple %854, 8 : i32
    %856 = arith.index_cast %855 : i32 to index
    %c0_209 = arith.constant 0 : index
    %857 = vector.load %arg12[%856, %c0_209] : memref<72x96xf32, #tpu.memory_space<vmem>>, vector<8x96xf32>
    %858 = arith.truncf %853 : vector<8x16xf32> to vector<8x16xbf16>
    %cst_210 = arith.constant dense<0.000000e+00> : vector<8x48xf32>
    %859 = tpu.matmul %858, %629, %cst_210 {dimension_numbers = #tpu.dot_dimension_numbers<[1], [0], [0], [1], [0, 0, 1, 1], [], []>} : vector<8x16xbf16>, vector<16x48xbf16>, vector<8x48xf32> -> vector<8x48xf32>
    %860 = vector.extract_strided_slice %857 {offsets = [0, 0], sizes = [8, 48], strides = [1, 1]} : vector<8x96xf32> to vector<8x48xf32>
    %861 = vector.extract_strided_slice %860 {offsets = [0, 0], sizes = [8, 32], strides = [1, 1]} : vector<8x48xf32> to vector<8x32xf32>
    %862 = vector.extract_strided_slice %859 {offsets = [0, 0], sizes = [8, 32], strides = [1, 1]} : vector<8x48xf32> to vector<8x32xf32>
    %863 = arith.addf %861, %862 : vector<8x32xf32>
    %864 = arith.negf %863 : vector<8x32xf32>
    %865 = math.exp %864 : vector<8x32xf32>
    %cst_211 = arith.constant 1.000000e+00 : f32
    %866 = vector.broadcast %cst_211 : f32 to vector<8x32xf32>
    %867 = arith.addf %866, %865 : vector<8x32xf32>
    %868 = arith.divf %866, %867 : vector<8x32xf32>
    %869 = vector.extract_strided_slice %868 {offsets = [0, 0], sizes = [8, 16], strides = [1, 1]} : vector<8x32xf32> to vector<8x16xf32>
    %870 = vector.extract_strided_slice %868 {offsets = [0, 16], sizes = [8, 16], strides = [1, 1]} : vector<8x32xf32> to vector<8x16xf32>
    %871 = vector.extract_strided_slice %860 {offsets = [0, 32], sizes = [8, 16], strides = [1, 1]} : vector<8x48xf32> to vector<8x16xf32>
    %872 = vector.extract_strided_slice %859 {offsets = [0, 32], sizes = [8, 16], strides = [1, 1]} : vector<8x48xf32> to vector<8x16xf32>
    %873 = arith.addf %872, %617 : vector<8x16xf32>
    %874 = arith.mulf %869, %873 : vector<8x16xf32>
    %875 = arith.addf %871, %874 : vector<8x16xf32>
    %876 = math.tanh %875 : vector<8x16xf32>
    %cst_212 = arith.constant 1.000000e+00 : f32
    %877 = vector.broadcast %cst_212 : f32 to vector<8x16xf32>
    %878 = arith.subf %877, %870 : vector<8x16xf32>
    %879 = arith.mulf %878, %876 : vector<8x16xf32>
    %880 = arith.mulf %870, %853 : vector<8x16xf32>
    %881 = arith.addf %879, %880 : vector<8x16xf32>
    %c9_i32_213 = arith.constant 9 : i32
    %c64 = arith.constant 64 : index
    %c0_214 = arith.constant 0 : index
    %882 = vector.load %arg12[%c64, %c0_214] : memref<72x96xf32, #tpu.memory_space<vmem>>, vector<8x96xf32>
    %cst_215 = arith.constant 0.000000e+00 : f32
    %883 = vector.broadcast %cst_215 : f32 to vector<8x48xf32>
    %884 = vector.extract_strided_slice %882 {offsets = [0, 48], sizes = [8, 48], strides = [1, 1]} : vector<8x96xf32> to vector<8x48xf32>
    %885 = vector.extract_strided_slice %884 {offsets = [0, 0], sizes = [8, 32], strides = [1, 1]} : vector<8x48xf32> to vector<8x32xf32>
    %886 = vector.extract_strided_slice %883 {offsets = [0, 0], sizes = [8, 32], strides = [1, 1]} : vector<8x48xf32> to vector<8x32xf32>
    %887 = arith.addf %885, %886 : vector<8x32xf32>
    %888 = arith.negf %887 : vector<8x32xf32>
    %889 = math.exp %888 : vector<8x32xf32>
    %cst_216 = arith.constant 1.000000e+00 : f32
    %890 = vector.broadcast %cst_216 : f32 to vector<8x32xf32>
    %891 = arith.addf %890, %889 : vector<8x32xf32>
    %892 = arith.divf %890, %891 : vector<8x32xf32>
    %893 = vector.extract_strided_slice %892 {offsets = [0, 0], sizes = [8, 16], strides = [1, 1]} : vector<8x32xf32> to vector<8x16xf32>
    %894 = vector.extract_strided_slice %892 {offsets = [0, 16], sizes = [8, 16], strides = [1, 1]} : vector<8x32xf32> to vector<8x16xf32>
    %895 = vector.extract_strided_slice %884 {offsets = [0, 32], sizes = [8, 16], strides = [1, 1]} : vector<8x48xf32> to vector<8x16xf32>
    %896 = vector.extract_strided_slice %883 {offsets = [0, 32], sizes = [8, 16], strides = [1, 1]} : vector<8x48xf32> to vector<8x16xf32>
    %897 = arith.addf %896, %622 : vector<8x16xf32>
    %898 = arith.mulf %893, %897 : vector<8x16xf32>
    %899 = arith.addf %895, %898 : vector<8x16xf32>
    %900 = math.tanh %899 : vector<8x16xf32>
    %cst_217 = arith.constant 1.000000e+00 : f32
    %901 = vector.broadcast %cst_217 : f32 to vector<8x16xf32>
    %902 = arith.subf %901, %894 : vector<8x16xf32>
    %903 = arith.mulf %902, %900 : vector<8x16xf32>
    %904 = arith.mulf %894, %628 : vector<8x16xf32>
    %905 = arith.addf %903, %904 : vector<8x16xf32>
    %906 = tpu.concatenate %881, %905 in 1 : vector<8x16xf32>, vector<8x16xf32> -> vector<8x32xf32>
    %cst_218 = arith.constant 0.000000e+00 : f32
    %907 = vector.broadcast %cst_218 : f32 to vector<8x32xf32>
    %908 = arith.cmpf ogt, %906, %907 : vector<8x32xf32>
    %cst_219 = arith.constant 2.000000e-01 : f32
    %909 = vector.broadcast %cst_219 : f32 to vector<8x32xf32>
    %910 = arith.mulf %909, %906 : vector<8x32xf32>
    %911 = arith.select %908, %906, %910 : vector<8x32xi1>, vector<8x32xf32>
    %c0_220 = arith.constant 0 : index
    %c0_221 = arith.constant 0 : index
    %912 = vector.load %arg7[%c0_220, %c0_221] : memref<32x128xf32, #tpu.memory_space<vmem>>, vector<32x128xf32>
    %cst_222 = arith.constant dense<0.000000e+00> : vector<8x128xf32>
    %913 = tpu.matmul %911, %912, %cst_222 {dimension_numbers = #tpu.dot_dimension_numbers<[1], [0], [0], [1], [0, 0, 1, 1], [], []>} : vector<8x32xf32>, vector<32x128xf32>, vector<8x128xf32> -> vector<8x128xf32>
    %c0_223 = arith.constant 0 : index
    %c0_224 = arith.constant 0 : index
    %914 = vector.load %arg8[%c0_223, %c0_224] : memref<1x128xf32, #tpu.memory_space<vmem>>, vector<1x128xf32>
    %915 = vector.broadcast %914 : vector<1x128xf32> to vector<8x128xf32>
    %916 = arith.addf %913, %915 : vector<8x128xf32>
    %c0_225 = arith.constant 0 : index
    %c0_226 = arith.constant 0 : index
    %917 = vector.load %arg9[%c0_225, %c0_226] : memref<128x128xf32, #tpu.memory_space<vmem>>, vector<128x128xf32>
    %cst_227 = arith.constant dense<0.000000e+00> : vector<8x128xf32>
    %918 = tpu.matmul %916, %917, %cst_227 {dimension_numbers = #tpu.dot_dimension_numbers<[1], [0], [0], [1], [0, 0, 1, 1], [], []>} : vector<8x128xf32>, vector<128x128xf32>, vector<8x128xf32> -> vector<8x128xf32>
    %c0_228 = arith.constant 0 : index
    %c0_229 = arith.constant 0 : index
    %919 = vector.load %arg10[%c0_228, %c0_229] : memref<1x128xf32, #tpu.memory_space<vmem>>, vector<1x128xf32>
    %920 = vector.broadcast %919 : vector<1x128xf32> to vector<8x128xf32>
    %921 = arith.addf %918, %920 : vector<8x128xf32>
    %c0_230 = arith.constant 0 : index
    %c0_231 = arith.constant 0 : index
    %922 = vector.load %arg11[%c0_230, %c0_231] : memref<8x128xf32, #tpu.memory_space<vmem>>, vector<8x128xf32>
    tpu.vector_store %arg11[%c0_230, %c0_231], %921 {strides = array<i32>} : memref<8x128xf32, #tpu.memory_space<vmem>>, vector<8x128xf32>,
    return
  }
}

</mosaic_0001>

<bundles_post_ra>
// kernel: tpu_custom_call.1
= control target key start
LH: loop header
LB: loop body
LE: loop exit
PB: predicated region body
PF: predicated region fallthrough
CT: control target
= control target key end

     0   :  { %16 = vsyncpa [#allocation5], 0  ;;  %s4145_s0 = inlined_call_operand.hbm [shape: bf16[4,8,32], index: 0, kind: input, shape index: {}]   ;;  %s4146_s1 = inlined_call_operand.hbm [shape: bf16[3,8,32], index: 1, kind: input, shape index: {}]   ;;  %s4147_s2 = inlined_call_operand.hbm [shape: bf16[2,8,32], index: 2, kind: input, shape index: {}]   ;;  %s4148_s3 = inlined_call_operand.hbm [shape: bf16[2,32,96], index: 3, kind: input, shape index: {}]   ;;  %s4149_s4 = inlined_call_operand.hbm [shape: bf16[2,32,96], index: 4, kind: input, shape index: {}]   ;;  %s4150_s5 = inlined_call_operand.vmem [shape: f32[2,1,96], index: 5, kind: input, shape index: {}]   ;;  %s4151_s6 = inlined_call_operand.vmem [shape: f32[2,1,32], index: 6, kind: input, shape index: {}]   ;;  %s4152_s7 = inlined_call_operand.hbm [shape: f32[32,128], index: 7, kind: input, shape index: {}]   ;;  %s4153_s8 = inlined_call_operand.vmem [shape: f32[1,128], index: 8, kind: input, shape index: {}]   ;;  %s4154_s9 = inlined_call_operand.hbm [shape: f32[128,128], index: 9, kind: input, shape index: {}]   ;;  %s4155_s10 = inlined_call_operand.vmem [shape: f32[1,128], index: 10, kind: input, shape index: {}]   ;;  %s4156_s11 = inlined_call_operand.hbm [shape: f32[8,128], index: 11, kind: output, shape index: {}]  }
   0x1   :  { %17 = vsyncpa [#allocation8], 0 }
   0x2   :  { %18 = vsyncpa [#allocation11], 0 }
   0x3   :  { %19 = vsyncpa [#allocation14], 0 }
   0x4   :  { %20 = vsyncpa [#allocation6], 0  ;;  %s3375_s17 = smov [#allocation7]   ;;  %s3376_s19 = smov [#allocation10]  }
   0x5   :  { %s38_s18 = sshll.u32 %s3375_s17, 4  ;;  %s62_s20 = sshll.u32 %s3376_s19, 4  ;;  %s39_s18 = int_to_ptr.vmem [resolvable:$true] %s38_s18  ;;  %s3455_s20 = int_to_ptr.vmem [resolvable:$true] %s62_s20 }
   0x6   :  { %s3189_s23 = scalar_lea.hbm %s4146_s1, 192 }
   0x7   :  { %p3190_p0 = scmp.ne.s32.totalorder %s4146_s1, %s3189_s23  ;;  %p3193_p1 = scmp.lt.u32.totalorder %s3189_s23, %s4146_s1 }
   0x9   :  { %p3195_p2 = pnand %p3193_p1, %p3190_p0 }
   0xb   :  { %3198 = shalt.err (!%p3195_p2)
}
   0xc   :  { %s3199_s28 = scalar_lea.vmem %s39_s18, 192  ;;  %p3204_p4 = scmp.lt.s32.totalorder %s39_s18, %s39_s18 }
   0xd   :  { %p3200_p3 = scmp.ne.s32.totalorder %s39_s18, %s3199_s28  ;;  %p3205_p5 = scmp.lt.s32.totalorder %s3199_s28, %s3199_s28 }
   0xf   :  { %p3206_p6 = por %p3205_p5, %p3204_p4 }
  0x11   :  { %p3207_p7 = pnand %p3206_p6, %p3200_p3 }
  0x13   :  { %3210 = shalt.err (!%p3207_p7)
}
  0x14   :  { %s3377_s29 = smov 64   ;;  %s3378_s30 = smov 4  }
  0x15   :  { %44 = dma.hbm_to_vmem [thread:$0]  %s4146_s1, 192, %s39_s18, [#allocation8], %s3377_s29, %s3377_s29, %s3378_s30  }
  0x16   :  { %s3211_s16 = scalar_lea.hbm %s4148_s3, 512 }
  0x17   :  { %p3212_p8 = scmp.ne.s32.totalorder %s4148_s3, %s3211_s16  ;;  %p3215_p9 = scmp.lt.u32.totalorder %s3211_s16, %s4148_s3 }
  0x19   :  { %p3217_p10 = pnand %p3215_p9, %p3212_p8 }
  0x1b   :  { %3220 = shalt.err (!%p3217_p10)
}
  0x1c   :  { %s3221_s23 = scalar_lea.vmem %s3455_s20, 512  ;;  %p3226_p12 = scmp.lt.s32.totalorder %s3455_s20, %s3455_s20 }
  0x1d   :  { %p3222_p11 = scmp.ne.s32.totalorder %s3455_s20, %s3221_s23  ;;  %p3227_p13 = scmp.lt.s32.totalorder %s3221_s23, %s3221_s23 }
  0x1f   :  { %p3228_p0 = por %p3227_p13, %p3226_p12 }
  0x21   :  { %p3229_p1 = pnand %p3228_p0, %p3222_p11 }
  0x23   :  { %3232 = shalt.err (!%p3229_p1)
}
  0x24   :  { %68 = dma.hbm_to_vmem [thread:$0]  %s4148_s3, 512, %s3455_s20, [#allocation11], %s3377_s29, %s3377_s29, %s3378_s30  }
  0x25   :  { %s3379_s24 = smov [#allocation13]   ;;  %s3233_s28 = scalar_lea.hbm %s4152_s7, 512 }
  0x26   :  { %s90_s25 = sshll.u32 %s3379_s24, 4  ;;  %p3234_p2 = scmp.ne.s32.totalorder %s4152_s7, %s3233_s28  ;;  %s91_s25 = int_to_ptr.vmem [resolvable:$true] %s90_s25 }
  0x27   :  { %p3237_p3 = scmp.lt.u32.totalorder %s3233_s28, %s4152_s7 }
  0x29   :  { %p3239_p4 = pnand %p3237_p3, %p3234_p2 }
  0x2b   :  { %3242 = shalt.err (!%p3239_p4)
}
  0x2c   :  { %s3243_s16 = scalar_lea.vmem %s91_s25, 512  ;;  %p3248_p6 = scmp.lt.s32.totalorder %s91_s25, %s91_s25 }
  0x2d   :  { %p3244_p5 = scmp.ne.s32.totalorder %s91_s25, %s3243_s16  ;;  %p3249_p7 = scmp.lt.s32.totalorder %s3243_s16, %s3243_s16 }
  0x2f   :  { %p3250_p8 = por %p3249_p7, %p3248_p6 }
  0x31   :  { %p3251_p9 = pnand %p3250_p8, %p3244_p5 }
  0x33   :  { %3254 = shalt.err (!%p3251_p9)
}
  0x34   :  { %s3380_s3 = smov 128   ;;  %s3381_s20 = smov 8  }
  0x35   :  { %96 = dma.hbm_to_vmem [thread:$0]  %s4152_s7, 512, %s91_s25, [#allocation14], %s3380_s3, %s3380_s3, %s3381_s20  }
  0x36   :  { %s3382_s21 = smov [#allocation4]   ;;  %s3383_s23 = smov [#allocation9]  }
  0x37   :  { %s26_s22 = sshll.u32 %s3382_s21, 4  ;;  %s50_s1 = sshll.u32 %s3383_s23, 4  ;;  %s27_s22 = int_to_ptr.vmem [resolvable:$true] %s26_s22  ;;  %s51_s1 = int_to_ptr.vmem [resolvable:$true] %s50_s1 }
  0x38   :  { %s3255_s26 = scalar_lea.hbm %s4145_s0, 256 }
  0x39   :  { %p3256_p10 = scmp.ne.s32.totalorder %s4145_s0, %s3255_s26  ;;  %p3259_p11 = scmp.lt.u32.totalorder %s3255_s26, %s4145_s0 }
  0x3b   :  { %p3261_p12 = pnand %p3259_p11, %p3256_p10 }
  0x3d   :  { %3264 = shalt.err (!%p3261_p12)
}
  0x3e   :  { %s3265_s7 = scalar_lea.vmem %s27_s22, 256  ;;  %p3270_p0 = scmp.lt.s32.totalorder %s27_s22, %s27_s22 }
  0x3f   :  { %p3266_p13 = scmp.ne.s32.totalorder %s27_s22, %s3265_s7  ;;  %p3271_p1 = scmp.lt.s32.totalorder %s3265_s7, %s3265_s7 }
  0x41   :  { %p3272_p2 = por %p3271_p1, %p3270_p0 }
  0x43   :  { %p3273_p3 = pnand %p3272_p2, %p3266_p13 }
  0x45   :  { %3276 = shalt.err (!%p3273_p3)
}
  0x46   :  { %32 = dma.hbm_to_vmem [thread:$0]  %s4145_s0, 256, %s27_s22, [#allocation5], %s3377_s29, %s3377_s29, %s3378_s30  }
  0x47   :  { %s3277_s17 = scalar_lea.hbm %s4147_s2, 128 }
  0x48   :  { %p3278_p4 = scmp.ne.s32.totalorder %s4147_s2, %s3277_s17  ;;  %p3281_p5 = scmp.lt.u32.totalorder %s3277_s17, %s4147_s2 }
  0x4a   :  { %p3283_p6 = pnand %p3281_p5, %p3278_p4 }
  0x4c   :  { %3286 = shalt.err (!%p3283_p6)
}
  0x4d   :  { %s3287_s24 = scalar_lea.vmem %s51_s1, 128  ;;  %p3292_p8 = scmp.lt.s32.totalorder %s51_s1, %s51_s1 }
  0x4e   :  { %p3288_p7 = scmp.ne.s32.totalorder %s51_s1, %s3287_s24  ;;  %p3293_p9 = scmp.lt.s32.totalorder %s3287_s24, %s3287_s24 }
  0x50   :  { %p3294_p10 = por %p3293_p9, %p3292_p8 }
  0x52   :  { %p3295_p11 = pnand %p3294_p10, %p3288_p7 }
  0x54   :  { %3298 = shalt.err (!%p3295_p11)
}
  0x55   :  { %56 = dma.hbm_to_vmem [thread:$0]  %s4147_s2, 128, %s51_s1, [#allocation8], %s3377_s29, %s3377_s29, %s3378_s30  }
  0x56   :  { %s3384_s26 = smov [#allocation12]   ;;  %s3385_s28 = smov [#allocation15]  }
  0x57   :  { %s74_s27 = sshll.u32 %s3384_s26, 4  ;;  %s104_s12 = sshll.u32 %s3385_s28, 4  ;;  %s75_s27 = int_to_ptr.vmem [resolvable:$true] %s74_s27  ;;  %s105_s12 = int_to_ptr.vmem [resolvable:$true] %s104_s12 }
  0x58   :  { %s3299_s25 = scalar_lea.hbm %s4149_s4, 512 }
  0x59   :  { %p3300_p12 = scmp.ne.s32.totalorder %s4149_s4, %s3299_s25  ;;  %p3303_p13 = scmp.lt.u32.totalorder %s3299_s25, %s4149_s4 }
  0x5b   :  { %p3305_p0 = pnand %p3303_p13, %p3300_p12 }
  0x5d   :  { %3308 = shalt.err (!%p3305_p0)
}
  0x5e   :  { %s3309_s2 = scalar_lea.vmem %s75_s27, 512  ;;  %p3314_p2 = scmp.lt.s32.totalorder %s75_s27, %s75_s27 }
  0x5f   :  { %p3310_p1 = scmp.ne.s32.totalorder %s75_s27, %s3309_s2  ;;  %p3315_p3 = scmp.lt.s32.totalorder %s3309_s2, %s3309_s2 }
  0x61   :  { %p3316_p4 = por %p3315_p3, %p3314_p2 }
  0x63   :  { %p3317_p5 = pnand %p3316_p4, %p3310_p1 }
  0x65   :  { %3320 = shalt.err (!%p3317_p5)
}
  0x66   :  { %80 = dma.hbm_to_vmem [thread:$0]  %s4149_s4, 512, %s75_s27, [#allocation11], %s3377_s29, %s3377_s29, %s3378_s30  }
  0x67   :  { %s3321_s18 = scalar_lea.hbm %s4154_s9, 2048 }
  0x68   :  { %p3322_p6 = scmp.ne.s32.totalorder %s4154_s9, %s3321_s18  ;;  %p3325_p7 = scmp.lt.u32.totalorder %s3321_s18, %s4154_s9 }
  0x6a   :  { %p3327_p8 = pnand %p3325_p7, %p3322_p6 }
  0x6c   :  { %3330 = shalt.err (!%p3327_p8)
}
  0x6d   :  { %s3331_s28 = scalar_lea.vmem %s105_s12, 2048  ;;  %p3336_p10 = scmp.lt.s32.totalorder %s105_s12, %s105_s12 }
  0x6e   :  { %p3332_p9 = scmp.ne.s32.totalorder %s105_s12, %s3331_s28  ;;  %p3337_p11 = scmp.lt.s32.totalorder %s3331_s28, %s3331_s28 }
  0x70   :  { %p3338_p12 = por %p3337_p11, %p3336_p10 }
  0x72   :  { %p3339_p13 = pnand %p3338_p12, %p3332_p9 }
  0x74   :  { %3342 = shalt.err (!%p3339_p13)
}
  0x75   :  { %110 = dma.hbm_to_vmem [thread:$0]  %s4154_s9, 2048, %s105_s12, [#allocation14], %s3380_s3, %s3380_s3, %s3381_s20  }
  0x76   :  { %3365 = dma.done.wait [#allocation5], 256  }
  0x77   :  { %3366 = vsyncadd [#allocation5], 4294967040 }
  0x78   :  { %3367 = dma.done.wait [#allocation8], 320  }
  0x79   :  { %3368 = vsyncadd [#allocation8], 4294966976 }
  0x7a   :  { %3369 = dma.done.wait [#allocation11], 1024  }
  0x7b   :  { %3370 = vsyncadd [#allocation11], 4294966272 }
  0x7c   :  { %3371 = dma.done.wait [#allocation14], 2560  }
  0x7d   :  { %3372 = vsyncadd [#allocation14], 4294964736  ;;  %v3386_v0 = vmov 0.0   ;;  %vm3387_vm0 = vmmov 0   ;;  %v3007_v1 = vld [vmem:[#allocation10] sm:$0xff]   ;;  %vm139_vm1 = vcmask 257024  }
  0x7e   :  { %2737 = vmatprep.subr.bf16.mxu0 %v3386_v0  ;;  %2741 = vmatprep.mubr.msk.bf16.mxu0 %vm3387_vm0, %v3386_v0  ;;  %v3008_v2 = vld [vmem:[#allocation10 + $0x8] sm:$0xff]   ;;  %v135_v3 = vld [vmem:[#allocation4] sm:$0xf]  ;;  %v136_v4 = vld [vmem:[#allocation4 + $0x4] sm:$0xf]  ;;  %s3388_s20 = smov 32  }
  0x7f   :  { %2769 = vmatprep.subr.bf16.mxu1 %v3386_v0  ;;  %2773 = vmatprep.mubr.msk.bf16.mxu1 %vm3387_vm0, %v3386_v0  ;;  %140 = vst.msk [vmem:[#allocation3] sm:$0xf] %vm139_vm1, %v135_v3  ;;  %141 = vst.msk [vmem:[#allocation3 + $0x4] sm:$0xf] %vm139_vm1, %v136_v4  ;;  %v3576_v5 = vld [vmem:[#allocation12] sm:$0xff]   ;;  %v3585_v13 = vld [vmem:[#allocation12 + $0x8] sm:$0xff]  }
  0x80   :  { %2738 = vmatpush3.bf16.msra.mxu0 %v3007_v1  ;;  %v137_v6 = vld [vmem:[#allocation4 + $0x8] sm:$0xf]  ;;  %v138_v7 = vld [vmem:[#allocation4 + $0xc] sm:$0xf]  ;;  %v144_v8 = vld [vmem:[#allocation7] sm:$0xf]  ;;  %2770 = vmatpush3.bf16.msra.mxu1 %v3576_v5 }
  0x81   :  { %2739 = vmatprep.subr.bf16.mxu0 %v3386_v0  ;;  %142 = vst.msk [vmem:[#allocation3 + $0x8] sm:$0xf] %vm139_vm1, %v137_v6  ;;  %v145_v9 = vld [vmem:[#allocation7 + $0x4] sm:$0xf]  ;;  %143 = vst.msk [vmem:[#allocation3 + $0xc] sm:$0xf] %vm139_vm1, %v138_v7  ;;  %2771 = vmatprep.subr.bf16.mxu1 %v3386_v0 }
  0x82   :  { %147 = vst.msk [vmem:[#allocation3 + $0x10] sm:$0xf] %vm139_vm1, %v144_v8  ;;  %148 = vst.msk [vmem:[#allocation3 + $0x14] sm:$0xf] %vm139_vm1, %v145_v9  ;;  %v146_v10 = vld [vmem:[#allocation7 + $0x8] sm:$0xf] }
  0x83   :  { %v150_v11 = vld [vmem:[#allocation9] sm:$0xf]  ;;  %v151_v12 = vld [vmem:[#allocation9 + $0x4] sm:$0xf]  ;;  %149 = vst.msk [vmem:[#allocation3 + $0x18] sm:$0xf] %vm139_vm1, %v146_v10 }
  0x84   :  { %2740 = vmatpush3.bf16.msra.mxu0 %v3008_v2  ;;  %152 = vst.msk [vmem:[#allocation3 + $0x1c] sm:$0xf] %vm139_vm1, %v150_v11  ;;  %153 = vst.msk [vmem:[#allocation3 + $0x20] sm:$0xf] %vm139_vm1, %v151_v12  ;;  %v2541_v14 = vld [vmem:[%s4151_s6] ss:$0 sm:$0xff]  ;;  %2772 = vmatpush3.bf16.msra.mxu1 %v3585_v13 }
  0x85   :  { %2761 = vmatprep.subr.bf16.mxu0 %v3386_v0  ;;  %383 = vrot.lane.b32.xlu0 %v2541_v14, %s3388_s20  ;;  %vm219_vm2 = vcmask 261120   ;;  %v3389_v20 = vmov 0.0|0.0   ;;  %v2542_v21 = vld [vmem:[%s4150_s5] ss:$0 sm:$0xff]  ;;  %vm307_vm3 = vcmask 785408   ;;  %s3390_s12 = smov 96  }
  0x86   :  { %v3009_v15 = vld [vmem:[#allocation3] sm:$0xff]   ;;  %2777 = vmatprep.subr.bf16.mxu1 %v3386_v0  ;;  %s3391_s13 = smov 112   ;;  %s3392_s7 = smov 80   ;;  %vm467_vm4 = vcmask 130048   ;;  %vm443_vm5 = vcmask 125952   ;;  %vm453_vm6 = vcmask 257152  }
  0x87   :  { %2742 = vmatmul.mubr.msk.bf16.vlgmr.msra.gmra.mrb[0].mxu0 %vm219_vm2, %v3009_v15  ;;  %s3394_s1 = smov [#allocation16]  }
  0x88   :  { %2762 = vmatpush3.bf16.msra.mxu0 %v3576_v5  ;;  %2745 = vmatprep.mubr.msk.bf16.mxu0 %vm3387_vm0, %v3386_v0  ;;  %v3011_v16 = vld [vmem:[#allocation3 + $0x8] sm:$0xff]   ;;  %s2529_s19 = sshll.u32 %s3394_s1, 4  ;;  %s2530_s19 = int_to_ptr.vmem [resolvable:$true] %s2529_s19 }
  0x89   :  { %413 = vrot.lane.b32.xlu0 %v2541_v14, %s3377_s29  ;;  %2763 = vmatprep.subr.bf16.mxu0 %v3386_v0  ;;  %v3012_v17 = vld [vmem:[#allocation3 + $0x10] sm:$0xff]   ;;  %s3343_s21 = scalar_lea.vmem %s2530_s19, 128  ;;  %p3348_p1 = scmp.lt.s32.totalorder %s2530_s19, %s2530_s19 }
  0x8a   :  { %p3344_p0 = scmp.ne.s32.totalorder %s2530_s19, %s3343_s21  ;;  %p3349_p2 = scmp.lt.s32.totalorder %s3343_s21, %s3343_s21 }
  0x8b   :  { %v3014_v18 = vld [vmem:[#allocation3 + $0x18] sm:$0xff]   ;;  %v3015_v19 = vld [vmem:[#allocation3 + $0x20] ss:$0 sps:$4 sm:$0xff]  }
  0x8c   :  { %2764 = vmatpush3.bf16.msra.mxu0 %v3585_v13  ;;  %p3350_p3 = por %p3349_p2, %p3348_p1 }
  0x8d   :  { %2801 = vmatprep.subr.bf16.mxu0 %v3386_v0 }
  0x8e   :  { %p3351_p4 = pnand %p3350_p3, %p3344_p0 }
  0x8f   :  { %2746 = vmatmul.mubr.msk.bf16.gmra.mrb[4].mxu0 %vm219_vm2, %v3011_v16 }
  0x90   :  { %2749 = vmatprep.mubr.msk.bf16.mxu0 %vm3387_vm0, %v3386_v0 }
  0x97   :  { %2750 = vmatmul.mubr.msk.bf16.gmra.mrb[8].mxu0 %vm219_vm2, %v3012_v17 }
  0x98   :  { %2753 = vmatprep.mubr.msk.bf16.mxu0 %vm3387_vm0, %v3386_v0 }
  0x9f   :  { %2754 = vmatmul.mubr.msk.bf16.gmra.mrb[12].mxu0 %vm219_vm2, %v3014_v18 }
  0xa0   :  { %2757 = vmatprep.mubr.msk.bf16.mxu0 %vm3387_vm0, %v3386_v0 }
  0xa7   :  { %2758 = vmatmul.mubr.msk.bf16.gmra.mrb[16].mxu0 %vm219_vm2, %v3015_v19 }
  0xa8   :  { %2765 = vmatprep.mubr.msk.bf16.mxu0 %vm3387_vm0, %v3386_v0 }
  0xaf   :  { %2766 = vmatmul.mubr.bf16.vlgmr.msra.gmra.mrb[20].mxu0 %v3389_v20 }
  0xb0   :  { %2802 = vmatpush3.bf16.msra.mxu0 %v3576_v5  ;;  %2805 = vmatprep.mubr.msk.bf16.mxu0 %vm3387_vm0, %v3386_v0 }
  0xb1   :  { %2803 = vmatprep.subr.bf16.mxu0 %v3386_v0 }
  0xb4   :  { %2804 = vmatpush3.bf16.msra.mxu0 %v3585_v13 }
  0xb5   :  { %2817 = vmatprep.subr.bf16.mxu0 %v3386_v0 }
  0xf7   :  { %v3635_v51 = vpop.permute.xlu0 %383 }
  0xfb   :  { %v3638_v55 = vpop.permute.xlu0 %413 }
 0x15a   :  { %v269_v22 = vpop.f32.mrb[0].mxu0 }
 0x15b   :  { %v270_v23 = vadd.f32 %v2542_v21, %v269_v22  ;;  %v2743_v24 = vpop.f32.mrb[1].mxu0 }
 0x15c   :  { %v272_v25 = vpop.f32.mrb[2].mxu0 }
 0x15d   :  { %308 = vst.msk [vmem:[#allocation2] sm:$0xff] %vm307_vm3, %v270_v23  ;;  %v273_v26 = vadd.f32 %v2542_v21, %v272_v25  ;;  %v2744_v27 = vpop.f32.mrb[3].mxu0 }
 0x15f   :  { %309 = vst.msk [vmem:[#allocation2 + $0x8] sm:$0xff] %vm307_vm3, %v273_v26 }
 0x162   :  { %v277_v28 = vpop.f32.mrb[4].mxu0 }
 0x163   :  { %v278_v29 = vadd.f32 %v2542_v21, %v277_v28  ;;  %v2747_v30 = vpop.f32.mrb[5].mxu0 }
 0x164   :  { %v280_v31 = vpop.f32.mrb[6].mxu0  ;;  %v3643_v59 = vld [vmem:[#allocation2] sm:$0xff] }
 0x165   :  { %310 = vst.msk [vmem:[#allocation2 + $0x10] sm:$0xff] %vm307_vm3, %v278_v29  ;;  %v281_v32 = vadd.f32 %v2542_v21, %v280_v31  ;;  %v2748_v33 = vpop.f32.mrb[7].mxu0 }
 0x167   :  { %311 = vst.msk [vmem:[#allocation2 + $0x18] sm:$0xff] %vm307_vm3, %v281_v32 }
 0x16a   :  { %v285_v34 = vpop.f32.mrb[8].mxu0 }
 0x16b   :  { %v286_v35 = vadd.f32 %v2542_v21, %v285_v34  ;;  %v2751_v36 = vpop.f32.mrb[9].mxu0 }
 0x16c   :  { %v288_v37 = vpop.f32.mrb[10].mxu0 }
 0x16d   :  { %312 = vst.msk [vmem:[#allocation2 + $0x20] sm:$0xff] %vm307_vm3, %v286_v35  ;;  %v289_v38 = vadd.f32 %v2542_v21, %v288_v37  ;;  %v2752_v39 = vpop.f32.mrb[11].mxu0 }
 0x16f   :  { %313 = vst.msk [vmem:[#allocation2 + $0x28] sm:$0xff] %vm307_vm3, %v289_v38 }
 0x172   :  { %v293_v40 = vpop.f32.mrb[12].mxu0 }
 0x173   :  { %v294_v41 = vadd.f32 %v2542_v21, %v293_v40  ;;  %v2755_v42 = vpop.f32.mrb[13].mxu0 }
 0x174   :  { %v296_v43 = vpop.f32.mrb[14].mxu0 }
 0x175   :  { %314 = vst.msk [vmem:[#allocation2 + $0x30] sm:$0xff] %vm307_vm3, %v294_v41  ;;  %v297_v44 = vadd.f32 %v2542_v21, %v296_v43  ;;  %v2756_v45 = vpop.f32.mrb[15].mxu0  ;;  %v3671_v41 = vld [vmem:[#allocation2 + $0x8] sm:$0xff] }
 0x177   :  { %315 = vst.msk [vmem:[#allocation2 + $0x38] sm:$0xff] %vm307_vm3, %v297_v44 }
 0x17a   :  { %v301_v46 = vpop.f32.mrb[16].mxu0 }
 0x17b   :  { %v302_v47 = vadd.f32 %v2542_v21, %v301_v46  ;;  %v2759_v48 = vpop.f32.mrb[17].mxu0 }
 0x17c   :  { %v304_v49 = vpop.f32.mrb[18].mxu0 }
 0x17d   :  { %316 = vst.msk [vmem:[#allocation2 + $0x40] sm:$0xff] %vm307_vm3, %v302_v47  ;;  %v2760_v50 = vpop.f32.mrb[19].mxu0 }
 0x17e   :  { %v3673_v42 = vld [vmem:[#allocation2 + $0x38] sm:$0xff] }
 0x182   :  { %v370_v52 = vpop.f32.mrb[20].mxu0 }
 0x183   :  { %v2767_v53 = vpop.f32.mrb[21].mxu0  ;;  %v386_v54 = vadd.f32 %v3635_v51, %v370_v52  ;;  %v416_v58 = vadd.f32 %v3638_v55, %v370_v52  ;;  %v376_v60 = vadd.f32 %v370_v52, %v3643_v59 }
 0x184   :  { %v373_v56 = vpop.f32.mrb[22].mxu0  ;;  %v319_v61 = vld [vmem:[#allocation2 + $0x40] sm:$0xff] }
 0x185   :  { %388 = vrot.lane.b32.xlu1 %v386_v54, %s3390_s12  ;;  %v2768_v57 = vpop.f32.mrb[23].mxu0  ;;  %v2557_v62 = vmul.f32 -1.442695, %v376_v60  ;;  %v406_v63 = vadd.f32 %v370_v52, %v319_v61 }
 0x187   :  { %3024 = vpow2.f32 %v2557_v62  ;;  %v2558_v1 = vmul.f32 -1.442695, %v406_v63 }
 0x189   :  { %418 = vrot.lane.b32.xlu1 %v416_v58, %s3390_s12  ;;  %3026 = vpow2.f32 %v2558_v1 }
 0x191   :  { %v3025_v2 = vpop.eup %3024 }
 0x192   :  { %v380_v3 = vadd.f32 1.0, %v3025_v2 }
 0x193   :  { %v3027_v4 = vpop.eup %3026 }
 0x194   :  { %3028 = vrcp.f32 %v380_v3  ;;  %v410_v6 = vadd.f32 1.0, %v3027_v4 }
 0x196   :  { %3030 = vrcp.f32 %v410_v6 }
 0x19e   :  { %v3029_v7 = vpop.eup %3028 }
 0x19f   :  { %v398_v21 = vsub.f32 1.0, %v3029_v7  ;;  %v404_v23 = vmul.f32 0.0, %v3029_v7 }
 0x1a0   :  { %v3031_v10 = vpop.eup %3030 }
 0x1a1   :  { %v428_v26 = vsub.f32 1.0, %v3031_v10  ;;  %v434_v28 = vmul.f32 0.0, %v3031_v10 }
 0x1f7   :  { %v389_v8 = vpop.permute.xlu1 %388 }
 0x1f8   :  { %v391_v9 = vmul.f32 %v3029_v7, %v389_v8 }
 0x1fa   :  { %393 = vrot.lane.b32.xlu0 %v391_v9, %s3388_s20 }
 0x1fb   :  { %v419_v11 = vpop.permute.xlu1 %418 }
 0x1fc   :  { %v421_v12 = vmul.f32 %v3031_v10, %v419_v11 }
 0x1fe   :  { %423 = vrot.lane.b32.xlu1 %v421_v12, %s3388_s20 }
 0x26c   :  { %v394_v14 = vpop.permute.xlu0 %393 }
 0x26d   :  { %v396_v15 = vadd.f32 %v394_v14, %v3643_v59 }
 0x26f   :  { %3032 = vtanh.f32 %v396_v15 }
 0x270   :  { %v424_v16 = vpop.permute.xlu1 %423 }
 0x271   :  { %v426_v17 = vadd.f32 %v424_v16, %v319_v61 }
 0x273   :  { %3034 = vtanh.f32 %v426_v17 }
 0x279   :  { %v3033_v18 = vpop.eup %3032 }
 0x27a   :  { %400 = vrot.lane.b32.xlu0 %v3033_v18, %s3391_s13 }
 0x27d   :  { %v3035_v19 = vpop.eup %3034 }
 0x27e   :  { %430 = vrot.lane.b32.xlu1 %v3035_v19, %s3391_s13 }
 0x2ec   :  { %v401_v22 = vpop.permute.xlu0 %400 }
 0x2ed   :  { %v403_v24 = vmul.f32 %v401_v22, %v398_v21 }
 0x2ef   :  { %v3651_v25 = vadd.f32 %v404_v23, %v403_v24 }
 0x2f0   :  { %v431_v27 = vpop.permute.xlu1 %430 }
 0x2f1   :  { %v433_v29 = vmul.f32 %v431_v27, %v428_v26  ;;  %460 = vrot.lane.b32.xlu0 %v3651_v25, %s3391_s13  ;;  %v3705_v27 = vld [vmem:[#allocation2 + $0x10] sm:$0xff] }
 0x2f3   :  { %v3655_v30 = vadd.f32 %v434_v28, %v433_v29  ;;  %v3707_v28 = vld [vmem:[#allocation2 + $0x30] sm:$0xff] }
 0x2f5   :  { %464 = vrot.lane.b32.xlu1 %v3655_v30, %s3392_s7 }
 0x363   :  { %v461_v31 = vpop.permute.xlu0 %460 }
 0x367   :  { %v465_v32 = vpop.permute.xlu1 %464 }
 0x368   :  { %v468_v33 = vsel %vm467_vm4, %v461_v31, %v465_v32 }
 0x369   :  { %v469_v34 = vpack.c.bf16 %v468_v33, %v468_v33 }
 0x36b   :  { %2774 = vmatmul.mubr.msk.bf16.vlgmr.msra.gmra.mrb[0].mxu1 %vm219_vm2, %v469_v34 }
 0x36c   :  { %2778 = vmatpush3.bf16.msra.mxu1 %v3576_v5  ;;  %2781 = vmatprep.mubr.msk.bf16.mxu1 %vm3387_vm0, %v3386_v0 }
 0x36d   :  { %2779 = vmatprep.subr.bf16.mxu1 %v3386_v0 }
 0x370   :  { %2780 = vmatpush3.bf16.msra.mxu1 %v3585_v13 }
 0x371   :  { %2785 = vmatprep.subr.bf16.mxu1 %v3386_v0 }
 0x43e   :  { %v507_v35 = vpop.f32.mrb[0].mxu1 }
 0x43f   :  { %v2775_v36 = vpop.f32.mrb[1].mxu1  ;;  %v547_v37 = vadd.f32 %v507_v35, %v3638_v55  ;;  %v520_v38 = vadd.f32 %v507_v35, %v3635_v51  ;;  %v513_v43 = vadd.f32 %v507_v35, %v3671_v41  ;;  %v540_v44 = vadd.f32 %v507_v35, %v3673_v42 }
 0x440   :  { %v510_v39 = vpop.f32.mrb[2].mxu1 }
 0x441   :  { %549 = vrot.lane.b32.xlu1 %v547_v37, %s3390_s12  ;;  %522 = vrot.lane.b32.xlu0 %v520_v38, %s3390_s12  ;;  %v2776_v40 = vpop.f32.mrb[3].mxu1  ;;  %v2562_v45 = vmul.f32 -1.442695, %v513_v43  ;;  %v2563_v46 = vmul.f32 -1.442695, %v540_v44 }
 0x443   :  { %3036 = vpow2.f32 %v2562_v45 }
 0x444   :  { %3038 = vpow2.f32 %v2563_v46 }
 0x44d   :  { %v3037_v47 = vpop.eup %3036 }
 0x44e   :  { %v3039_v48 = vpop.eup %3038  ;;  %v517_v49 = vadd.f32 1.0, %v3037_v47 }
 0x44f   :  { %v544_v50 = vadd.f32 1.0, %v3039_v48 }
 0x450   :  { %3040 = vrcp.f32 %v517_v49 }
 0x451   :  { %3042 = vrcp.f32 %v544_v50 }
 0x45a   :  { %v3041_v52 = vpop.eup %3040 }
 0x45b   :  { %v3043_v53 = vpop.eup %3042  ;;  %v532_v6 = vsub.f32 1.0, %v3041_v52  ;;  %v538_v10 = vmul.f32 %v3041_v52, %v3651_v25 }
 0x45c   :  { %v559_v3 = vsub.f32 1.0, %v3043_v53  ;;  %v565_v7 = vmul.f32 %v3043_v53, %v3655_v30 }
 0x4b3   :  { %v550_v54 = vpop.permute.xlu1 %549  ;;  %v523_v56 = vpop.permute.xlu0 %522 }
 0x4b4   :  { %v552_v57 = vmul.f32 %v3043_v53, %v550_v54  ;;  %v525_v58 = vmul.f32 %v3041_v52, %v523_v56 }
 0x4b6   :  { %554 = vrot.lane.b32.xlu1 %v552_v57, %s3388_s20  ;;  %527 = vrot.lane.b32.xlu0 %v525_v58, %s3388_s20 }
 0x528   :  { %v555_v60 = vpop.permute.xlu1 %554  ;;  %v528_v61 = vpop.permute.xlu0 %527 }
 0x529   :  { %v557_v62 = vadd.f32 %v555_v60, %v3673_v42  ;;  %v530_v63 = vadd.f32 %v528_v61, %v3671_v41 }
 0x52b   :  { %3044 = vtanh.f32 %v557_v62 }
 0x52c   :  { %3046 = vtanh.f32 %v530_v63 }
 0x535   :  { %v3045_v1 = vpop.eup %3044 }
 0x536   :  { %v3047_v2 = vpop.eup %3046  ;;  %561 = vrot.lane.b32.xlu1 %v3045_v1, %s3391_s13 }
 0x537   :  { %534 = vrot.lane.b32.xlu0 %v3047_v2, %s3391_s13 }
 0x5a8   :  { %v562_v4 = vpop.permute.xlu1 %561 }
 0x5a9   :  { %v564_v8 = vmul.f32 %v562_v4, %v559_v3  ;;  %v535_v9 = vpop.permute.xlu0 %534 }
 0x5aa   :  { %v537_v11 = vmul.f32 %v535_v9, %v532_v6 }
 0x5ab   :  { %v3685_v12 = vadd.f32 %v565_v7, %v564_v8 }
 0x5ac   :  { %v3687_v14 = vadd.f32 %v538_v10, %v537_v11 }
 0x5ad   :  { %594 = vrot.lane.b32.xlu1 %v3685_v12, %s3392_s7 }
 0x5ae   :  { %590 = vrot.lane.b32.xlu0 %v3687_v14, %s3391_s13 }
 0x61f   :  { %v595_v15 = vpop.permute.xlu1 %594 }
 0x620   :  { %v591_v16 = vpop.permute.xlu0 %590 }
 0x621   :  { %v597_v17 = vsel %vm467_vm4, %v591_v16, %v595_v15  ;;  %v3739_v16 = vld [vmem:[#allocation2 + $0x18] sm:$0xff] }
 0x622   :  { %v598_v18 = vpack.c.bf16 %v597_v17, %v597_v17  ;;  %v3741_v17 = vld [vmem:[#allocation2 + $0x28] sm:$0xff] }
 0x624   :  { %2782 = vmatmul.mubr.msk.bf16.vlgmr.msra.gmra.mrb[4].mxu1 %vm219_vm2, %v598_v18 }
 0x625   :  { %2786 = vmatpush3.bf16.msra.mxu1 %v3576_v5  ;;  %2789 = vmatprep.mubr.msk.bf16.mxu1 %vm3387_vm0, %v3386_v0 }
 0x626   :  { %2787 = vmatprep.subr.bf16.mxu1 %v3386_v0 }
 0x629   :  { %2788 = vmatpush3.bf16.msra.mxu1 %v3585_v13 }
 0x62a   :  { %2793 = vmatprep.subr.bf16.mxu1 %v3386_v0 }
 0x6f7   :  { %v636_v19 = vpop.f32.mrb[4].mxu1 }
 0x6f8   :  { %v2783_v21 = vpop.f32.mrb[5].mxu1  ;;  %v676_v22 = vadd.f32 %v636_v19, %v3638_v55  ;;  %v649_v23 = vadd.f32 %v636_v19, %v3635_v51  ;;  %v642_v29 = vadd.f32 %v636_v19, %v3705_v27  ;;  %v669_v31 = vadd.f32 %v636_v19, %v3707_v28 }
 0x6f9   :  { %v639_v24 = vpop.f32.mrb[6].mxu1 }
 0x6fa   :  { %678 = vrot.lane.b32.xlu1 %v676_v22, %s3390_s12  ;;  %651 = vrot.lane.b32.xlu0 %v649_v23, %s3390_s12  ;;  %v2784_v26 = vpop.f32.mrb[7].mxu1  ;;  %v2567_v32 = vmul.f32 -1.442695, %v642_v29  ;;  %v2568_v33 = vmul.f32 -1.442695, %v669_v31 }
 0x6fc   :  { %3048 = vpow2.f32 %v2567_v32 }
 0x6fd   :  { %3050 = vpow2.f32 %v2568_v33 }
 0x706   :  { %v3049_v34 = vpop.eup %3048 }
 0x707   :  { %v3051_v35 = vpop.eup %3050  ;;  %v646_v36 = vadd.f32 1.0, %v3049_v34 }
 0x708   :  { %v673_v37 = vadd.f32 1.0, %v3051_v35 }
 0x709   :  { %3052 = vrcp.f32 %v646_v36 }
 0x70a   :  { %3054 = vrcp.f32 %v673_v37 }
 0x713   :  { %v3053_v38 = vpop.eup %3052 }
 0x714   :  { %v3055_v39 = vpop.eup %3054  ;;  %v661_v56 = vsub.f32 1.0, %v3053_v38  ;;  %v667_v61 = vmul.f32 %v3053_v38, %v3687_v14 }
 0x715   :  { %v688_v53 = vsub.f32 1.0, %v3055_v39  ;;  %v694_v57 = vmul.f32 %v3055_v39, %v3685_v12 }
 0x76c   :  { %v679_v40 = vpop.permute.xlu1 %678  ;;  %v652_v43 = vpop.permute.xlu0 %651 }
 0x76d   :  { %v681_v44 = vmul.f32 %v3055_v39, %v679_v40  ;;  %v654_v45 = vmul.f32 %v3053_v38, %v652_v43 }
 0x76f   :  { %683 = vrot.lane.b32.xlu1 %v681_v44, %s3388_s20  ;;  %656 = vrot.lane.b32.xlu0 %v654_v45, %s3388_s20 }
 0x7e1   :  { %v684_v46 = vpop.permute.xlu1 %683  ;;  %v657_v47 = vpop.permute.xlu0 %656 }
 0x7e2   :  { %v686_v48 = vadd.f32 %v684_v46, %v3707_v28  ;;  %v659_v49 = vadd.f32 %v657_v47, %v3705_v27 }
 0x7e4   :  { %3056 = vtanh.f32 %v686_v48 }
 0x7e5   :  { %3058 = vtanh.f32 %v659_v49 }
 0x7ee   :  { %v3057_v50 = vpop.eup %3056 }
 0x7ef   :  { %v3059_v52 = vpop.eup %3058  ;;  %690 = vrot.lane.b32.xlu1 %v3057_v50, %s3391_s13 }
 0x7f0   :  { %663 = vrot.lane.b32.xlu0 %v3059_v52, %s3391_s13 }
 0x861   :  { %v691_v54 = vpop.permute.xlu1 %690 }
 0x862   :  { %v693_v58 = vmul.f32 %v691_v54, %v688_v53  ;;  %v664_v60 = vpop.permute.xlu0 %663 }
 0x863   :  { %v666_v62 = vmul.f32 %v664_v60, %v661_v56 }
 0x864   :  { %v3719_v63 = vadd.f32 %v694_v57, %v693_v58 }
 0x865   :  { %v3721_v1 = vadd.f32 %v667_v61, %v666_v62 }
 0x866   :  { %723 = vrot.lane.b32.xlu1 %v3719_v63, %s3392_s7 }
 0x867   :  { %719 = vrot.lane.b32.xlu0 %v3721_v1, %s3391_s13 }
 0x8d8   :  { %v724_v2 = vpop.permute.xlu1 %723 }
 0x8d9   :  { %v720_v3 = vpop.permute.xlu0 %719 }
 0x8da   :  { %v726_v4 = vsel %vm467_vm4, %v720_v3, %v724_v2 }
 0x8db   :  { %v727_v6 = vpack.c.bf16 %v726_v4, %v726_v4 }
 0x8dd   :  { %2790 = vmatmul.mubr.msk.bf16.vlgmr.msra.gmra.mrb[8].mxu1 %vm219_vm2, %v727_v6 }
 0x8de   :  { %2794 = vmatpush3.bf16.msra.mxu1 %v3576_v5  ;;  %2797 = vmatprep.mubr.msk.bf16.mxu1 %vm3387_vm0, %v3386_v0 }
 0x8df   :  { %2795 = vmatprep.subr.bf16.mxu1 %v3386_v0 }
 0x8e2   :  { %2796 = vmatpush3.bf16.msra.mxu1 %v3585_v13 }
 0x8e3   :  { %2809 = vmatprep.subr.bf16.mxu1 %v3386_v0 }
 0x9b0   :  { %v765_v7 = vpop.f32.mrb[8].mxu1 }
 0x9b1   :  { %v2791_v8 = vpop.f32.mrb[9].mxu1  ;;  %v805_v9 = vadd.f32 %v765_v7, %v3638_v55  ;;  %v778_v10 = vadd.f32 %v765_v7, %v3635_v51  ;;  %v771_v18 = vadd.f32 %v765_v7, %v3739_v16  ;;  %v798_v19 = vadd.f32 %v765_v7, %v3741_v17 }
 0x9b2   :  { %v768_v11 = vpop.f32.mrb[10].mxu1  ;;  %v844_v8 = vld [vmem:[#allocation2 + $0x20] sm:$0xff] }
 0x9b3   :  { %807 = vrot.lane.b32.xlu1 %v805_v9, %s3390_s12  ;;  %780 = vrot.lane.b32.xlu0 %v778_v10, %s3390_s12  ;;  %v2792_v15 = vpop.f32.mrb[11].mxu1  ;;  %v2572_v21 = vmul.f32 -1.442695, %v771_v18  ;;  %v2573_v22 = vmul.f32 -1.442695, %v798_v19 }
 0x9b5   :  { %3060 = vpow2.f32 %v2572_v21 }
 0x9b6   :  { %3062 = vpow2.f32 %v2573_v22 }
 0x9bf   :  { %v3061_v23 = vpop.eup %3060 }
 0x9c0   :  { %v3063_v24 = vpop.eup %3062  ;;  %v775_v26 = vadd.f32 1.0, %v3061_v23 }
 0x9c1   :  { %v802_v29 = vadd.f32 1.0, %v3063_v24 }
 0x9c2   :  { %3064 = vrcp.f32 %v775_v26 }
 0x9c3   :  { %3066 = vrcp.f32 %v802_v29 }
 0x9cc   :  { %v3065_v31 = vpop.eup %3064 }
 0x9cd   :  { %v3067_v32 = vpop.eup %3066  ;;  %v790_v47 = vsub.f32 1.0, %v3065_v31  ;;  %v796_v52 = vmul.f32 %v3065_v31, %v3721_v1 }
 0x9ce   :  { %v817_v45 = vsub.f32 1.0, %v3067_v32  ;;  %v823_v48 = vmul.f32 %v3067_v32, %v3719_v63 }
 0xa25   :  { %v808_v33 = vpop.permute.xlu1 %807  ;;  %v781_v34 = vpop.permute.xlu0 %780 }
 0xa26   :  { %v810_v35 = vmul.f32 %v3067_v32, %v808_v33  ;;  %v783_v36 = vmul.f32 %v3065_v31, %v781_v34 }
 0xa28   :  { %812 = vrot.lane.b32.xlu1 %v810_v35, %s3388_s20  ;;  %785 = vrot.lane.b32.xlu0 %v783_v36, %s3388_s20 }
 0xa9a   :  { %v813_v37 = vpop.permute.xlu1 %812  ;;  %v786_v38 = vpop.permute.xlu0 %785 }
 0xa9b   :  { %v815_v39 = vadd.f32 %v813_v37, %v3741_v17  ;;  %v788_v40 = vadd.f32 %v786_v38, %v3739_v16 }
 0xa9d   :  { %3068 = vtanh.f32 %v815_v39 }
 0xa9e   :  { %3070 = vtanh.f32 %v788_v40 }
 0xaa7   :  { %v3069_v43 = vpop.eup %3068 }
 0xaa8   :  { %v3071_v44 = vpop.eup %3070  ;;  %819 = vrot.lane.b32.xlu1 %v3069_v43, %s3391_s13 }
 0xaa9   :  { %792 = vrot.lane.b32.xlu0 %v3071_v44, %s3391_s13 }
 0xb1a   :  { %v820_v46 = vpop.permute.xlu1 %819 }
 0xb1b   :  { %v822_v49 = vmul.f32 %v820_v46, %v817_v45  ;;  %v793_v50 = vpop.permute.xlu0 %792 }
 0xb1c   :  { %v795_v53 = vmul.f32 %v793_v50, %v790_v47 }
 0xb1d   :  { %v3753_v54 = vadd.f32 %v823_v48, %v822_v49 }
 0xb1e   :  { %v3755_v56 = vadd.f32 %v796_v52, %v795_v53 }
 0xb1f   :  { %850 = vrot.lane.b32.xlu1 %v3753_v54, %s3392_s7 }
 0xb20   :  { %846 = vrot.lane.b32.xlu0 %v3755_v56, %s3391_s13 }
 0xb91   :  { %v851_v57 = vpop.permute.xlu1 %850 }
 0xb92   :  { %v847_v58 = vpop.permute.xlu0 %846 }
 0xb93   :  { %v853_v60 = vsel %vm467_vm4, %v847_v58, %v851_v57 }
 0xb94   :  { %v854_v61 = vpack.c.bf16 %v853_v60, %v853_v60 }
 0xb96   :  { %2798 = vmatmul.mubr.msk.bf16.vlgmr.msra.gmra.mrb[12].mxu1 %vm219_vm2, %v854_v61 }
 0xb97   :  { %2810 = vmatpush3.bf16.msra.mxu1 %v3576_v5  ;;  %2813 = vmatprep.mubr.msk.bf16.mxu1 %vm3387_vm0, %v3386_v0 }
 0xb98   :  { %2811 = vmatprep.subr.bf16.mxu1 %v3386_v0 }
 0xb9b   :  { %2812 = vmatpush3.bf16.msra.mxu1 %v3585_v13 }
 0xb9c   :  { %2825 = vmatprep.subr.bf16.mxu1 %v3386_v0 }
 0xc69   :  { %v892_v62 = vpop.f32.mrb[12].mxu1 }
 0xc6a   :  { %v905_v2 = vadd.f32 %v892_v62, %v3635_v51  ;;  %v925_v3 = vadd.f32 %v892_v62, %v3638_v55  ;;  %v2799_v4 = vpop.f32.mrb[13].mxu1  ;;  %v898_v9 = vadd.f32 %v892_v62, %v844_v8 }
 0xc6b   :  { %v895_v6 = vpop.f32.mrb[14].mxu1 }
 0xc6c   :  { %927 = vrot.lane.b32.xlu1 %v925_v3, %s3390_s12  ;;  %907 = vrot.lane.b32.xlu0 %v905_v2, %s3390_s12  ;;  %v2800_v7 = vpop.f32.mrb[15].mxu1  ;;  %v2577_v10 = vmul.f32 -1.442695, %v898_v9 }
 0xc6e   :  { %3072 = vpow2.f32 %v2577_v10 }
 0xc78   :  { %v3073_v11 = vpop.eup %3072 }
 0xc79   :  { %v902_v15 = vadd.f32 1.0, %v3073_v11 }
 0xc7b   :  { %3074 = vrcp.f32 %v902_v15 }
 0xc85   :  { %v3075_v18 = vpop.eup %3074 }
 0xc86   :  { %v917_v34 = vsub.f32 1.0, %v3075_v18  ;;  %v942_v36 = vmul.f32 %v3075_v18, %v3753_v54  ;;  %v923_v39 = vmul.f32 %v3075_v18, %v3755_v56 }
 0xcde   :  { %v928_v19 = vpop.permute.xlu1 %927  ;;  %v908_v21 = vpop.permute.xlu0 %907 }
 0xcdf   :  { %v930_v22 = vmul.f32 %v3075_v18, %v928_v19  ;;  %v910_v23 = vmul.f32 %v3075_v18, %v908_v21 }
 0xce1   :  { %932 = vrot.lane.b32.xlu1 %v930_v22, %s3388_s20  ;;  %912 = vrot.lane.b32.xlu0 %v910_v23, %s3388_s20 }
 0xd53   :  { %v933_v24 = vpop.permute.xlu1 %932  ;;  %v913_v26 = vpop.permute.xlu0 %912 }
 0xd54   :  { %v935_v29 = vadd.f32 %v933_v24, %v844_v8  ;;  %v915_v31 = vadd.f32 %v913_v26, %v844_v8 }
 0xd56   :  { %3076 = vtanh.f32 %v935_v29 }
 0xd57   :  { %3078 = vtanh.f32 %v915_v31 }
 0xd60   :  { %v3077_v32 = vpop.eup %3076 }
 0xd61   :  { %v3079_v33 = vpop.eup %3078  ;;  %938 = vrot.lane.b32.xlu1 %v3077_v32, %s3391_s13 }
 0xd62   :  { %919 = vrot.lane.b32.xlu0 %v3079_v33, %s3391_s13 }
 0xdd3   :  { %v939_v35 = vpop.permute.xlu1 %938 }
 0xdd4   :  { %v941_v37 = vmul.f32 %v939_v35, %v917_v34  ;;  %v920_v38 = vpop.permute.xlu0 %919 }
 0xdd5   :  { %v922_v40 = vmul.f32 %v920_v38, %v917_v34 }
 0xdd6   :  { %v3779_v43 = vadd.f32 %v942_v36, %v941_v37 }
 0xdd7   :  { %v3781_v44 = vadd.f32 %v923_v39, %v922_v40 }
 0xdd8   :  { %968 = vrot.lane.b32.xlu1 %v3779_v43, %s3392_s7 }
 0xdd9   :  { %964 = vrot.lane.b32.xlu0 %v3781_v44, %s3391_s13 }
 0xe4a   :  { %v969_v45 = vpop.permute.xlu1 %968 }
 0xe4b   :  { %v965_v46 = vpop.permute.xlu0 %964 }
 0xe4c   :  { %v971_v47 = vsel %vm467_vm4, %v965_v46, %v969_v45 }
 0xe4d   :  { %v972_v48 = vpack.c.bf16 %v971_v47, %v971_v47 }
 0xe4f   :  { %2806 = vmatmul.mubr.msk.bf16.vlgmr.msra.gmra.mrb[24].mxu0 %vm219_vm2, %v972_v48 }
 0xe50   :  { %2818 = vmatpush3.bf16.msra.mxu0 %v3576_v5  ;;  %2821 = vmatprep.mubr.msk.bf16.mxu0 %vm3387_vm0, %v3386_v0 }
 0xe51   :  { %2819 = vmatprep.subr.bf16.mxu0 %v3386_v0 }
 0xe54   :  { %2820 = vmatpush3.bf16.msra.mxu0 %v3585_v13 }
 0xe55   :  { %2833 = vmatprep.subr.bf16.mxu0 %v3386_v0 }
 0xf22   :  { %v1010_v49 = vpop.f32.mrb[24].mxu0 }
 0xf23   :  { %v2807_v50 = vpop.f32.mrb[25].mxu0  ;;  %v1050_v52 = vadd.f32 %v1010_v49, %v3638_v55  ;;  %v1023_v53 = vadd.f32 %v1010_v49, %v3635_v51  ;;  %v1016_v60 = vadd.f32 %v1010_v49, %v3741_v17  ;;  %v1043_v61 = vadd.f32 %v1010_v49, %v3739_v16 }
 0xf24   :  { %v1013_v57 = vpop.f32.mrb[26].mxu0 }
 0xf25   :  { %1052 = vrot.lane.b32.xlu1 %v1050_v52, %s3390_s12  ;;  %1025 = vrot.lane.b32.xlu0 %v1023_v53, %s3390_s12  ;;  %v2808_v58 = vpop.f32.mrb[27].mxu0  ;;  %v2581_v62 = vmul.f32 -1.442695, %v1016_v60  ;;  %v2582_v2 = vmul.f32 -1.442695, %v1043_v61 }
 0xf27   :  { %3080 = vpow2.f32 %v2581_v62 }
 0xf28   :  { %3082 = vpow2.f32 %v2582_v2 }
 0xf31   :  { %v3081_v3 = vpop.eup %3080 }
 0xf32   :  { %v3083_v4 = vpop.eup %3082  ;;  %v1020_v6 = vadd.f32 1.0, %v3081_v3 }
 0xf33   :  { %v1047_v7 = vadd.f32 1.0, %v3083_v4 }
 0xf34   :  { %3084 = vrcp.f32 %v1020_v6 }
 0xf35   :  { %3086 = vrcp.f32 %v1047_v7 }
 0xf3e   :  { %v3085_v8 = vpop.eup %3084 }
 0xf3f   :  { %v3087_v9 = vpop.eup %3086  ;;  %v1035_v32 = vsub.f32 1.0, %v3085_v8  ;;  %v1041_v36 = vmul.f32 %v3085_v8, %v3781_v44 }
 0xf40   :  { %v1062_v29 = vsub.f32 1.0, %v3087_v9  ;;  %v1068_v33 = vmul.f32 %v3087_v9, %v3779_v43 }
 0xf97   :  { %v1053_v10 = vpop.permute.xlu1 %1052  ;;  %v1026_v11 = vpop.permute.xlu0 %1025 }
 0xf98   :  { %v1055_v15 = vmul.f32 %v3087_v9, %v1053_v10  ;;  %v1028_v18 = vmul.f32 %v3085_v8, %v1026_v11 }
 0xf9a   :  { %1057 = vrot.lane.b32.xlu1 %v1055_v15, %s3388_s20  ;;  %1030 = vrot.lane.b32.xlu0 %v1028_v18, %s3388_s20 }
0x100c   :  { %v1058_v19 = vpop.permute.xlu1 %1057  ;;  %v1031_v21 = vpop.permute.xlu0 %1030 }
0x100d   :  { %v1060_v22 = vadd.f32 %v1058_v19, %v3739_v16  ;;  %v1033_v23 = vadd.f32 %v1031_v21, %v3741_v17 }
0x100f   :  { %3088 = vtanh.f32 %v1060_v22 }
0x1010   :  { %3090 = vtanh.f32 %v1033_v23 }
0x1019   :  { %v3089_v24 = vpop.eup %3088 }
0x101a   :  { %v3091_v26 = vpop.eup %3090  ;;  %1064 = vrot.lane.b32.xlu1 %v3089_v24, %s3391_s13 }
0x101b   :  { %1037 = vrot.lane.b32.xlu0 %v3091_v26, %s3391_s13 }
0x108c   :  { %v1065_v31 = vpop.permute.xlu1 %1064 }
0x108d   :  { %v1067_v34 = vmul.f32 %v1065_v31, %v1062_v29  ;;  %v1038_v35 = vpop.permute.xlu0 %1037 }
0x108e   :  { %v1040_v16 = vmul.f32 %v1038_v35, %v1035_v32 }
0x108f   :  { %v3809_v37 = vadd.f32 %v1068_v33, %v1067_v34 }
0x1090   :  { %v3811_v17 = vadd.f32 %v1041_v36, %v1040_v16 }
0x1091   :  { %1093 = vrot.lane.b32.xlu1 %v3809_v37, %s3392_s7 }
0x1092   :  { %1089 = vrot.lane.b32.xlu0 %v3811_v17, %s3391_s13 }
0x1103   :  { %v1094_v38 = vpop.permute.xlu1 %1093 }
0x1104   :  { %v1090_v39 = vpop.permute.xlu0 %1089 }
0x1105   :  { %v1096_v40 = vsel %vm467_vm4, %v1090_v39, %v1094_v38 }
0x1106   :  { %v1097_v45 = vpack.c.bf16 %v1096_v40, %v1096_v40 }
0x1108   :  { %2814 = vmatmul.mubr.msk.bf16.vlgmr.msra.gmra.mrb[16].mxu1 %vm219_vm2, %v1097_v45 }
0x1109   :  { %2826 = vmatpush3.bf16.msra.mxu1 %v3576_v5  ;;  %2829 = vmatprep.mubr.msk.bf16.mxu1 %vm3387_vm0, %v3386_v0 }
0x110a   :  { %2827 = vmatprep.subr.bf16.mxu1 %v3386_v0 }
0x110d   :  { %2828 = vmatpush3.bf16.msra.mxu1 %v3585_v13 }
0x110e   :  { %2857 = vmatprep.subr.bf16.mxu1 %v3386_v0 }
0x11db   :  { %v1135_v46 = vpop.f32.mrb[16].mxu1 }
0x11dc   :  { %v2815_v47 = vpop.f32.mrb[17].mxu1  ;;  %v1175_v48 = vadd.f32 %v1135_v46, %v3638_v55  ;;  %v1148_v49 = vadd.f32 %v1135_v46, %v3635_v51  ;;  %v1141_v52 = vadd.f32 %v1135_v46, %v3707_v28  ;;  %v1168_v53 = vadd.f32 %v1135_v46, %v3705_v27 }
0x11dd   :  { %v1138_v50 = vpop.f32.mrb[18].mxu1 }
0x11de   :  { %1177 = vrot.lane.b32.xlu1 %v1175_v48, %s3390_s12  ;;  %1150 = vrot.lane.b32.xlu0 %v1148_v49, %s3390_s12  ;;  %v2816_v5 = vpop.f32.mrb[19].mxu1  ;;  %v2586_v57 = vmul.f32 -1.442695, %v1141_v52  ;;  %v2587_v13 = vmul.f32 -1.442695, %v1168_v53 }
0x11e0   :  { %3092 = vpow2.f32 %v2586_v57 }
0x11e1   :  { %3094 = vpow2.f32 %v2587_v13 }
0x11ea   :  { %v3093_v58 = vpop.eup %3092 }
0x11eb   :  { %v3095_v60 = vpop.eup %3094  ;;  %v1145_v61 = vadd.f32 1.0, %v3093_v58 }
0x11ec   :  { %v1172_v62 = vadd.f32 1.0, %v3095_v60 }
0x11ed   :  { %3096 = vrcp.f32 %v1145_v61 }
0x11ee   :  { %3098 = vrcp.f32 %v1172_v62 }
0x11f7   :  { %v3097_v2 = vpop.eup %3096 }
0x11f8   :  { %v3099_v3 = vpop.eup %3098  ;;  %v1160_v23 = vsub.f32 1.0, %v3097_v2  ;;  %v1166_v31 = vmul.f32 %v3097_v2, %v3811_v17 }
0x11f9   :  { %v1187_v21 = vsub.f32 1.0, %v3099_v3  ;;  %v1193_v24 = vmul.f32 %v3099_v3, %v3809_v37 }
0x1250   :  { %v1178_v4 = vpop.permute.xlu1 %1177  ;;  %v1151_v6 = vpop.permute.xlu0 %1150 }
0x1251   :  { %v1180_v7 = vmul.f32 %v3099_v3, %v1178_v4  ;;  %v1153_v8 = vmul.f32 %v3097_v2, %v1151_v6 }
0x1253   :  { %1182 = vrot.lane.b32.xlu1 %v1180_v7, %s3388_s20  ;;  %1155 = vrot.lane.b32.xlu0 %v1153_v8, %s3388_s20 }
0x12c5   :  { %v1183_v9 = vpop.permute.xlu1 %1182  ;;  %v1156_v10 = vpop.permute.xlu0 %1155 }
0x12c6   :  { %v1185_v11 = vadd.f32 %v1183_v9, %v3705_v27  ;;  %v1158_v15 = vadd.f32 %v1156_v10, %v3707_v28 }
0x12c8   :  { %3100 = vtanh.f32 %v1185_v11 }
0x12c9   :  { %3102 = vtanh.f32 %v1158_v15 }
0x12d2   :  { %v3101_v18 = vpop.eup %3100 }
0x12d3   :  { %v3103_v19 = vpop.eup %3102  ;;  %1189 = vrot.lane.b32.xlu1 %v3101_v18, %s3391_s13 }
0x12d4   :  { %1162 = vrot.lane.b32.xlu0 %v3103_v19, %s3391_s13 }
0x1345   :  { %v1190_v22 = vpop.permute.xlu1 %1189 }
0x1346   :  { %v1192_v26 = vmul.f32 %v1190_v22, %v1187_v21  ;;  %v1163_v29 = vpop.permute.xlu0 %1162 }
0x1347   :  { %v1165_v27 = vmul.f32 %v1163_v29, %v1160_v23 }
0x1348   :  { %v3839_v32 = vadd.f32 %v1193_v24, %v1192_v26 }
0x1349   :  { %v3841_v28 = vadd.f32 %v1166_v31, %v1165_v27 }
0x134a   :  { %1218 = vrot.lane.b32.xlu1 %v3839_v32, %s3392_s7 }
0x134b   :  { %1214 = vrot.lane.b32.xlu0 %v3841_v28, %s3391_s13 }
0x13bc   :  { %v1219_v33 = vpop.permute.xlu1 %1218 }
0x13bd   :  { %v1215_v34 = vpop.permute.xlu0 %1214 }
0x13be   :  { %v1221_v35 = vsel %vm467_vm4, %v1215_v34, %v1219_v33 }
0x13bf   :  { %v1222_v36 = vpack.c.bf16 %v1221_v35, %v1221_v35 }
0x13c1   :  { %2822 = vmatmul.mubr.msk.bf16.vlgmr.msra.gmra.mrb[28].mxu0 %vm219_vm2, %v1222_v36 }
0x13c2   :  { %2837 = vmatprep.mubr.msk.bf16.mxu0 %vm3387_vm0, %v3386_v0 }
0x1494   :  { %v1260_v16 = vpop.f32.mrb[28].mxu0 }
0x1495   :  { %v2823_v38 = vpop.f32.mrb[29].mxu0  ;;  %v1300_v39 = vadd.f32 %v1260_v16, %v3638_v55  ;;  %v1273_v40 = vadd.f32 %v1260_v16, %v3635_v51  ;;  %v1266_v47 = vadd.f32 %v1260_v16, %v3673_v42  ;;  %v1293_v48 = vadd.f32 %v1260_v16, %v3671_v41 }
0x1496   :  { %v1263_v45 = vpop.f32.mrb[30].mxu0 }
0x1497   :  { %1302 = vrot.lane.b32.xlu1 %v1300_v39, %s3390_s12  ;;  %1275 = vrot.lane.b32.xlu0 %v1273_v40, %s3390_s12  ;;  %v2824_v46 = vpop.f32.mrb[31].mxu0  ;;  %v2591_v49 = vmul.f32 -1.442695, %v1266_v47  ;;  %v2592_v50 = vmul.f32 -1.442695, %v1293_v48 }
0x1499   :  { %3104 = vpow2.f32 %v2591_v49 }
0x149a   :  { %3106 = vpow2.f32 %v2592_v50 }
0x14a3   :  { %v3105_v5 = vpop.eup %3104 }
0x14a4   :  { %v3107_v52 = vpop.eup %3106  ;;  %v1270_v53 = vadd.f32 1.0, %v3105_v5 }
0x14a5   :  { %v1297_v57 = vadd.f32 1.0, %v3107_v52  ;;  %v3888_v52 = vld [vmem:[#allocation12 + $0x10] sm:$0xff]  }
0x14a6   :  { %3108 = vrcp.f32 %v1270_v53 }
0x14a7   :  { %3110 = vrcp.f32 %v1297_v57  ;;  %v3017_v57 = vld [vmem:[#allocation10 + $0x10] sm:$0xff]  }
0x14a8   :  { %2834 = vmatpush3.bf16.msra.mxu0 %v3017_v57 }
0x14a9   :  { %2835 = vmatprep.subr.bf16.mxu0 %v3386_v0 }
0x14b0   :  { %v3109_v13 = vpop.eup %3108 }
0x14b1   :  { %v3111_v58 = vpop.eup %3110  ;;  %v1285_v15 = vsub.f32 1.0, %v3109_v13  ;;  %v1291_v22 = vmul.f32 %v3109_v13, %v3841_v28 }
0x14b2   :  { %v1312_v10 = vsub.f32 1.0, %v3111_v58  ;;  %v1318_v18 = vmul.f32 %v3111_v58, %v3839_v32 }
0x1509   :  { %v1303_v60 = vpop.permute.xlu1 %1302  ;;  %v1276_v61 = vpop.permute.xlu0 %1275 }
0x150a   :  { %v1305_v62 = vmul.f32 %v3111_v58, %v1303_v60  ;;  %v1278_v2 = vmul.f32 %v3109_v13, %v1276_v61  ;;  %v3018_v13 = vld [vmem:[#allocation10 + $0x18] sm:$0xff]  }
0x150b   :  { %2836 = vmatpush3.bf16.msra.mxu0 %v3018_v13 }
0x150c   :  { %1307 = vrot.lane.b32.xlu1 %v1305_v62, %s3388_s20  ;;  %1280 = vrot.lane.b32.xlu0 %v1278_v2, %s3388_s20 }
0x150d   :  { %2887 = vmatprep.subr.bf16.mxu0 %v3386_v0 }
0x157e   :  { %v1308_v3 = vpop.permute.xlu1 %1307  ;;  %v1281_v4 = vpop.permute.xlu0 %1280 }
0x157f   :  { %v1310_v6 = vadd.f32 %v1308_v3, %v3671_v41  ;;  %v1283_v7 = vadd.f32 %v1281_v4, %v3673_v42 }
0x1581   :  { %3112 = vtanh.f32 %v1310_v6 }
0x1582   :  { %3114 = vtanh.f32 %v1283_v7 }
0x158b   :  { %v3113_v8 = vpop.eup %3112 }
0x158c   :  { %v3115_v9 = vpop.eup %3114  ;;  %1314 = vrot.lane.b32.xlu1 %v3113_v8, %s3391_s13 }
0x158d   :  { %1287 = vrot.lane.b32.xlu0 %v3115_v9, %s3391_s13 }
0x15fe   :  { %v1315_v11 = vpop.permute.xlu1 %1314 }
0x15ff   :  { %v1317_v19 = vmul.f32 %v1315_v11, %v1312_v10  ;;  %v1288_v21 = vpop.permute.xlu0 %1287 }
0x1600   :  { %v1290_v41 = vmul.f32 %v1288_v21, %v1285_v15  ;;  %v3925_v21 = vld [vmem:[%s4150_s5 + $0x1] ss:$0 sm:$0xff] }
0x1601   :  { %v1319_v23 = vadd.f32 %v1318_v18, %v1317_v19 }
0x1602   :  { %v3865_v42 = vadd.f32 %v1291_v22, %v1290_v41 }
0x1603   :  { %1343 = vrot.lane.b32.xlu1 %v1319_v23, %s3392_s7  ;;  %v2653_v48 = vpack.c.bf16 %v1319_v23, %v1319_v23 }
0x1604   :  { %1339 = vrot.lane.b32.xlu0 %v3865_v42, %s3391_s13 }
0x1675   :  { %v1344_v24 = vpop.permute.xlu1 %1343 }
0x1676   :  { %v1340_v26 = vpop.permute.xlu0 %1339 }
0x1677   :  { %v1346_v29 = vsel %vm467_vm4, %v1340_v26, %v1344_v24 }
0x1678   :  { %v1347_v31 = vpack.c.bf16 %v1346_v29, %v1346_v29 }
0x167a   :  { %2830 = vmatmul.mubr.msk.bf16.vlgmr.msra.gmra.mrb[20].mxu1 %vm219_vm2, %v1347_v31 }
0x167b   :  { %2859 = vmatprep.mubr.msk.bf16.mxu1 %vm3387_vm0, %v3386_v0  ;;  %2858 = vmatpush3.bf16.msra.mxu1 %v3888_v52 }
0x167c   :  { %2863 = vmatprep.subr.bf16.mxu1 %v3386_v0 }
0x174d   :  { %v3874_v27 = vpop.f32.mrb[20].mxu1 }
0x174e   :  { %v2831_v33 = vpop.f32.mrb[21].mxu1  ;;  %v1425_v34 = vadd.f32 %v3874_v27, %v3638_v55  ;;  %v1418_v16 = vadd.f32 %v3874_v27, %v3643_v59  ;;  %v2638_v55 = vpack.c.bf16 %v3651_v25, %v3651_v25  ;;  %v3393_v25 = vmov 0  }
0x174f   :  { %v1388_v35 = vpop.f32.mrb[22].mxu1  ;;  %2860 = vmatmul.mubr.bf16.vlgmr.msra.gmra.mrb[24].mxu1 %v3393_v25 }
0x1750   :  { %1427 = vrot.lane.b32.xlu0 %v1425_v34, %s3390_s12  ;;  %v2832_v36 = vpop.f32.mrb[23].mxu1  ;;  %v2597_v38 = vmul.f32 -1.442695, %v1418_v16  ;;  %2864 = vmatpush3.bf16.msra.mxu1 %v3888_v52 }
0x1751   :  { %2865 = vmatprep.mubr.msk.bf16.mxu1 %vm3387_vm0, %v3386_v0  ;;  %2869 = vmatprep.subr.bf16.mxu1 %v3386_v0 }
0x1752   :  { %3116 = vpow2.f32 %v2597_v38 }
0x175c   :  { %v3117_v39 = vpop.eup %3116 }
0x175d   :  { %v1422_v40 = vadd.f32 1.0, %v3117_v39 }
0x175f   :  { %3118 = vrcp.f32 %v1422_v40 }
0x1769   :  { %v3119_v45 = vpop.eup %3118 }
0x176a   :  { %v1437_v58 = vsub.f32 1.0, %v3119_v45  ;;  %v1443_v61 = vmul.f32 %v3119_v45, %v1319_v23 }
0x17c2   :  { %v1428_v46 = vpop.permute.xlu0 %1427 }
0x17c3   :  { %v1430_v47 = vmul.f32 %v3119_v45, %v1428_v46 }
0x17c5   :  { %1432 = vrot.lane.b32.xlu1 %v1430_v47, %s3388_s20 }
0x17c9   :  { %440 = vrot.lane.b32.xlu1 %v2638_v55, %s3391_s13 }
0x17cd   :  { %1332 = vrot.lane.b32.xlu1 %v2653_v48, %s3392_s7 }
0x1822   :  { %v1669_v7 = vpop.f32.mrb[24].mxu1 }
0x1823   :  { %v2861_v8 = vpop.f32.mrb[25].mxu1 }
0x1824   :  { %v1672_v9 = vpop.f32.mrb[26].mxu1 }
0x1825   :  { %v2862_v10 = vpop.f32.mrb[27].mxu1 }
0x1837   :  { %v1433_v49 = vpop.permute.xlu1 %1432 }
0x1838   :  { %v1435_v50 = vadd.f32 %v1433_v49, %v3643_v59  ;;  %v2640_v59 = vpack.c.bf16 %v3687_v14, %v3687_v14  ;;  %v3905_v14 = vld [vmem:[%s4151_s6 + $0x1] ss:$0 sm:$0xff] }
0x1839   :  { %1682 = vrot.lane.b32.xlu1 %v3905_v14, %s3388_s20 }
0x183a   :  { %3120 = vtanh.f32 %v1435_v50 }
0x183b   :  { %v441_v5 = vpop.permute.xlu1 %440 }
0x183c   :  { %444 = vst.msk [vmem:[#allocation3] sm:$0xf] %vm443_vm5, %v441_v5 }
0x183f   :  { %v1333_v4 = vpop.permute.xlu1 %1332 }
0x1844   :  { %v3121_v53 = vpop.eup %3120 }
0x1845   :  { %1439 = vrot.lane.b32.xlu0 %v3121_v53, %s3391_s13 }
0x1849   :  { %571 = vrot.lane.b32.xlu0 %v2640_v59, %s3391_s13 }
0x18ab   :  { %v3912_v11 = vpop.permute.xlu1 %1682 }
0x18ac   :  { %v1685_v15 = vadd.f32 %v3912_v11, %v1669_v7 }
0x18b7   :  { %v1440_v60 = vpop.permute.xlu0 %1439 }
0x18b8   :  { %v1442_v62 = vmul.f32 %v1440_v60, %v1437_v58 }
0x18ba   :  { %v1444_v2 = vadd.f32 %v1443_v61, %v1442_v62 }
0x18bb   :  { %v572_v3 = vpop.permute.xlu0 %571 }
0x18bc   :  { %v2655_v6 = vpack.c.bf16 %v1444_v2, %v1444_v2  ;;  %575 = vst.msk [vmem:[#allocation3 + $0x4] sm:$0xf] %vm443_vm5, %v572_v3 }
0x18bd   :  { %1335 = vst.msk [vmem:[#allocation3 + $0x4] sm:$0xf] %vm453_vm6, %v1333_v4 }
0x18be   :  { %1457 = vrot.lane.b32.xlu0 %v2655_v6, %s3392_s7 }
0x18c2   :  { %1687 = vrot.lane.b32.xlu0 %v1685_v15, %s3390_s12  ;;  %v2642_v15 = vpack.c.bf16 %v3721_v1, %v3721_v1  ;;  %v2644_v1 = vpack.c.bf16 %v3755_v56, %v3755_v56 }
0x1930   :  { %v1458_v18 = vpop.permute.xlu0 %1457 }
0x1931   :  { %1460 = vst.msk [vmem:[#allocation3] sm:$0xf] %vm453_vm6, %v1458_v18  ;;  %v2649_v18 = vpack.c.bf16 %v3809_v37, %v3809_v37  ;;  %v2651_v37 = vpack.c.bf16 %v3839_v32, %v3839_v32 }
0x1934   :  { %v1688_v16 = vpop.permute.xlu0 %1687 }
0x1938   :  { %v3019_v19 = vld [vmem:[#allocation3] sm:$0xff]  }
0x1939   :  { %2838 = vmatmul.mubr.msk.bf16.vlgmr.msra.gmra.mrb[32].mxu0 %vm219_vm2, %v3019_v19 }
0x193a   :  { %2841 = vmatprep.mubr.msk.bf16.mxu0 %vm3387_vm0, %v3386_v0  ;;  %2888 = vmatpush3.bf16.msra.mxu0 %v3888_v52 }
0x193b   :  { %2899 = vmatprep.subr.bf16.mxu0 %v3386_v0 }
0x1a0c   :  { %v1578_v22 = vpop.f32.mrb[32].mxu0 }
0x1a0d   :  { %v1579_v41 = vadd.f32 %v3925_v21, %v1578_v22  ;;  %v2839_v23 = vpop.f32.mrb[33].mxu0 }
0x1a0e   :  { %v1581_v24 = vpop.f32.mrb[34].mxu0 }
0x1a0f   :  { %1616 = vst.msk [vmem:[#allocation2] sm:$0xff] %vm307_vm3, %v1579_v41  ;;  %v1582_v26 = vadd.f32 %v3925_v21, %v1581_v24  ;;  %v2840_v29 = vpop.f32.mrb[35].mxu0 }
0x1a11   :  { %1617 = vst.msk [vmem:[#allocation2 + $0x8] sm:$0xff] %vm307_vm3, %v1582_v26 }
0x1a16   :  { %v1625_v31 = vld [vmem:[#allocation2] sm:$0xff] }
0x1a17   :  { %v1675_v33 = vadd.f32 %v1669_v7, %v1625_v31 }
0x1a18   :  { %v1705_v60 = vld [vmem:[#allocation2 + $0x8] sm:$0xff] }
0x1a19   :  { %v2617_v34 = vmul.f32 -1.442695, %v1675_v33 }
0x1a1b   :  { %3122 = vpow2.f32 %v2617_v34 }
0x1a25   :  { %v3123_v35 = vpop.eup %3122 }
0x1a26   :  { %v1679_v36 = vadd.f32 1.0, %v3123_v35 }
0x1a28   :  { %3124 = vrcp.f32 %v1679_v36 }
0x1a32   :  { %v3125_v38 = vpop.eup %3124 }
0x1a33   :  { %v1690_v39 = vmul.f32 %v3125_v38, %v1688_v16  ;;  %v1697_v47 = vsub.f32 1.0, %v3125_v38  ;;  %v1703_v48 = vmul.f32 0.0, %v3125_v38 }
0x1a35   :  { %1692 = vrot.lane.b32.xlu1 %v1690_v39, %s3388_s20 }
0x1aa7   :  { %v1693_v40 = vpop.permute.xlu1 %1692 }
0x1aa8   :  { %v1695_v45 = vadd.f32 %v1693_v40, %v1625_v31 }
0x1aaa   :  { %3126 = vtanh.f32 %v1695_v45 }
0x1ab4   :  { %v3127_v46 = vpop.eup %3126 }
0x1ab5   :  { %1699 = vrot.lane.b32.xlu0 %v3127_v46, %s3391_s13 }
0x1b27   :  { %v1700_v55 = vpop.permute.xlu0 %1699 }
0x1b28   :  { %v1702_v49 = vmul.f32 %v1700_v55, %v1697_v47 }
0x1b2a   :  { %v1704_v50 = vadd.f32 %v1703_v48, %v1702_v49 }
0x1b2c   :  { %v1706_v5 = vpack.c.bf16 %v1704_v50, %v1704_v50 }
0x1b2e   :  { %1708 = vrot.lane.b32.xlu1 %v1706_v5, %s3391_s13 }
0x1ba0   :  { %v1709_v25 = vpop.permute.xlu1 %1708 }
0x1ba1   :  { %2866 = vmatmul.mubr.msk.bf16.vlgmr.msra.gmra.mrb[28].mxu1 %vm467_vm4, %v1709_v25 }
0x1ba2   :  { %2870 = vmatpush3.bf16.msra.mxu1 %v3888_v52  ;;  %2871 = vmatprep.mubr.msk.bf16.mxu1 %vm3387_vm0, %v3386_v0 }
0x1ba3   :  { %2875 = vmatprep.subr.bf16.mxu1 %v3386_v0 }
0x1c74   :  { %v1747_v53 = vpop.f32.mrb[28].mxu1 }
0x1c75   :  { %v1760_v59 = vadd.f32 %v1747_v53, %v3912_v11  ;;  %v2867_v57 = vpop.f32.mrb[29].mxu1  ;;  %v1753_v61 = vadd.f32 %v1747_v53, %v1705_v60 }
0x1c76   :  { %v1750_v13 = vpop.f32.mrb[30].mxu1 }
0x1c77   :  { %1762 = vrot.lane.b32.xlu0 %v1760_v59, %s3390_s12  ;;  %v2868_v58 = vpop.f32.mrb[31].mxu1  ;;  %v2619_v62 = vmul.f32 -1.442695, %v1753_v61 }
0x1c79   :  { %3128 = vpow2.f32 %v2619_v62 }
0x1c83   :  { %v3129_v2 = vpop.eup %3128 }
0x1c84   :  { %v1757_v3 = vadd.f32 1.0, %v3129_v2 }
0x1c86   :  { %3130 = vrcp.f32 %v1757_v3 }
0x1c90   :  { %v3131_v4 = vpop.eup %3130 }
0x1c91   :  { %v1772_v19 = vsub.f32 1.0, %v3131_v4  ;;  %v1778_v41 = vmul.f32 %v3131_v4, %v1704_v50 }
0x1ce9   :  { %v1763_v6 = vpop.permute.xlu0 %1762 }
0x1cea   :  { %v1765_v7 = vmul.f32 %v3131_v4, %v1763_v6 }
0x1cec   :  { %1767 = vrot.lane.b32.xlu1 %v1765_v7, %s3388_s20 }
0x1d5e   :  { %v1768_v8 = vpop.permute.xlu1 %1767 }
0x1d5f   :  { %v1770_v9 = vadd.f32 %v1768_v8, %v1705_v60 }
0x1d61   :  { %3132 = vtanh.f32 %v1770_v9 }
0x1d6b   :  { %v3133_v10 = vpop.eup %3132 }
0x1d6c   :  { %1774 = vrot.lane.b32.xlu0 %v3133_v10, %s3391_s13 }
0x1d70   :  { %700 = vrot.lane.b32.xlu0 %v2642_v15, %s3391_s13 }
0x1d74   :  { %1082 = vrot.lane.b32.xlu0 %v2649_v18, %s3392_s7 }
0x1dde   :  { %v1775_v22 = vpop.permute.xlu0 %1774 }
0x1ddf   :  { %v1777_v23 = vmul.f32 %v1775_v22, %v1772_v19 }
0x1de1   :  { %v1779_v24 = vadd.f32 %v1778_v41, %v1777_v23 }
0x1de2   :  { %v701_v26 = vpop.permute.xlu0 %700 }
0x1de3   :  { %704 = vst.msk [vmem:[#allocation3 + $0x8] sm:$0xf] %vm443_vm5, %v701_v26  ;;  %v1781_v29 = vpack.c.bf16 %v1779_v24, %v1779_v24 }
0x1de5   :  { %1783 = vrot.lane.b32.xlu1 %v1781_v29, %s3391_s13 }
0x1de6   :  { %v1083_v34 = vpop.permute.xlu0 %1082 }
0x1de9   :  { %829 = vrot.lane.b32.xlu1 %v2644_v1, %s3391_s13 }
0x1ded   :  { %1207 = vrot.lane.b32.xlu1 %v2651_v37, %s3392_s7 }
0x1e57   :  { %v1784_v31 = vpop.permute.xlu1 %1783 }
0x1e58   :  { %2872 = vmatmul.mubr.msk.bf16.vlgmr.msra.gmra.mrb[32].mxu1 %vm467_vm4, %v1784_v31 }
0x1e59   :  { %2876 = vmatpush3.bf16.msra.mxu1 %v3888_v52  ;;  %2877 = vmatprep.mubr.msk.bf16.mxu1 %vm3387_vm0, %v3386_v0 }
0x1e5a   :  { %2881 = vmatprep.subr.bf16.mxu1 %v3386_v0 }
0x1e5b   :  { %v830_v33 = vpop.permute.xlu1 %829 }
0x1e5c   :  { %833 = vst.msk [vmem:[#allocation3 + $0xc] sm:$0xf] %vm443_vm5, %v830_v33 }
0x1e5d   :  { %1085 = vst.msk [vmem:[#allocation3 + $0xc] sm:$0xf] %vm453_vm6, %v1083_v34 }
0x1e5f   :  { %v1208_v56 = vpop.permute.xlu1 %1207 }
0x1e60   :  { %1210 = vst.msk [vmem:[#allocation3 + $0x8] sm:$0xf] %vm453_vm6, %v1208_v56  ;;  %v2645_v56 = vpack.c.bf16 %v3753_v54, %v3753_v54 }
0x1e67   :  { %v3020_v32 = vld [vmem:[#allocation3 + $0x8] sm:$0xff]  }
0x1e68   :  { %2842 = vmatmul.mubr.msk.bf16.gmra.mrb[36].mxu0 %vm219_vm2, %v3020_v32  ;;  %v2647_v32 = vpack.c.bf16 %v3779_v43, %v3779_v43 }
0x1e69   :  { %2845 = vmatprep.mubr.msk.bf16.mxu0 %vm3387_vm0, %v3386_v0 }
0x1f2b   :  { %v1822_v35 = vpop.f32.mrb[32].mxu1 }
0x1f2c   :  { %v1835_v36 = vadd.f32 %v1822_v35, %v3912_v11  ;;  %v2873_v16 = vpop.f32.mrb[33].mxu1 }
0x1f2d   :  { %v1825_v38 = vpop.f32.mrb[34].mxu1 }
0x1f2e   :  { %1837 = vrot.lane.b32.xlu0 %v1835_v36, %s3390_s12  ;;  %v2874_v39 = vpop.f32.mrb[35].mxu1  ;;  %v3188_v36 = vld [vmem:[#allocation2 + $0x40] sm:$0xff] }
0x1f2f   :  { %v1391_v16 = vadd.f32 %v3188_v36, %v3874_v27 }
0x1f31   :  { %v2596_v38 = vmul.f32 -1.442695, %v1391_v16 }
0x1f3b   :  { %v1586_v40 = vpop.f32.mrb[36].mxu0 }
0x1f3c   :  { %v1587_v45 = vadd.f32 %v3925_v21, %v1586_v40  ;;  %v2843_v46 = vpop.f32.mrb[37].mxu0 }
0x1f3d   :  { %v1589_v47 = vpop.f32.mrb[38].mxu0 }
0x1f3e   :  { %1618 = vst.msk [vmem:[#allocation2 + $0x10] sm:$0xff] %vm307_vm3, %v1587_v45  ;;  %v1590_v55 = vadd.f32 %v3925_v21, %v1589_v47  ;;  %v2844_v48 = vpop.f32.mrb[39].mxu0 }
0x1f3f   :  { %v2646_v48 = vpack.c.bf16 %v3781_v44, %v3781_v44 }
0x1f40   :  { %1619 = vst.msk [vmem:[#allocation2 + $0x18] sm:$0xff] %vm307_vm3, %v1590_v55 }
0x1f45   :  { %v1780_v49 = vld [vmem:[#allocation2 + $0x10] sm:$0xff] }
0x1f46   :  { %v1828_v50 = vadd.f32 %v1822_v35, %v1780_v49  ;;  %v1398_v35 = vadd.f32 %v3874_v27, %v3635_v51 }
0x1f47   :  { %v1855_v22 = vld [vmem:[#allocation2 + $0x18] sm:$0xff] }
0x1f48   :  { %v2621_v5 = vmul.f32 -1.442695, %v1828_v50 }
0x1f4a   :  { %3134 = vpow2.f32 %v2621_v5 }
0x1f54   :  { %v3135_v25 = vpop.eup %3134 }
0x1f55   :  { %v1832_v53 = vadd.f32 1.0, %v3135_v25  ;;  %v2648_v25 = vpack.c.bf16 %v3811_v17, %v3811_v17 }
0x1f57   :  { %3136 = vrcp.f32 %v1832_v53 }
0x1f61   :  { %v3137_v59 = vpop.eup %3136 }
0x1f62   :  { %v1847_v62 = vsub.f32 1.0, %v3137_v59  ;;  %v1853_v3 = vmul.f32 %v3137_v59, %v1779_v24 }
0x1fa0   :  { %v1838_v57 = vpop.permute.xlu0 %1837 }
0x1fa1   :  { %v1840_v13 = vmul.f32 %v3137_v59, %v1838_v57 }
0x1fa3   :  { %1842 = vrot.lane.b32.xlu1 %v1840_v13, %s3388_s20 }
0x2015   :  { %v1843_v58 = vpop.permute.xlu1 %1842 }
0x2016   :  { %v1845_v60 = vadd.f32 %v1843_v58, %v1780_v49 }
0x2018   :  { %3138 = vtanh.f32 %v1845_v60  ;;  %v2641_v60 = vpack.c.bf16 %v3685_v12, %v3685_v12 }
0x2022   :  { %v3139_v61 = vpop.eup %3138 }
0x2023   :  { %1849 = vrot.lane.b32.xlu0 %v3139_v61, %s3391_s13  ;;  %v2650_v61 = vpack.c.bf16 %v3841_v28, %v3841_v28 }
0x2095   :  { %v1850_v2 = vpop.permute.xlu0 %1849 }
0x2096   :  { %v1852_v4 = vmul.f32 %v1850_v2, %v1847_v62  ;;  %v2639_v62 = vpack.c.bf16 %v3655_v30, %v3655_v30 }
0x2098   :  { %v1854_v6 = vadd.f32 %v1853_v3, %v1852_v4 }
0x209a   :  { %v1856_v7 = vpack.c.bf16 %v1854_v6, %v1854_v6 }
0x209c   :  { %1858 = vrot.lane.b32.xlu1 %v1856_v7, %s3391_s13 }
0x210e   :  { %v1859_v8 = vpop.permute.xlu1 %1858 }
0x210f   :  { %2878 = vmatmul.mubr.msk.bf16.vlgmr.msra.gmra.mrb[36].mxu1 %vm467_vm4, %v1859_v8 }
0x2110   :  { %2882 = vmatpush3.bf16.msra.mxu1 %v3888_v52  ;;  %2883 = vmatprep.mubr.msk.bf16.mxu1 %vm3387_vm0, %v3386_v0 }
0x2111   :  { %2893 = vmatprep.subr.bf16.mxu1 %v3386_v0 }
0x21e2   :  { %v1897_v9 = vpop.f32.mrb[36].mxu1 }
0x21e3   :  { %v1910_v10 = vadd.f32 %v1897_v9, %v3912_v11  ;;  %v2879_v15 = vpop.f32.mrb[37].mxu1  ;;  %v1903_v41 = vadd.f32 %v1897_v9, %v1855_v22 }
0x21e4   :  { %v1900_v18 = vpop.f32.mrb[38].mxu1 }
0x21e5   :  { %1912 = vrot.lane.b32.xlu0 %v1910_v10, %s3390_s12  ;;  %v2880_v19 = vpop.f32.mrb[39].mxu1  ;;  %v2623_v23 = vmul.f32 -1.442695, %v1903_v41 }
0x21e7   :  { %3140 = vpow2.f32 %v2623_v23 }
0x21f1   :  { %v3141_v24 = vpop.eup %3140 }
0x21f2   :  { %v1907_v26 = vadd.f32 1.0, %v3141_v24 }
0x21f4   :  { %3142 = vrcp.f32 %v1907_v26 }
0x21fe   :  { %v3143_v29 = vpop.eup %3142 }
0x21ff   :  { %v1922_v54 = vsub.f32 1.0, %v3143_v29  ;;  %v1928_v46 = vmul.f32 %v3143_v29, %v1854_v6 }
0x2257   :  { %v1913_v1 = vpop.permute.xlu0 %1912 }
0x2258   :  { %v1915_v37 = vmul.f32 %v3143_v29, %v1913_v1 }
0x225a   :  { %1917 = vrot.lane.b32.xlu1 %v1915_v37, %s3388_s20 }
0x22cc   :  { %v1918_v31 = vpop.permute.xlu1 %1917 }
0x22cd   :  { %v1920_v33 = vadd.f32 %v1918_v31, %v1855_v22 }
0x22cf   :  { %3144 = vtanh.f32 %v1920_v33 }
0x22d0   :  { %3146 = vpow2.f32 %v2596_v38  ;;  %v2652_v38 = vpack.c.bf16 %v3865_v42, %v3865_v42 }
0x22d9   :  { %v3145_v34 = vpop.eup %3144 }
0x22da   :  { %1924 = vrot.lane.b32.xlu0 %v3145_v34, %s3391_s13  ;;  %v3147_v39 = vpop.eup %3146 }
0x22db   :  { %v1395_v40 = vadd.f32 1.0, %v3147_v39 }
0x22dd   :  { %3148 = vrcp.f32 %v1395_v40 }
0x22de   :  { %838 = vrot.lane.b32.xlu0 %v2645_v56, %s3392_s7 }
0x22e2   :  { %957 = vrot.lane.b32.xlu0 %v2647_v32, %s3392_s7 }
0x22e6   :  { %1400 = vrot.lane.b32.xlu0 %v1398_v35, %s3390_s12 }
0x22e7   :  { %v4005_v49 = vpop.eup %3148 }
0x22e8   :  { %v1410_v32 = vsub.f32 1.0, %v4005_v49  ;;  %v1416_v16 = vmul.f32 %v4005_v49, %v3865_v42 }
0x234c   :  { %v1925_v45 = vpop.permute.xlu0 %1924 }
0x234d   :  { %v1927_v47 = vmul.f32 %v1925_v45, %v1922_v54 }
0x234f   :  { %v3996_v43 = vadd.f32 %v1928_v46, %v1927_v47 }
0x2350   :  { %v839_v55 = vpop.permute.xlu0 %838 }
0x2351   :  { %842 = vst.msk [vmem:[#allocation3 + $0x14] sm:$0xf] %vm453_vm6, %v839_v55  ;;  %v1931_v51 = vpack.c.bf16 %v3996_v43, %v3996_v43 }
0x2353   :  { %1933 = vrot.lane.b32.xlu1 %v1931_v51, %s3391_s13 }
0x2354   :  { %v958_v27 = vpop.permute.xlu0 %957 }
0x2357   :  { %948 = vrot.lane.b32.xlu1 %v2646_v48, %s3391_s13 }
0x2358   :  { %v1401_v50 = vpop.permute.xlu0 %1400 }
0x2359   :  { %v1403_v5 = vmul.f32 %v4005_v49, %v1401_v50 }
0x235b   :  { %1074 = vrot.lane.b32.xlu1 %v2648_v25, %s3391_s13  ;;  %1405 = vrot.lane.b32.xlu0 %v1403_v5, %s3388_s20 }
0x23c5   :  { %v1934_v53 = vpop.permute.xlu1 %1933 }
0x23c6   :  { %2884 = vmatmul.mubr.msk.bf16.vlgmr.msra.gmra.mrb[40].mxu1 %vm467_vm4, %v1934_v53 }
0x23c7   :  { %2894 = vmatpush3.bf16.msra.mxu1 %v3888_v52  ;;  %2895 = vmatprep.mubr.msk.bf16.mxu1 %vm3387_vm0, %v3386_v0 }
0x23c8   :  { %2905 = vmatprep.subr.bf16.mxu1 %v3386_v0 }
0x23c9   :  { %v949_v44 = vpop.permute.xlu1 %948 }
0x23ca   :  { %952 = vst.msk [vmem:[#allocation3 + $0x10] sm:$0xf] %vm443_vm5, %v949_v44 }
0x23cb   :  { %960 = vst.msk [vmem:[#allocation3 + $0x10] sm:$0xf] %vm453_vm6, %v958_v27 }
0x23cd   :  { %v1075_v17 = vpop.permute.xlu1 %1074  ;;  %v1406_v59 = vpop.permute.xlu0 %1405 }
0x23ce   :  { %1077 = vst.msk [vmem:[#allocation3 + $0x14] sm:$0xf] %vm443_vm5, %v1075_v17  ;;  %v1408_v57 = vadd.f32 %v3188_v36, %v1406_v59  ;;  %v2643_v36 = vpack.c.bf16 %v3719_v63, %v3719_v63 }
0x23d0   :  { %3150 = vtanh.f32 %v1408_v57 }
0x23d5   :  { %v3021_v13 = vld [vmem:[#allocation3 + $0x10] sm:$0xff]  }
0x23d6   :  { %2846 = vmatmul.mubr.msk.bf16.gmra.mrb[40].mxu0 %vm219_vm2, %v3021_v13 }
0x23d7   :  { %2849 = vmatprep.mubr.msk.bf16.mxu0 %vm3387_vm0, %v3386_v0 }
0x23da   :  { %v3151_v58 = vpop.eup %3150 }
0x23db   :  { %1412 = vrot.lane.b32.xlu0 %v3151_v58, %s3391_s13 }
0x23df   :  { %580 = vrot.lane.b32.xlu0 %v2641_v60, %s3392_s7 }
0x23e3   :  { %1199 = vrot.lane.b32.xlu0 %v2650_v61, %s3391_s13 }
0x23e7   :  { %449 = vrot.lane.b32.xlu0 %v2639_v62, %s3392_s7 }
0x244d   :  { %v1413_v2 = vpop.permute.xlu0 %1412 }
0x244e   :  { %v1415_v35 = vmul.f32 %v1413_v2, %v1410_v32 }
0x2450   :  { %v1417_v39 = vadd.f32 %v1416_v16, %v1415_v35 }
0x2451   :  { %v581_v3 = vpop.permute.xlu0 %580 }
0x2452   :  { %584 = vst.msk [vmem:[#allocation3 + $0x1c] sm:$0xf] %vm453_vm6, %v581_v3  ;;  %v2654_v40 = vpack.c.bf16 %v1417_v39, %v1417_v39 }
0x2455   :  { %v1200_v4 = vpop.permute.xlu0 %1199 }
0x2459   :  { %v450_v6 = vpop.permute.xlu0 %449 }
0x245a   :  { %454 = vst.msk [vmem:[#allocation3 + $0x20] sm:$0xf] %vm453_vm6, %v450_v6 }
0x2499   :  { %v1972_v12 = vpop.f32.mrb[40].mxu1 }
0x249a   :  { %v1985_v7 = vadd.f32 %v1972_v12, %v3912_v11  ;;  %v2885_v8 = vpop.f32.mrb[41].mxu1 }
0x249b   :  { %v1975_v28 = vpop.f32.mrb[42].mxu1 }
0x249c   :  { %1987 = vrot.lane.b32.xlu1 %v1985_v7, %s3390_s12  ;;  %v2886_v9 = vpop.f32.mrb[43].mxu1 }
0x24a9   :  { %v1594_v10 = vpop.f32.mrb[40].mxu0 }
0x24aa   :  { %v1595_v30 = vadd.f32 %v3925_v21, %v1594_v10  ;;  %v2847_v15 = vpop.f32.mrb[41].mxu0 }
0x24ab   :  { %v1597_v18 = vpop.f32.mrb[42].mxu0 }
0x24ac   :  { %1620 = vst.msk [vmem:[#allocation2 + $0x20] sm:$0xff] %vm307_vm3, %v1595_v30  ;;  %v1598_v19 = vadd.f32 %v3925_v21, %v1597_v18  ;;  %v2848_v22 = vpop.f32.mrb[43].mxu0 }
0x24ae   :  { %1621 = vst.msk [vmem:[#allocation2 + $0x28] sm:$0xff] %vm307_vm3, %v1598_v19 }
0x24b3   :  { %v1930_v41 = vld [vmem:[#allocation2 + $0x20] sm:$0xff] }
0x24b4   :  { %v1978_v23 = vadd.f32 %v1972_v12, %v1930_v41 }
0x24b5   :  { %v2005_v6 = vld [vmem:[#allocation2 + $0x28] sm:$0xff] }
0x24b6   :  { %v2625_v24 = vmul.f32 -1.442695, %v1978_v23 }
0x24b8   :  { %3152 = vpow2.f32 %v2625_v24 }
0x24c2   :  { %v3153_v26 = vpop.eup %3152 }
0x24c3   :  { %v1982_v29 = vadd.f32 1.0, %v3153_v26 }
0x24c5   :  { %3154 = vrcp.f32 %v1982_v29 }
0x24cf   :  { %v3155_v1 = vpop.eup %3154 }
0x24d0   :  { %v1997_v54 = vsub.f32 1.0, %v3155_v1  ;;  %v2003_v46 = vmul.f32 %v3155_v1, %v3996_v43 }
0x250e   :  { %v1988_v37 = vpop.permute.xlu1 %1987 }
0x250f   :  { %v1990_v31 = vmul.f32 %v3155_v1, %v1988_v37 }
0x2511   :  { %1992 = vrot.lane.b32.xlu1 %v1990_v31, %s3388_s20 }
0x2583   :  { %v1993_v33 = vpop.permute.xlu1 %1992 }
0x2584   :  { %v1995_v34 = vadd.f32 %v1993_v33, %v1930_v41 }
0x2586   :  { %3156 = vtanh.f32 %v1995_v34 }
0x2590   :  { %v3157_v56 = vpop.eup %3156 }
0x2591   :  { %1999 = vrot.lane.b32.xlu1 %v3157_v56, %s3391_s13 }
0x2595   :  { %709 = vrot.lane.b32.xlu1 %v2643_v36, %s3392_s7 }
0x2599   :  { %1324 = vrot.lane.b32.xlu1 %v2652_v38, %s3391_s13 }
0x259d   :  { %1449 = vrot.lane.b32.xlu1 %v2654_v40, %s3391_s13 }
0x2603   :  { %v2000_v45 = vpop.permute.xlu1 %1999 }
0x2604   :  { %v2002_v47 = vmul.f32 %v2000_v45, %v1997_v54 }
0x2606   :  { %v2004_v63 = vadd.f32 %v2003_v46, %v2002_v47 }
0x2607   :  { %v710_v55 = vpop.permute.xlu1 %709 }
0x2608   :  { %v2006_v51 = vpack.c.bf16 %v2004_v63, %v2004_v63  ;;  %713 = vst.msk [vmem:[#allocation3 + $0x18] sm:$0xf] %vm453_vm6, %v710_v55 }
0x2609   :  { %1202 = vst.msk [vmem:[#allocation3 + $0x18] sm:$0xf] %vm443_vm5, %v1200_v4 }
0x260a   :  { %2008 = vrot.lane.b32.xlu0 %v2006_v51, %s3391_s13 }
0x260b   :  { %v1325_v42 = vpop.permute.xlu1 %1324 }
0x260c   :  { %1327 = vst.msk [vmem:[#allocation3 + $0x1c] sm:$0xf] %vm443_vm5, %v1325_v42 }
0x260f   :  { %v1450_v27 = vpop.permute.xlu1 %1449 }
0x2610   :  { %1452 = vst.msk [vmem:[#allocation3 + $0x20] sm:$0xf] %vm443_vm5, %v1450_v27 }
0x2613   :  { %v3022_v48 = vld [vmem:[#allocation3 + $0x18] sm:$0xff]  }
0x2614   :  { %2850 = vmatmul.mubr.msk.bf16.gmra.mrb[44].mxu0 %vm219_vm2, %v3022_v48 }
0x2615   :  { %2853 = vmatprep.mubr.msk.bf16.mxu0 %vm3387_vm0, %v3386_v0 }
0x2617   :  { %v3023_v43 = vld [vmem:[#allocation3 + $0x20] ss:$0 sps:$4 sm:$0xff]  }
0x261c   :  { %2854 = vmatmul.mubr.msk.bf16.gmra.mrb[48].mxu0 %vm219_vm2, %v3023_v43 }
0x261d   :  { %2889 = vmatprep.mubr.msk.bf16.mxu0 %vm3387_vm0, %v3386_v0 }
0x267c   :  { %v2009_v49 = vpop.permute.xlu0 %2008 }
0x267d   :  { %2890 = vmatmul.mubr.msk.bf16.vlgmr.msra.gmra.mrb[52].mxu0 %vm467_vm4, %v2009_v49 }
0x267e   :  { %2900 = vmatpush3.bf16.msra.mxu0 %v3888_v52  ;;  %2901 = vmatprep.mubr.msk.bf16.mxu0 %vm3387_vm0, %v3386_v0 }
0x267f   :  { %2957 = vmatprep.subr.bf16.mxu0 %v3389_v20 }
0x26e7   :  { %v1602_v50 = vpop.f32.mrb[44].mxu0 }
0x26e8   :  { %v1603_v5 = vadd.f32 %v3925_v21, %v1602_v50  ;;  %v2851_v25 = vpop.f32.mrb[45].mxu0 }
0x26e9   :  { %v1605_v53 = vpop.f32.mrb[46].mxu0 }
0x26ea   :  { %1622 = vst.msk [vmem:[#allocation2 + $0x30] sm:$0xff] %vm307_vm3, %v1603_v5  ;;  %v1606_v44 = vadd.f32 %v3925_v21, %v1605_v53  ;;  %v2852_v17 = vpop.f32.mrb[47].mxu0 }
0x26ec   :  { %1623 = vst.msk [vmem:[#allocation2 + $0x38] sm:$0xff] %vm307_vm3, %v1606_v44 }
0x26ef   :  { %v1610_v59 = vpop.f32.mrb[48].mxu0 }
0x26f0   :  { %v1611_v57 = vadd.f32 %v3925_v21, %v1610_v59  ;;  %v2855_v13 = vpop.f32.mrb[49].mxu0 }
0x26f1   :  { %v1613_v58 = vpop.f32.mrb[50].mxu0  ;;  %v2080_v56 = vld [vmem:[#allocation2 + $0x30] sm:$0xff] }
0x26f2   :  { %1624 = vst.msk [vmem:[#allocation2 + $0x40] sm:$0xff] %vm307_vm3, %v1611_v57  ;;  %v2856_v60 = vpop.f32.mrb[51].mxu0 }
0x26f3   :  { %v2155_v25 = vld [vmem:[#allocation2 + $0x38] sm:$0xff] }
0x2750   :  { %v2047_v61 = vpop.f32.mrb[52].mxu0 }
0x2751   :  { %v2060_v62 = vadd.f32 %v2047_v61, %v3912_v11  ;;  %v2891_v2 = vpop.f32.mrb[53].mxu0  ;;  %v2053_v12 = vadd.f32 %v2047_v61, %v2005_v6 }
0x2752   :  { %v2050_v3 = vpop.f32.mrb[54].mxu0 }
0x2753   :  { %2062 = vrot.lane.b32.xlu1 %v2060_v62, %s3390_s12  ;;  %v2892_v4 = vpop.f32.mrb[55].mxu0  ;;  %v2627_v7 = vmul.f32 -1.442695, %v2053_v12 }
0x2755   :  { %3158 = vpow2.f32 %v2627_v7 }
0x275f   :  { %v3159_v8 = vpop.eup %3158 }
0x2760   :  { %v2057_v28 = vadd.f32 1.0, %v3159_v8  ;;  %v2305_v8 = vld [vmem:[#allocation2 + $0x40] sm:$0xff] }
0x2762   :  { %3160 = vrcp.f32 %v2057_v28  ;;  %v2634_v28 = vmul.f32 -1.442695, %v2305_v8 }
0x276c   :  { %v3161_v21 = vpop.eup %3160 }
0x276d   :  { %v2072_v19 = vsub.f32 1.0, %v3161_v21  ;;  %v2078_v41 = vmul.f32 %v3161_v21, %v2004_v63 }
0x27c5   :  { %v2063_v9 = vpop.permute.xlu1 %2062 }
0x27c6   :  { %v2065_v10 = vmul.f32 %v3161_v21, %v2063_v9 }
0x27c8   :  { %2067 = vrot.lane.b32.xlu0 %v2065_v10, %s3388_s20 }
0x283a   :  { %v2068_v30 = vpop.permute.xlu0 %2067 }
0x283b   :  { %v2070_v15 = vadd.f32 %v2068_v30, %v2005_v6 }
0x283d   :  { %3162 = vtanh.f32 %v2070_v15 }
0x2847   :  { %v3163_v18 = vpop.eup %3162 }
0x2848   :  { %2074 = vrot.lane.b32.xlu1 %v3163_v18, %s3391_s13 }
0x28ba   :  { %v2075_v22 = vpop.permute.xlu1 %2074 }
0x28bb   :  { %v2077_v23 = vmul.f32 %v2075_v22, %v2072_v19 }
0x28bd   :  { %v2079_v24 = vadd.f32 %v2078_v41, %v2077_v23 }
0x28bf   :  { %v2081_v26 = vpack.c.bf16 %v2079_v24, %v2079_v24 }
0x28c1   :  { %2083 = vrot.lane.b32.xlu0 %v2081_v26, %s3391_s13 }
0x2933   :  { %v2084_v29 = vpop.permute.xlu0 %2083 }
0x2934   :  { %2896 = vmatmul.mubr.msk.bf16.vlgmr.msra.gmra.mrb[44].mxu1 %vm467_vm4, %v2084_v29 }
0x2935   :  { %2906 = vmatpush3.bf16.msra.mxu1 %v3888_v52  ;;  %2907 = vmatprep.mubr.msk.bf16.mxu1 %vm3387_vm0, %v3386_v0 }
0x2936   :  { %2963 = vmatprep.subr.bf16.mxu1 %v3389_v20 }
0x2a07   :  { %v2122_v1 = vpop.f32.mrb[44].mxu1 }
0x2a08   :  { %v2135_v37 = vadd.f32 %v2122_v1, %v3912_v11  ;;  %v2897_v31 = vpop.f32.mrb[45].mxu1  ;;  %v2128_v32 = vadd.f32 %v2122_v1, %v2080_v56 }
0x2a09   :  { %v2125_v33 = vpop.f32.mrb[46].mxu1 }
0x2a0a   :  { %2137 = vrot.lane.b32.xlu1 %v2135_v37, %s3390_s12  ;;  %v2898_v34 = vpop.f32.mrb[47].mxu1  ;;  %v2629_v35 = vmul.f32 -1.442695, %v2128_v32 }
0x2a0c   :  { %3164 = vpow2.f32 %v2629_v35 }
0x2a16   :  { %v3165_v36 = vpop.eup %3164 }
0x2a17   :  { %v2132_v16 = vadd.f32 1.0, %v3165_v36 }
0x2a19   :  { %3166 = vrcp.f32 %v2132_v16 }
0x2a23   :  { %v3167_v52 = vpop.eup %3166 }
0x2a24   :  { %v2147_v46 = vsub.f32 1.0, %v3167_v52  ;;  %v2153_v63 = vmul.f32 %v3167_v52, %v2079_v24 }
0x2a7c   :  { %v2138_v38 = vpop.permute.xlu1 %2137 }
0x2a7d   :  { %v2140_v39 = vmul.f32 %v3167_v52, %v2138_v38 }
0x2a7f   :  { %2142 = vrot.lane.b32.xlu0 %v2140_v39, %s3388_s20  ;;  %v2345_v39 = vld [vmem:[#allocation13] sm:$0xff] }
0x2af1   :  { %v2143_v40 = vpop.permute.xlu0 %2142 }
0x2af2   :  { %v2145_v54 = vadd.f32 %v2143_v40, %v2080_v56  ;;  %v2346_v40 = vld [vmem:[#allocation13 + $0x8] sm:$0xff] }
0x2af4   :  { %3168 = vtanh.f32 %v2145_v54  ;;  %v2958_v54 = vpack.c.bf16 %v2346_v40, %v2345_v39 }
0x2afe   :  { %v3169_v45 = vpop.eup %3168 }
0x2aff   :  { %2149 = vrot.lane.b32.xlu1 %v3169_v45, %s3391_s13 }
0x2b71   :  { %v2150_v47 = vpop.permute.xlu1 %2149 }
0x2b72   :  { %v2152_v55 = vmul.f32 %v2150_v47, %v2147_v46  ;;  %v2347_v46 = vld [vmem:[#allocation13 + $0x10] sm:$0xff]  ;;  %v2348_v47 = vld [vmem:[#allocation13 + $0x18] sm:$0xff] }
0x2b74   :  { %v2154_v51 = vadd.f32 %v2153_v63, %v2152_v55  ;;  %v2961_v63 = vpack.c.bf16 %v2348_v47, %v2347_v46  ;;  %v2429_v55 = vld [vmem:[#allocation15] sm:$0xff] }
0x2b76   :  { %v2156_v42 = vpack.c.bf16 %v2154_v51, %v2154_v51 }
0x2b78   :  { %2158 = vrot.lane.b32.xlu0 %v2156_v42, %s3391_s13  ;;  %v2431_v42 = vld [vmem:[#allocation15 + $0x10] sm:$0xff] }
0x2bea   :  { %v2159_v27 = vpop.permute.xlu0 %2158 }
0x2beb   :  { %2902 = vmatmul.mubr.msk.bf16.vlgmr.msra.gmra.mrb[56].mxu0 %vm467_vm4, %v2159_v27 }
0x2bec   :  { %2919 = vmatprep.mubr.msk.f32.mxu0 %vm3387_vm0, %v3386_v0  ;;  %2959 = vmatpush3.bf16.msra.mxu0 %v2958_v54 }
0x2bed   :  { %2960 = vmatprep.subr.bf16.mxu0 %v3389_v20 }
0x2bf0   :  { %2962 = vmatpush3.bf16.msra.mxu0 %v2961_v63 }
0x2cbe   :  { %v2197_v48 = vpop.f32.mrb[56].mxu0 }
0x2cbf   :  { %v2210_v43 = vadd.f32 %v2197_v48, %v3912_v11  ;;  %v2903_v49 = vpop.f32.mrb[57].mxu0  ;;  %v2203_v53 = vadd.f32 %v2197_v48, %v2155_v25  ;;  %v2432_v48 = vld [vmem:[#allocation15 + $0x18] sm:$0xff] }
0x2cc0   :  { %v2200_v50 = vpop.f32.mrb[58].mxu0  ;;  %v2967_v49 = vpack.c.bf16 %v2432_v48, %v2431_v42 }
0x2cc1   :  { %2212 = vrot.lane.b32.xlu1 %v2210_v43, %s3390_s12  ;;  %v2904_v5 = vpop.f32.mrb[59].mxu0  ;;  %v2631_v44 = vmul.f32 -1.442695, %v2203_v53 }
0x2cc2   :  { %v2433_v5 = vld [vmem:[#allocation15 + $0x20] sm:$0xff] }
0x2cc3   :  { %3170 = vpow2.f32 %v2631_v44 }
0x2ccd   :  { %v3171_v17 = vpop.eup %3170 }
0x2cce   :  { %v2207_v59 = vadd.f32 1.0, %v3171_v17 }
0x2cd0   :  { %3172 = vrcp.f32 %v2207_v59 }
0x2cda   :  { %v3173_v57 = vpop.eup %3172 }
0x2cdb   :  { %v2222_v2 = vsub.f32 1.0, %v3173_v57  ;;  %v2228_v4 = vmul.f32 %v3173_v57, %v2154_v51  ;;  %v2430_v51 = vld [vmem:[#allocation15 + $0x8] sm:$0xff] }
0x2cdc   :  { %v2964_v27 = vpack.c.bf16 %v2430_v51, %v2429_v55 }
0x2d33   :  { %v2213_v13 = vpop.permute.xlu1 %2212 }
0x2d34   :  { %v2215_v58 = vmul.f32 %v3173_v57, %v2213_v13  ;;  %v2435_v57 = vld [vmem:[#allocation15 + $0x30] sm:$0xff]  ;;  %v2436_v13 = vld [vmem:[#allocation15 + $0x38] sm:$0xff] }
0x2d36   :  { %2217 = vrot.lane.b32.xlu0 %v2215_v58, %s3388_s20  ;;  %v2973_v58 = vpack.c.bf16 %v2436_v13, %v2435_v57 }
0x2da8   :  { %v2218_v60 = vpop.permute.xlu0 %2217 }
0x2da9   :  { %v2220_v61 = vadd.f32 %v2218_v60, %v2155_v25  ;;  %v2434_v25 = vld [vmem:[#allocation15 + $0x28] sm:$0xff]  ;;  %v2437_v60 = vld [vmem:[#allocation15 + $0x40] sm:$0xff] }
0x2daa   :  { %v2970_v59 = vpack.c.bf16 %v2434_v25, %v2433_v5 }
0x2dab   :  { %3174 = vtanh.f32 %v2220_v61  ;;  %v2438_v61 = vld [vmem:[#allocation15 + $0x48] sm:$0xff] }
0x2dac   :  { %3176 = vpow2.f32 %v2634_v28 }
0x2db5   :  { %v3175_v62 = vpop.eup %3174 }
0x2db6   :  { %2224 = vrot.lane.b32.xlu1 %v3175_v62, %s3391_s13  ;;  %v3177_v21 = vpop.eup %3176  ;;  %v2976_v62 = vpack.c.bf16 %v2438_v61, %v2437_v60 }
0x2db7   :  { %v2310_v9 = vadd.f32 1.0, %v3177_v21 }
0x2db9   :  { %3178 = vrcp.f32 %v2310_v9 }
0x2dc3   :  { %v3179_v30 = vpop.eup %3178 }
0x2dc4   :  { %v2331_v37 = vmul.f32 0.0, %v3179_v30 }
0x2e28   :  { %v2225_v3 = vpop.permute.xlu1 %2224 }
0x2e29   :  { %v2227_v6 = vmul.f32 %v2225_v3, %v2222_v2  ;;  %v2439_v2 = vld [vmem:[#allocation15 + $0x50] sm:$0xff]  ;;  %v2440_v3 = vld [vmem:[#allocation15 + $0x58] sm:$0xff] }
0x2e2b   :  { %v4098_v12 = vadd.f32 %v2228_v4, %v2227_v6  ;;  %v2979_v4 = vpack.c.bf16 %v2440_v3, %v2439_v2  ;;  %v2441_v6 = vld [vmem:[#allocation15 + $0x60] sm:$0xff] }
0x2e2d   :  { %v2231_v7 = vpack.c.bf16 %v4098_v12, %v4098_v12 }
0x2e2f   :  { %2233 = vrot.lane.b32.xlu0 %v2231_v7, %s3391_s13 }
0x2e33   :  { %2315 = vrot.lane.b32.xlu0 %v3905_v14, %s3388_s20 }
0x2ea1   :  { %v2234_v10 = vpop.permute.xlu0 %2233 }
0x2ea2   :  { %2908 = vmatmul.mubr.msk.bf16.vlgmr.msra.gmra.mrb[48].mxu1 %vm467_vm4, %v2234_v10 }
0x2ea3   :  { %2954 = vmatprep.mubr.msk.f32.mxu1 %vm3387_vm0, %v3386_v0  ;;  %v2325_v0 = vsub.f32 1.0, %v3179_v30  ;;  %2965 = vmatpush3.bf16.msra.mxu1 %v2964_v27 }
0x2ea4   :  { %2966 = vmatprep.subr.bf16.mxu1 %v3389_v20 }
0x2ea5   :  { %v2316_v15 = vpop.permute.xlu0 %2315 }
0x2ea6   :  { %v2318_v18 = vmul.f32 %v3179_v30, %v2316_v15  ;;  %v2443_v30 = vld [vmem:[#allocation15 + $0x70] sm:$0xff]  ;;  %v2444_v15 = vld [vmem:[#allocation15 + $0x78] sm:$0xff] }
0x2ea7   :  { %2968 = vmatpush3.bf16.msra.mxu1 %v2967_v49 }
0x2ea8   :  { %2320 = vrot.lane.b32.xlu0 %v2318_v18, %s3388_s20  ;;  %2969 = vmatprep.subr.bf16.mxu1 %v3389_v20  ;;  %v2985_v18 = vpack.c.bf16 %v2444_v15, %v2443_v30 }
0x2eab   :  { %2971 = vmatpush3.bf16.msra.mxu1 %v2970_v59 }
0x2eac   :  { %2972 = vmatprep.subr.bf16.mxu1 %v3389_v20 }
0x2eaf   :  { %2974 = vmatpush3.bf16.msra.mxu1 %v2973_v58 }
0x2eb0   :  { %2975 = vmatprep.subr.bf16.mxu1 %v3389_v20 }
0x2eb3   :  { %2977 = vmatpush3.bf16.msra.mxu1 %v2976_v62 }
0x2eb4   :  { %2978 = vmatprep.subr.bf16.mxu1 %v3389_v20 }
0x2eb7   :  { %2980 = vmatpush3.bf16.msra.mxu1 %v2979_v4 }
0x2eb8   :  { %2981 = vmatprep.subr.bf16.mxu1 %v3389_v20 }
0x2f1a   :  { %v2321_v19 = vpop.permute.xlu0 %2320 }
0x2f1b   :  { %v2323_v22 = vadd.f32 %v2321_v19, %v2305_v8  ;;  %v2635_v19 = vld [vmem:[%s4153_s8] ss:$0 sm:$0xff] }
0x2f1d   :  { %3180 = vtanh.f32 %v2323_v22 }
0x2f27   :  { %v3181_v14 = vpop.eup %3180 }
0x2f28   :  { %2327 = vrot.lane.b32.xlu0 %v3181_v14, %s3391_s13 }
0x2f75   :  { %v2272_v41 = vpop.f32.mrb[48].mxu1 }
0x2f76   :  { %v2285_v23 = vadd.f32 %v2272_v41, %v3912_v11  ;;  %v2909_v24 = vpop.f32.mrb[49].mxu1  ;;  %v2278_v34 = vadd.f32 %v2305_v8, %v2272_v41  ;;  %v2637_v41 = vld [vmem:[%s4155_s10] ss:$0 sm:$0xff] }
0x2f77   :  { %v2275_v26 = vpop.f32.mrb[50].mxu1 }
0x2f78   :  { %2287 = vrot.lane.b32.xlu1 %v2285_v23, %s3390_s12  ;;  %v2910_v29 = vpop.f32.mrb[51].mxu1  ;;  %v2633_v56 = vmul.f32 -1.442695, %v2278_v34 }
0x2f7a   :  { %3182 = vpow2.f32 %v2633_v56 }
0x2f84   :  { %v3183_v32 = vpop.eup %3182 }
0x2f85   :  { %v2282_v35 = vadd.f32 1.0, %v3183_v32 }
0x2f87   :  { %3184 = vrcp.f32 %v2282_v35 }
0x2f91   :  { %v3185_v36 = vpop.eup %3184 }
0x2f92   :  { %v2297_v43 = vsub.f32 1.0, %v3185_v36  ;;  %v2303_v53 = vmul.f32 %v3185_v36, %v4098_v12  ;;  %v2442_v12 = vld [vmem:[#allocation15 + $0x68] sm:$0xff] }
0x2f93   :  { %v2982_v7 = vpack.c.bf16 %v2442_v12, %v2441_v6 }
0x2f95   :  { %2983 = vmatpush3.bf16.msra.mxu1 %v2982_v7 }
0x2f96   :  { %2984 = vmatprep.subr.bf16.mxu1 %v3389_v20 }
0x2f99   :  { %2986 = vmatpush3.bf16.msra.mxu1 %v2985_v18 }
0x2f9a   :  { %v2328_v1 = vpop.permute.xlu0 %2327 }
0x2f9b   :  { %v2330_v31 = vmul.f32 %v2328_v1, %v2325_v0 }
0x2f9d   :  { %v2332_v33 = vadd.f32 %v2331_v37, %v2330_v31 }
0x2f9f   :  { %2338 = vrot.lane.b32.xlu0 %v2332_v33, %s3392_s7 }
0x2fea   :  { %v2288_v11 = vpop.permute.xlu1 %2287 }
0x2feb   :  { %v2290_v16 = vmul.f32 %v3185_v36, %v2288_v11 }
0x2fed   :  { %2292 = vrot.lane.b32.xlu1 %v2290_v16, %s3388_s20 }
0x305f   :  { %v2293_v52 = vpop.permute.xlu1 %2292 }
0x3060   :  { %v2295_v38 = vadd.f32 %v2305_v8, %v2293_v52  ;;  %v2339_v8 = vpop.permute.xlu0 %2338 }
0x3062   :  { %3186 = vtanh.f32 %v2295_v38 }
0x306c   :  { %v3187_v45 = vpop.eup %3186 }
0x306d   :  { %2299 = vrot.lane.b32.xlu1 %v3187_v45, %s3391_s13 }
0x30df   :  { %v2300_v50 = vpop.permute.xlu1 %2299 }
0x30e0   :  { %v2302_v44 = vmul.f32 %v2300_v50, %v2297_v43 }
0x30e2   :  { %v2304_v17 = vadd.f32 %v2303_v53, %v2302_v44 }
0x30e4   :  { %2334 = vrot.lane.b32.xlu1 %v2304_v17, %s3391_s13 }
0x3156   :  { %v2335_v28 = vpop.permute.xlu1 %2334 }
0x3157   :  { %v2341_v21 = vsel %vm467_vm4, %v2335_v28, %v2339_v8 }
0x3158   :  { %vm2342_vm7 = vcmp.gt.f32.partialorder %v2341_v21, 0.0  ;;  %v2343_v9 = vmul.f32 0.2, %v2341_v21 }
0x315a   :  { %v2344_v10 = vsel %vm2342_vm7, %v2341_v21, %v2343_v9 }
0x315b   :  { %2920 = vmatmul.mubr.msk.f32.vlgmr.msra.gmra.mrb[60].mxu0 %vm219_vm2, %v2344_v10 }
0x322e   :  { %v2425_v22 = vpop.f32.mrb[60].mxu0 }
0x322f   :  { %v2426_v14 = vadd.f32 %v2635_v19, %v2425_v22  ;;  %v2921_v20 = vpop.f32.mrb[61].mxu0 }
0x3231   :  { %2955 = vmatmul.mubr.f32.vlgmr.msra.gmra.mrb[52].mxu1 %v2426_v14 }
0x3304   :  { %v2518_v23 = vpop.f32.mrb[52].mxu1 }
0x3305   :  { %v2519_v24 = vadd.f32 %v2637_v41, %v2518_v23  ;;  %v2956_v26 = vpop.f32.mrb[53].mxu1 }
0x3307   :  { %2522 = vst [vmem:[#allocation16] sm:$0xff] %v2519_v24 }
0x3308   :  { %3354 = shalt.err (!%p3351_p4)
}
0x3309   :  { %s3355_s18 = scalar_lea.hbm %s4156_s11, 128 }
0x330a   :  { %p3356_p5 = scmp.ne.s32.totalorder %s4156_s11, %s3355_s18  ;;  %p3359_p6 = scmp.lt.u32.totalorder %s3355_s18, %s4156_s11 }
0x330c   :  { %p3361_p7 = pnand %p3359_p6, %p3356_p5 }
0x330e   :  { %3364 = shalt.err (!%p3361_p7)
}
0x330f   :  { %2532 = dma.vmem_to_hbm [thread:$0]  %s2530_s19, 128, %s4156_s11, [#allocation6]  }
0x3310   :  { %3373 = dma.done.wait [#allocation6], 128  }
0x3311   :  { %3374 = vsyncadd [#allocation6], 4294967168 }
0x3312   :  { %2536 = vsyncpa [#allocation5], 1 }
0x3313   :  { %2537 = vsyncpa [#allocation8], 1 }
0x3314   :  { %2538 = vsyncpa [#allocation11], 1 }
0x3315   :  { %2539 = vsyncpa [#allocation14], 1 }
0x3316   :  { %2540 = vsyncpa [#allocation6], 1 }

</bundles_post_ra>
